<compile_context>
chip_gen: v5e
topology: v5e:2x2
jax: 0.10.0
libtpu: 0.0.40
codegen_flags: <defaults>
</compile_context>

<pallas_src>
import functools

import jax
import jax.numpy as jnp
from jax import lax
from jax.experimental import pallas as pl
from jax.experimental.pallas import tpu as pltpu


def _pad_sizes(H, C):
    pad128 = lambda n: ((n + 127) // 128) * 128
    return pad128(H), pad128(2 * H), pad128(C)   # KP (x lanes), GW (gate slab), CP (logits)


# ------------------------- fused Pallas kernel -------------------------

def _textrnn_gru_kernel(x_ref, w_ref, b_ref, logits_ref, hid_ref, l1_ref,
                        *, Bp, T, H, KP, GW, CP):
    """Fused 2-layer bidirectional GRU + tanh + fc head (all widths lane-padded to 128).

    x_ref:  (T*Bp, KP)  time-major, batch- and lane-padded input (pad entries are 0)
    w_ref:  (R, 15*GW+CP) weight slab: [wih1 | whh1 | wih2f | whh2f | wih2b | fcw]
    b_ref:  (1, 12*GW+CP) bias slab:   [bgx1 | bgx2f | bgx2b | bhn1 | bhn2f | bhn2b | fcb]
    logits_ref: (Bp, CP),  hid_ref: (Bp, GW),  l1_ref: VMEM scratch (T*Bp, GW)
    Gate slabs are GW wide; within a slab fwd occupies lanes [0,H) and bwd lanes [H,2H);
    padded lanes carry zero weights/biases so they stay exactly 0 through the recurrence.
    """
    f32 = jnp.float32
    G3 = 3 * GW
    TB = T * Bp

    # static column offsets into the fused slabs
    o_wih1, o_whh1, o_wih2f, o_whh2f, o_wih2b, o_fcw = (
        0, G3, 2 * G3, 3 * G3, 4 * G3, 5 * G3)
    o_bgx1, o_bgx2f, o_bgx2b = 0, G3, 2 * G3
    o_bhn1 = 3 * G3
    o_bhn2f = o_bhn1 + GW
    o_bhn2b = o_bhn2f + GW
    o_fcb = o_bhn2b + GW

    # ---- hoisted loads / broadcasts (once, outside all loops) ----
    whh1 = w_ref[0:GW, o_whh1:o_whh1 + G3]                     # (GW, 3GW)
    whh2f = w_ref[0:GW, o_whh2f:o_whh2f + G3]                  # (GW, 3GW)
    bhn1 = jnp.broadcast_to(b_ref[0:1, o_bhn1:o_bhn1 + GW], (Bp, GW))
    bhn2f = jnp.broadcast_to(b_ref[0:1, o_bhn2f:o_bhn2f + GW], (Bp, GW))
    bhn2b = jnp.broadcast_to(b_ref[0:1, o_bhn2b:o_bhn2b + GW], (Bp, GW))

    def gru_cell(gx, gh, bhn, h):
        # gx already contains b_ih (+ folded b_hr/b_hz); b_hn stays inside r*(...)
        r = jax.nn.sigmoid(gx[:, 0:GW] + gh[:, 0:GW])
        z = jax.nn.sigmoid(gx[:, GW:2 * GW] + gh[:, GW:2 * GW])
        n = jnp.tanh(gx[:, 2 * GW:G3] + r * (gh[:, 2 * GW:G3] + bhn))
        return (1.0 - z) * n + z * h

    def rev_blocks(a):
        # reverse the T row blocks (each Bp rows, sublane aligned) of a (TB, k) value
        return jnp.concatenate(
            [a[t * Bp:(t + 1) * Bp, :] for t in range(T - 1, -1, -1)], axis=0)

    lane = lax.broadcasted_iota(jnp.int32, (TB, GW), 1)
    fwd_lane = lane < H                                        # fwd half of a gate slab
    fwd_lane3 = jnp.concatenate([fwd_lane, fwd_lane, fwd_lane], axis=1)

    # ---- layer 1: one hoisted input projection for BOTH directions (gate-interleaved) ----
    gx1 = (jnp.dot(x_ref[...], w_ref[0:KP, o_wih1:o_wih1 + G3],
                   preferred_element_type=f32)
           + b_ref[0:1, o_bgx1:o_bgx1 + G3])                   # (TB, 3GW)
    # step order: fwd lanes read time s, bwd lanes read time T-1-s (done once, off the chain)
    gx1s = jnp.where(fwd_lane3, gx1, rev_blocks(gx1))

    h1 = jnp.zeros((Bp, GW), f32)                              # lanes [0,H)=fwd, [H,2H)=bwd
    for s in range(T):                                         # fully unrolled, static offsets
        gh = jnp.dot(h1, whh1, preferred_element_type=f32)     # (Bp, 3GW)
        h1 = gru_cell(gx1s[s * Bp:(s + 1) * Bp, :], gh, bhn1, h1)
        l1_ref[s * Bp:(s + 1) * Bp, :] = h1                    # one unmasked vst per step

    # re-order bwd lanes back to time order (single lane-select off the serial chain)
    l1s = l1_ref[...]
    l1t = jnp.where(fwd_lane, l1s, rev_blocks(l1s))            # (TB, GW), lanes [0,2H) real

    # ---- layer 2 forward: hoisted projection + unrolled recurrence ----
    gx2f = (jnp.dot(l1t, w_ref[0:GW, o_wih2f:o_wih2f + G3],
                    preferred_element_type=f32)
            + b_ref[0:1, o_bgx2f:o_bgx2f + G3])                # (TB, 3GW)
    h2f = jnp.zeros((Bp, GW), f32)                             # real hidden in lanes [0,H)
    for s in range(T):
        gh = jnp.dot(h2f, whh2f, preferred_element_type=f32)
        h2f = gru_cell(gx2f[s * Bp:(s + 1) * Bp, :], gh, bhn2f, h2f)

    # ---- layer 2 backward: only the step at t = T-1 feeds output[:, -1, :] ----
    xlast = l1t[(T - 1) * Bp:TB, :]                            # (Bp, GW)
    gx2b = (jnp.dot(xlast, w_ref[0:GW, o_wih2b:o_wih2b + G3],
                    preferred_element_type=f32)
            + b_ref[0:1, o_bgx2b:o_bgx2b + G3])                # (Bp, 3GW)
    h2b = gru_cell(gx2b, jnp.zeros((Bp, G3), f32), bhn2b,
                   jnp.zeros((Bp, GW), f32))                   # real hidden in lanes [H,2H)

    # ---- head: tanh + fc (dropout = identity at inference) ----
    hid = jnp.tanh(h2f + h2b)                                  # disjoint lane support -> no concat
    hid_ref[...] = hid
    logits_ref[...] = (jnp.dot(hid, w_ref[0:GW, o_fcw:o_fcw + CP],
                               preferred_element_type=f32)
                       + b_ref[0:1, o_fcb:o_fcb + CP])


# ------------------------- wrapper -------------------------

def textrnn_gru_forward(x, w_slab, b_slab, num_labels):
    """x: (B, T, H) batch_first, like the PyTorch module. Returns (logits, hidden_state)."""
    B, T, H = x.shape
    KP, GW, CP = _pad_sizes(H, num_labels)
    Bp = max(8, ((B + 7) // 8) * 8)           # sublane pad
    TB = T * Bp

    # time-major + batch/lane pad once in XLA; everything else happens in one kernel.
    xt = jnp.transpose(x.astype(jnp.float32), (1, 0, 2))              # (T, B, H)
    xt = jnp.pad(xt, ((0, 0), (0, Bp - B), (0, KP - H)))
    x2d = xt.reshape(TB, KP)

    kernel = functools.partial(_textrnn_gru_kernel,
                               Bp=Bp, T=T, H=H, KP=KP, GW=GW, CP=CP)
    vm = pl.BlockSpec(memory_space=pltpu.MemorySpace.VMEM)

    flops = 2 * (TB * KP * 3 * GW            # layer-1 input projection
                 + 2 * T * Bp * GW * 3 * GW  # both recurrences (hidden-hidden)
                 + TB * GW * 3 * GW          # layer-2 input projection
                 + Bp * GW * 3 * GW          # layer-2 bwd single step
                 + Bp * GW * CP)             # fc head
    transcendentals = (2 * T + 1) * 3 * Bp * GW
    bytes_accessed = 4 * (TB * KP + int(w_slab.size) + int(b_slab.size)
                          + Bp * CP + Bp * GW + TB * GW)

    logits_p, hid_p = pl.pallas_call(
        kernel,
        out_shape=(jax.ShapeDtypeStruct((Bp, CP), jnp.float32),
                   jax.ShapeDtypeStruct((Bp, GW), jnp.float32)),
        in_specs=[vm, vm, vm],
        out_specs=(vm, vm),
        scratch_shapes=[pltpu.VMEM((TB, GW), jnp.float32)],
        cost_estimate=pl.CostEstimate(flops=flops,
                                      transcendentals=transcendentals,
                                      bytes_accessed=bytes_accessed),
    )(x2d, w_slab, b_slab)
    # drop batch padding and lane padding
    return logits_p[:B, :num_labels], hid_p[:B, :2 * H]


# ------------------------- parameter packing (one-time) -------------------------

def pack_params(params):
    """Fold biases, interleave directions per gate, lane-pad to 128, fuse into 2 slabs."""
    L1, L2 = params["layers"]
    H = L1["w_hh_f"].shape[0]
    C = params["fc_w"].shape[1]
    KP, GW, CP = _pad_sizes(H, C)
    R = max(KP, GW)
    f32 = jnp.float32

    def place_w(dst, w, row0, lane_off):
        # w: (rows, 3H) gate-blocked [r|z|n]; gate g -> dst[row0:, g*GW+lane_off : +H]
        r = w.shape[0]
        for g in range(3):
            dst = dst.at[row0:row0 + r,
                         g * GW + lane_off:g * GW + lane_off + H].set(
                w[:, g * H:(g + 1) * H])
        return dst

    def place_b(dst, b, lane_off):
        for g in range(3):
            dst = dst.at[0, g * GW + lane_off:g * GW + lane_off + H].set(
                b[g * H:(g + 1) * H])
        return dst

    def fold(b_ih, b_hh):
        # b_ih + [b_hr, b_hz, 0]  (b_hn must stay inside r*(...))
        return b_ih + jnp.concatenate([b_hh[:2 * H], jnp.zeros((H,), f32)])

    z3 = jnp.zeros((R, 3 * GW), f32)
    # layer 1: gates interleaved (fwd lanes [0,H), bwd lanes [H,2H) per gate slab)
    wih1 = place_w(place_w(z3, L1["w_ih_f"], 0, 0), L1["w_ih_b"], 0, H)
    whh1 = place_w(place_w(z3, L1["w_hh_f"], 0, 0), L1["w_hh_b"], H, H)
    # layer 2: fwd at lane offset 0, bwd at lane offset H (so the head needs no concat)
    wih2f = place_w(z3, L2["w_ih_f"], 0, 0)
    whh2f = place_w(z3, L2["w_hh_f"], 0, 0)
    wih2b = place_w(z3, L2["w_ih_b"], 0, H)
    fcw = jnp.zeros((R, CP), f32).at[0:2 * H, 0:C].set(params["fc_w"])
    w_slab = jnp.concatenate([wih1, whh1, wih2f, whh2f, wih2b, fcw], axis=1)

    b3 = jnp.zeros((1, 3 * GW), f32)
    bg = jnp.zeros((1, GW), f32)
    bgx1 = place_b(place_b(b3, fold(L1["b_ih_f"], L1["b_hh_f"]), 0),
                   fold(L1["b_ih_b"], L1["b_hh_b"]), H)
    bgx2f = place_b(b3, fold(L2["b_ih_f"], L2["b_hh_f"]), 0)
    bgx2b = place_b(b3, fold(L2["b_ih_b"], L2["b_hh_b"]), H)
    bhn1 = bg.at[0, 0:H].set(L1["b_hh_f"][2 * H:]).at[0, H:2 * H].set(L1["b_hh_b"][2 * H:])
    bhn2f = bg.at[0, 0:H].set(L2["b_hh_f"][2 * H:])
    bhn2b = bg.at[0, H:2 * H].set(L2["b_hh_b"][2 * H:])
    fcb = jnp.zeros((1, CP), f32).at[0, 0:C].set(params["fc_b"])
    b_slab = jnp.concatenate([bgx1, bgx2f, bgx2b, bhn1, bhn2f, bhn2b, fcb], axis=1)
    return w_slab, b_slab


# ------------------------- pure-JAX reference -------------------------

def _gru_dir_ref(x_tbd, w_ih, w_hh, b_ih, b_hh):
    H = w_hh.shape[0]
    B = x_tbd.shape[1]

    def step(h, x_t):
        gx = x_t @ w_ih + b_ih
        gh = h @ w_hh + b_hh
        r = jax.nn.sigmoid(gx[:, :H] + gh[:, :H])
        z = jax.nn.sigmoid(gx[:, H:2 * H] + gh[:, H:2 * H])
        n = jnp.tanh(gx[:, 2 * H:] + r * gh[:, 2 * H:])
        h_new = (1.0 - z) * n + z * h
        return h_new, h_new

    _, out = lax.scan(step, jnp.zeros((B, H), jnp.float32), x_tbd)
    return out


def textrnn_gru_ref(x, params):
    h_in = jnp.transpose(x.astype(jnp.float32), (1, 0, 2))
    for p in params["layers"]:
        fwd = _gru_dir_ref(h_in, p["w_ih_f"], p["w_hh_f"], p["b_ih_f"], p["b_hh_f"])
        bwd = _gru_dir_ref(h_in[::-1], p["w_ih_b"], p["w_hh_b"], p["b_ih_b"], p["b_hh_b"])[::-1]
        h_in = jnp.concatenate([fwd, bwd], axis=-1)
    last = h_in[-1]
    hidden_state = jnp.tanh(last)
    logits = hidden_state @ params["fc_w"] + params["fc_b"]
    return logits, hidden_state


# ------------------------- parameter init -------------------------

def init_params(key, hidden_size, num_labels):
    H = hidden_size
    k = 1.0 / jnp.sqrt(jnp.float32(H))

    def uni(key, shape):
        return jax.random.uniform(key, shape, jnp.float32, -k, k)

    keys = iter(jax.random.split(key, 40))
    layers = []
    for layer in range(2):
        din = H if layer == 0 else 2 * H
        layers.append({
            # stored transposed relative to PyTorch (Din, 3H) / (H, 3H) so kernels do x @ W
            "w_ih_f": uni(next(keys), (din, 3 * H)),
            "w_hh_f": uni(next(keys), (H, 3 * H)),
            "b_ih_f": uni(next(keys), (3 * H,)),
            "b_hh_f": uni(next(keys), (3 * H,)),
            "w_ih_b": uni(next(keys), (din, 3 * H)),
            "w_hh_b": uni(next(keys), (H, 3 * H)),
            "b_ih_b": uni(next(keys), (3 * H,)),
            "b_hh_b": uni(next(keys), (3 * H,)),
        })
    kf = 1.0 / jnp.sqrt(jnp.float32(2 * H))
    fc_w = jax.random.uniform(next(keys), (2 * H, num_labels), jnp.float32, -kf, kf)
    fc_b = jax.random.uniform(next(keys), (num_labels,), jnp.float32, -kf, kf)
    return {"layers": layers, "fc_w": fc_w, "fc_b": fc_b}


# ------------------------- main -------------------------

if __name__ == "__main__":
    B, T, H, C = 2, 8, 32, 3          # batch, seq_len, hidden_size, num_labels
    root = jax.random.PRNGKey(0)
    kx, kp = jax.random.split(root)
    x = jax.random.normal(kx, (B, T, H), jnp.float32)
    params = init_params(kp, H, C)
    w_slab, b_slab = pack_params(params)   # one-time repacking / folding / padding

    logits, hidden_state = textrnn_gru_forward(x, w_slab, b_slab, C)
    jax.block_until_ready((logits, hidden_state))

    ref_logits, ref_hidden = textrnn_gru_ref(x, params)
    assert logits.shape == (B, C) and hidden_state.shape == (B, 2 * H)
    assert jnp.allclose(logits, ref_logits, atol=1e-4, rtol=1e-4)
    assert jnp.allclose(hidden_state, ref_hidden, atol=1e-4, rtol=1e-4)

    print("KERNEL_OK")
</pallas_src>

<mosaic_0001>
module attributes {stable_mosaic.version = 11 : i64} {
  func.func @_textrnn_gru_kernel(%arg0: memref<64x128xf32, #tpu.memory_space<vmem>>, %arg1: memref<128x2048xf32, #tpu.memory_space<vmem>>, %arg2: memref<1x1664xf32, #tpu.memory_space<vmem>>, %arg3: memref<8x128xf32, #tpu.memory_space<vmem>>, %arg4: memref<8x128xf32, #tpu.memory_space<vmem>>, %arg5: memref<64x128xf32, #tpu.memory_space<vmem>>) attributes {dimension_semantics = [], scalar_prefetch = 0 : i64, scratch_operands = 1 : i64, tpu.core_type = #tpu.core_type<tc>} {
    %c0 = arith.constant 0 : index
    %c384 = arith.constant 384 : index
    %0 = vector.load %arg1[%c0, %c384] : memref<128x2048xf32, #tpu.memory_space<vmem>>, vector<128x384xf32>
    %c0_0 = arith.constant 0 : index
    %c1152 = arith.constant 1152 : index
    %1 = vector.load %arg1[%c0_0, %c1152] : memref<128x2048xf32, #tpu.memory_space<vmem>>, vector<128x384xf32>
    %c0_1 = arith.constant 0 : index
    %c1152_2 = arith.constant 1152 : index
    %2 = vector.load %arg2[%c0_1, %c1152_2] : memref<1x1664xf32, #tpu.memory_space<vmem>>, vector<1x128xf32>
    %3 = vector.shape_cast %2 : vector<1x128xf32> to vector<1x128xf32>
    %4 = vector.broadcast %3 : vector<1x128xf32> to vector<8x128xf32>
    %c0_3 = arith.constant 0 : index
    %c1280 = arith.constant 1280 : index
    %5 = vector.load %arg2[%c0_3, %c1280] : memref<1x1664xf32, #tpu.memory_space<vmem>>, vector<1x128xf32>
    %6 = vector.shape_cast %5 : vector<1x128xf32> to vector<1x128xf32>
    %7 = vector.broadcast %6 : vector<1x128xf32> to vector<8x128xf32>
    %c0_4 = arith.constant 0 : index
    %c1408 = arith.constant 1408 : index
    %8 = vector.load %arg2[%c0_4, %c1408] : memref<1x1664xf32, #tpu.memory_space<vmem>>, vector<1x128xf32>
    %9 = vector.shape_cast %8 : vector<1x128xf32> to vector<1x128xf32>
    %10 = vector.broadcast %9 : vector<1x128xf32> to vector<8x128xf32>
    %11 = tpu.iota {dimensions = array<i32: 1>} : vector<64x128xi32>
    %c32_i32 = arith.constant 32 : i32
    %12 = vector.broadcast %c32_i32 : i32 to vector<64x128xi32>
    %13 = arith.cmpi slt, %11, %12 : vector<64x128xi32>
    %14 = tpu.concatenate %13, %13, %13 in 1 : vector<64x128xi1>, vector<64x128xi1>, vector<64x128xi1> -> vector<64x384xi1>
    %c0_5 = arith.constant 0 : index
    %c0_6 = arith.constant 0 : index
    %15 = vector.load %arg0[%c0_5, %c0_6] : memref<64x128xf32, #tpu.memory_space<vmem>>, vector<64x128xf32>
    %c0_7 = arith.constant 0 : index
    %c0_8 = arith.constant 0 : index
    %16 = vector.load %arg1[%c0_7, %c0_8] : memref<128x2048xf32, #tpu.memory_space<vmem>>, vector<128x384xf32>
    %cst = arith.constant dense<0.000000e+00> : vector<64x384xf32>
    %17 = tpu.matmul %15, %16, %cst {dimension_numbers = #tpu.dot_dimension_numbers<[1], [0], [0], [1], [0, 0, 1, 1], [], []>} : vector<64x128xf32>, vector<128x384xf32>, vector<64x384xf32> -> vector<64x384xf32>
    %c0_9 = arith.constant 0 : index
    %c0_10 = arith.constant 0 : index
    %18 = vector.load %arg2[%c0_9, %c0_10] : memref<1x1664xf32, #tpu.memory_space<vmem>>, vector<1x384xf32>
    %19 = vector.broadcast %18 : vector<1x384xf32> to vector<64x384xf32>
    %20 = arith.addf %17, %19 : vector<64x384xf32>
    %21 = vector.extract_strided_slice %20 {offsets = [56, 0], sizes = [8, 384], strides = [1, 1]} : vector<64x384xf32> to vector<8x384xf32>
    %22 = vector.extract_strided_slice %20 {offsets = [48, 0], sizes = [8, 384], strides = [1, 1]} : vector<64x384xf32> to vector<8x384xf32>
    %23 = vector.extract_strided_slice %20 {offsets = [40, 0], sizes = [8, 384], strides = [1, 1]} : vector<64x384xf32> to vector<8x384xf32>
    %24 = vector.extract_strided_slice %20 {offsets = [32, 0], sizes = [8, 384], strides = [1, 1]} : vector<64x384xf32> to vector<8x384xf32>
    %25 = vector.extract_strided_slice %20 {offsets = [24, 0], sizes = [8, 384], strides = [1, 1]} : vector<64x384xf32> to vector<8x384xf32>
    %26 = vector.extract_strided_slice %20 {offsets = [16, 0], sizes = [8, 384], strides = [1, 1]} : vector<64x384xf32> to vector<8x384xf32>
    %27 = vector.extract_strided_slice %20 {offsets = [8, 0], sizes = [8, 384], strides = [1, 1]} : vector<64x384xf32> to vector<8x384xf32>
    %28 = vector.extract_strided_slice %20 {offsets = [0, 0], sizes = [8, 384], strides = [1, 1]} : vector<64x384xf32> to vector<8x384xf32>
    %29 = tpu.concatenate %21, %22, %23, %24, %25, %26, %27, %28 in 0 : vector<8x384xf32>, vector<8x384xf32>, vector<8x384xf32>, vector<8x384xf32>, vector<8x384xf32>, vector<8x384xf32>, vector<8x384xf32>, vector<8x384xf32> -> vector<64x384xf32>
    %30 = arith.select %14, %20, %29 : vector<64x384xi1>, vector<64x384xf32>
    %cst_11 = arith.constant 0.000000e+00 : f32
    %31 = vector.broadcast %cst_11 : f32 to vector<8x128xf32>
    %cst_12 = arith.constant dense<0.000000e+00> : vector<8x384xf32>
    %32 = tpu.matmul %31, %0, %cst_12 {dimension_numbers = #tpu.dot_dimension_numbers<[1], [0], [0], [1], [0, 0, 1, 1], [], []>} : vector<8x128xf32>, vector<128x384xf32>, vector<8x384xf32> -> vector<8x384xf32>
    %33 = vector.extract_strided_slice %30 {offsets = [0, 0], sizes = [8, 384], strides = [1, 1]} : vector<64x384xf32> to vector<8x384xf32>
    %34 = vector.extract_strided_slice %33 {offsets = [0, 0], sizes = [8, 128], strides = [1, 1]} : vector<8x384xf32> to vector<8x128xf32>
    %35 = vector.extract_strided_slice %32 {offsets = [0, 0], sizes = [8, 128], strides = [1, 1]} : vector<8x384xf32> to vector<8x128xf32>
    %36 = arith.addf %34, %35 : vector<8x128xf32>
    %37 = arith.negf %36 : vector<8x128xf32>
    %38 = math.exp %37 : vector<8x128xf32>
    %cst_13 = arith.constant 1.000000e+00 : f32
    %39 = vector.broadcast %cst_13 : f32 to vector<8x128xf32>
    %40 = arith.addf %39, %38 : vector<8x128xf32>
    %41 = arith.divf %39, %40 : vector<8x128xf32>
    %42 = vector.extract_strided_slice %33 {offsets = [0, 128], sizes = [8, 128], strides = [1, 1]} : vector<8x384xf32> to vector<8x128xf32>
    %43 = vector.extract_strided_slice %32 {offsets = [0, 128], sizes = [8, 128], strides = [1, 1]} : vector<8x384xf32> to vector<8x128xf32>
    %44 = arith.addf %42, %43 : vector<8x128xf32>
    %45 = arith.negf %44 : vector<8x128xf32>
    %46 = math.exp %45 : vector<8x128xf32>
    %cst_14 = arith.constant 1.000000e+00 : f32
    %47 = vector.broadcast %cst_14 : f32 to vector<8x128xf32>
    %48 = arith.addf %47, %46 : vector<8x128xf32>
    %49 = arith.divf %47, %48 : vector<8x128xf32>
    %50 = vector.extract_strided_slice %33 {offsets = [0, 256], sizes = [8, 128], strides = [1, 1]} : vector<8x384xf32> to vector<8x128xf32>
    %51 = vector.extract_strided_slice %32 {offsets = [0, 256], sizes = [8, 128], strides = [1, 1]} : vector<8x384xf32> to vector<8x128xf32>
    %52 = arith.addf %51, %4 : vector<8x128xf32>
    %53 = arith.mulf %41, %52 : vector<8x128xf32>
    %54 = arith.addf %50, %53 : vector<8x128xf32>
    %55 = math.tanh %54 : vector<8x128xf32>
    %cst_15 = arith.constant 1.000000e+00 : f32
    %56 = vector.broadcast %cst_15 : f32 to vector<8x128xf32>
    %57 = arith.subf %56, %49 : vector<8x128xf32>
    %58 = arith.mulf %57, %55 : vector<8x128xf32>
    %59 = arith.mulf %49, %31 : vector<8x128xf32>
    %60 = arith.addf %58, %59 : vector<8x128xf32>
    %c0_16 = arith.constant 0 : index
    %c0_17 = arith.constant 0 : index
    %61 = vector.load %arg5[%c0_16, %c0_17] : memref<64x128xf32, #tpu.memory_space<vmem>>, vector<8x128xf32>
    tpu.vector_store %arg5[%c0_16, %c0_17], %60 {strides = array<i32>} : memref<64x128xf32, #tpu.memory_space<vmem>>, vector<8x128xf32>,
    %cst_18 = arith.constant dense<0.000000e+00> : vector<8x384xf32>
    %62 = tpu.matmul %60, %0, %cst_18 {dimension_numbers = #tpu.dot_dimension_numbers<[1], [0], [0], [1], [0, 0, 1, 1], [], []>} : vector<8x128xf32>, vector<128x384xf32>, vector<8x384xf32> -> vector<8x384xf32>
    %63 = vector.extract_strided_slice %30 {offsets = [8, 0], sizes = [8, 384], strides = [1, 1]} : vector<64x384xf32> to vector<8x384xf32>
    %64 = vector.extract_strided_slice %63 {offsets = [0, 0], sizes = [8, 128], strides = [1, 1]} : vector<8x384xf32> to vector<8x128xf32>
    %65 = vector.extract_strided_slice %62 {offsets = [0, 0], sizes = [8, 128], strides = [1, 1]} : vector<8x384xf32> to vector<8x128xf32>
    %66 = arith.addf %64, %65 : vector<8x128xf32>
    %67 = arith.negf %66 : vector<8x128xf32>
    %68 = math.exp %67 : vector<8x128xf32>
    %cst_19 = arith.constant 1.000000e+00 : f32
    %69 = vector.broadcast %cst_19 : f32 to vector<8x128xf32>
    %70 = arith.addf %69, %68 : vector<8x128xf32>
    %71 = arith.divf %69, %70 : vector<8x128xf32>
    %72 = vector.extract_strided_slice %63 {offsets = [0, 128], sizes = [8, 128], strides = [1, 1]} : vector<8x384xf32> to vector<8x128xf32>
    %73 = vector.extract_strided_slice %62 {offsets = [0, 128], sizes = [8, 128], strides = [1, 1]} : vector<8x384xf32> to vector<8x128xf32>
    %74 = arith.addf %72, %73 : vector<8x128xf32>
    %75 = arith.negf %74 : vector<8x128xf32>
    %76 = math.exp %75 : vector<8x128xf32>
    %cst_20 = arith.constant 1.000000e+00 : f32
    %77 = vector.broadcast %cst_20 : f32 to vector<8x128xf32>
    %78 = arith.addf %77, %76 : vector<8x128xf32>
    %79 = arith.divf %77, %78 : vector<8x128xf32>
    %80 = vector.extract_strided_slice %63 {offsets = [0, 256], sizes = [8, 128], strides = [1, 1]} : vector<8x384xf32> to vector<8x128xf32>
    %81 = vector.extract_strided_slice %62 {offsets = [0, 256], sizes = [8, 128], strides = [1, 1]} : vector<8x384xf32> to vector<8x128xf32>
    %82 = arith.addf %81, %4 : vector<8x128xf32>
    %83 = arith.mulf %71, %82 : vector<8x128xf32>
    %84 = arith.addf %80, %83 : vector<8x128xf32>
    %85 = math.tanh %84 : vector<8x128xf32>
    %cst_21 = arith.constant 1.000000e+00 : f32
    %86 = vector.broadcast %cst_21 : f32 to vector<8x128xf32>
    %87 = arith.subf %86, %79 : vector<8x128xf32>
    %88 = arith.mulf %87, %85 : vector<8x128xf32>
    %89 = arith.mulf %79, %60 : vector<8x128xf32>
    %90 = arith.addf %88, %89 : vector<8x128xf32>
    %c8 = arith.constant 8 : index
    %c0_22 = arith.constant 0 : index
    %91 = vector.load %arg5[%c8, %c0_22] : memref<64x128xf32, #tpu.memory_space<vmem>>, vector<8x128xf32>
    tpu.vector_store %arg5[%c8, %c0_22], %90 {strides = array<i32>} : memref<64x128xf32, #tpu.memory_space<vmem>>, vector<8x128xf32>,
    %cst_23 = arith.constant dense<0.000000e+00> : vector<8x384xf32>
    %92 = tpu.matmul %90, %0, %cst_23 {dimension_numbers = #tpu.dot_dimension_numbers<[1], [0], [0], [1], [0, 0, 1, 1], [], []>} : vector<8x128xf32>, vector<128x384xf32>, vector<8x384xf32> -> vector<8x384xf32>
    %93 = vector.extract_strided_slice %30 {offsets = [16, 0], sizes = [8, 384], strides = [1, 1]} : vector<64x384xf32> to vector<8x384xf32>
    %94 = vector.extract_strided_slice %93 {offsets = [0, 0], sizes = [8, 128], strides = [1, 1]} : vector<8x384xf32> to vector<8x128xf32>
    %95 = vector.extract_strided_slice %92 {offsets = [0, 0], sizes = [8, 128], strides = [1, 1]} : vector<8x384xf32> to vector<8x128xf32>
    %96 = arith.addf %94, %95 : vector<8x128xf32>
    %97 = arith.negf %96 : vector<8x128xf32>
    %98 = math.exp %97 : vector<8x128xf32>
    %cst_24 = arith.constant 1.000000e+00 : f32
    %99 = vector.broadcast %cst_24 : f32 to vector<8x128xf32>
    %100 = arith.addf %99, %98 : vector<8x128xf32>
    %101 = arith.divf %99, %100 : vector<8x128xf32>
    %102 = vector.extract_strided_slice %93 {offsets = [0, 128], sizes = [8, 128], strides = [1, 1]} : vector<8x384xf32> to vector<8x128xf32>
    %103 = vector.extract_strided_slice %92 {offsets = [0, 128], sizes = [8, 128], strides = [1, 1]} : vector<8x384xf32> to vector<8x128xf32>
    %104 = arith.addf %102, %103 : vector<8x128xf32>
    %105 = arith.negf %104 : vector<8x128xf32>
    %106 = math.exp %105 : vector<8x128xf32>
    %cst_25 = arith.constant 1.000000e+00 : f32
    %107 = vector.broadcast %cst_25 : f32 to vector<8x128xf32>
    %108 = arith.addf %107, %106 : vector<8x128xf32>
    %109 = arith.divf %107, %108 : vector<8x128xf32>
    %110 = vector.extract_strided_slice %93 {offsets = [0, 256], sizes = [8, 128], strides = [1, 1]} : vector<8x384xf32> to vector<8x128xf32>
    %111 = vector.extract_strided_slice %92 {offsets = [0, 256], sizes = [8, 128], strides = [1, 1]} : vector<8x384xf32> to vector<8x128xf32>
    %112 = arith.addf %111, %4 : vector<8x128xf32>
    %113 = arith.mulf %101, %112 : vector<8x128xf32>
    %114 = arith.addf %110, %113 : vector<8x128xf32>
    %115 = math.tanh %114 : vector<8x128xf32>
    %cst_26 = arith.constant 1.000000e+00 : f32
    %116 = vector.broadcast %cst_26 : f32 to vector<8x128xf32>
    %117 = arith.subf %116, %109 : vector<8x128xf32>
    %118 = arith.mulf %117, %115 : vector<8x128xf32>
    %119 = arith.mulf %109, %90 : vector<8x128xf32>
    %120 = arith.addf %118, %119 : vector<8x128xf32>
    %c16 = arith.constant 16 : index
    %c0_27 = arith.constant 0 : index
    %121 = vector.load %arg5[%c16, %c0_27] : memref<64x128xf32, #tpu.memory_space<vmem>>, vector<8x128xf32>
    tpu.vector_store %arg5[%c16, %c0_27], %120 {strides = array<i32>} : memref<64x128xf32, #tpu.memory_space<vmem>>, vector<8x128xf32>,
    %cst_28 = arith.constant dense<0.000000e+00> : vector<8x384xf32>
    %122 = tpu.matmul %120, %0, %cst_28 {dimension_numbers = #tpu.dot_dimension_numbers<[1], [0], [0], [1], [0, 0, 1, 1], [], []>} : vector<8x128xf32>, vector<128x384xf32>, vector<8x384xf32> -> vector<8x384xf32>
    %123 = vector.extract_strided_slice %30 {offsets = [24, 0], sizes = [8, 384], strides = [1, 1]} : vector<64x384xf32> to vector<8x384xf32>
    %124 = vector.extract_strided_slice %123 {offsets = [0, 0], sizes = [8, 128], strides = [1, 1]} : vector<8x384xf32> to vector<8x128xf32>
    %125 = vector.extract_strided_slice %122 {offsets = [0, 0], sizes = [8, 128], strides = [1, 1]} : vector<8x384xf32> to vector<8x128xf32>
    %126 = arith.addf %124, %125 : vector<8x128xf32>
    %127 = arith.negf %126 : vector<8x128xf32>
    %128 = math.exp %127 : vector<8x128xf32>
    %cst_29 = arith.constant 1.000000e+00 : f32
    %129 = vector.broadcast %cst_29 : f32 to vector<8x128xf32>
    %130 = arith.addf %129, %128 : vector<8x128xf32>
    %131 = arith.divf %129, %130 : vector<8x128xf32>
    %132 = vector.extract_strided_slice %123 {offsets = [0, 128], sizes = [8, 128], strides = [1, 1]} : vector<8x384xf32> to vector<8x128xf32>
    %133 = vector.extract_strided_slice %122 {offsets = [0, 128], sizes = [8, 128], strides = [1, 1]} : vector<8x384xf32> to vector<8x128xf32>
    %134 = arith.addf %132, %133 : vector<8x128xf32>
    %135 = arith.negf %134 : vector<8x128xf32>
    %136 = math.exp %135 : vector<8x128xf32>
    %cst_30 = arith.constant 1.000000e+00 : f32
    %137 = vector.broadcast %cst_30 : f32 to vector<8x128xf32>
    %138 = arith.addf %137, %136 : vector<8x128xf32>
    %139 = arith.divf %137, %138 : vector<8x128xf32>
    %140 = vector.extract_strided_slice %123 {offsets = [0, 256], sizes = [8, 128], strides = [1, 1]} : vector<8x384xf32> to vector<8x128xf32>
    %141 = vector.extract_strided_slice %122 {offsets = [0, 256], sizes = [8, 128], strides = [1, 1]} : vector<8x384xf32> to vector<8x128xf32>
    %142 = arith.addf %141, %4 : vector<8x128xf32>
    %143 = arith.mulf %131, %142 : vector<8x128xf32>
    %144 = arith.addf %140, %143 : vector<8x128xf32>
    %145 = math.tanh %144 : vector<8x128xf32>
    %cst_31 = arith.constant 1.000000e+00 : f32
    %146 = vector.broadcast %cst_31 : f32 to vector<8x128xf32>
    %147 = arith.subf %146, %139 : vector<8x128xf32>
    %148 = arith.mulf %147, %145 : vector<8x128xf32>
    %149 = arith.mulf %139, %120 : vector<8x128xf32>
    %150 = arith.addf %148, %149 : vector<8x128xf32>
    %c24 = arith.constant 24 : index
    %c0_32 = arith.constant 0 : index
    %151 = vector.load %arg5[%c24, %c0_32] : memref<64x128xf32, #tpu.memory_space<vmem>>, vector<8x128xf32>
    tpu.vector_store %arg5[%c24, %c0_32], %150 {strides = array<i32>} : memref<64x128xf32, #tpu.memory_space<vmem>>, vector<8x128xf32>,
    %cst_33 = arith.constant dense<0.000000e+00> : vector<8x384xf32>
    %152 = tpu.matmul %150, %0, %cst_33 {dimension_numbers = #tpu.dot_dimension_numbers<[1], [0], [0], [1], [0, 0, 1, 1], [], []>} : vector<8x128xf32>, vector<128x384xf32>, vector<8x384xf32> -> vector<8x384xf32>
    %153 = vector.extract_strided_slice %30 {offsets = [32, 0], sizes = [8, 384], strides = [1, 1]} : vector<64x384xf32> to vector<8x384xf32>
    %154 = vector.extract_strided_slice %153 {offsets = [0, 0], sizes = [8, 128], strides = [1, 1]} : vector<8x384xf32> to vector<8x128xf32>
    %155 = vector.extract_strided_slice %152 {offsets = [0, 0], sizes = [8, 128], strides = [1, 1]} : vector<8x384xf32> to vector<8x128xf32>
    %156 = arith.addf %154, %155 : vector<8x128xf32>
    %157 = arith.negf %156 : vector<8x128xf32>
    %158 = math.exp %157 : vector<8x128xf32>
    %cst_34 = arith.constant 1.000000e+00 : f32
    %159 = vector.broadcast %cst_34 : f32 to vector<8x128xf32>
    %160 = arith.addf %159, %158 : vector<8x128xf32>
    %161 = arith.divf %159, %160 : vector<8x128xf32>
    %162 = vector.extract_strided_slice %153 {offsets = [0, 128], sizes = [8, 128], strides = [1, 1]} : vector<8x384xf32> to vector<8x128xf32>
    %163 = vector.extract_strided_slice %152 {offsets = [0, 128], sizes = [8, 128], strides = [1, 1]} : vector<8x384xf32> to vector<8x128xf32>
    %164 = arith.addf %162, %163 : vector<8x128xf32>
    %165 = arith.negf %164 : vector<8x128xf32>
    %166 = math.exp %165 : vector<8x128xf32>
    %cst_35 = arith.constant 1.000000e+00 : f32
    %167 = vector.broadcast %cst_35 : f32 to vector<8x128xf32>
    %168 = arith.addf %167, %166 : vector<8x128xf32>
    %169 = arith.divf %167, %168 : vector<8x128xf32>
    %170 = vector.extract_strided_slice %153 {offsets = [0, 256], sizes = [8, 128], strides = [1, 1]} : vector<8x384xf32> to vector<8x128xf32>
    %171 = vector.extract_strided_slice %152 {offsets = [0, 256], sizes = [8, 128], strides = [1, 1]} : vector<8x384xf32> to vector<8x128xf32>
    %172 = arith.addf %171, %4 : vector<8x128xf32>
    %173 = arith.mulf %161, %172 : vector<8x128xf32>
    %174 = arith.addf %170, %173 : vector<8x128xf32>
    %175 = math.tanh %174 : vector<8x128xf32>
    %cst_36 = arith.constant 1.000000e+00 : f32
    %176 = vector.broadcast %cst_36 : f32 to vector<8x128xf32>
    %177 = arith.subf %176, %169 : vector<8x128xf32>
    %178 = arith.mulf %177, %175 : vector<8x128xf32>
    %179 = arith.mulf %169, %150 : vector<8x128xf32>
    %180 = arith.addf %178, %179 : vector<8x128xf32>
    %c32 = arith.constant 32 : index
    %c0_37 = arith.constant 0 : index
    %181 = vector.load %arg5[%c32, %c0_37] : memref<64x128xf32, #tpu.memory_space<vmem>>, vector<8x128xf32>
    tpu.vector_store %arg5[%c32, %c0_37], %180 {strides = array<i32>} : memref<64x128xf32, #tpu.memory_space<vmem>>, vector<8x128xf32>,
    %cst_38 = arith.constant dense<0.000000e+00> : vector<8x384xf32>
    %182 = tpu.matmul %180, %0, %cst_38 {dimension_numbers = #tpu.dot_dimension_numbers<[1], [0], [0], [1], [0, 0, 1, 1], [], []>} : vector<8x128xf32>, vector<128x384xf32>, vector<8x384xf32> -> vector<8x384xf32>
    %183 = vector.extract_strided_slice %30 {offsets = [40, 0], sizes = [8, 384], strides = [1, 1]} : vector<64x384xf32> to vector<8x384xf32>
    %184 = vector.extract_strided_slice %183 {offsets = [0, 0], sizes = [8, 128], strides = [1, 1]} : vector<8x384xf32> to vector<8x128xf32>
    %185 = vector.extract_strided_slice %182 {offsets = [0, 0], sizes = [8, 128], strides = [1, 1]} : vector<8x384xf32> to vector<8x128xf32>
    %186 = arith.addf %184, %185 : vector<8x128xf32>
    %187 = arith.negf %186 : vector<8x128xf32>
    %188 = math.exp %187 : vector<8x128xf32>
    %cst_39 = arith.constant 1.000000e+00 : f32
    %189 = vector.broadcast %cst_39 : f32 to vector<8x128xf32>
    %190 = arith.addf %189, %188 : vector<8x128xf32>
    %191 = arith.divf %189, %190 : vector<8x128xf32>
    %192 = vector.extract_strided_slice %183 {offsets = [0, 128], sizes = [8, 128], strides = [1, 1]} : vector<8x384xf32> to vector<8x128xf32>
    %193 = vector.extract_strided_slice %182 {offsets = [0, 128], sizes = [8, 128], strides = [1, 1]} : vector<8x384xf32> to vector<8x128xf32>
    %194 = arith.addf %192, %193 : vector<8x128xf32>
    %195 = arith.negf %194 : vector<8x128xf32>
    %196 = math.exp %195 : vector<8x128xf32>
    %cst_40 = arith.constant 1.000000e+00 : f32
    %197 = vector.broadcast %cst_40 : f32 to vector<8x128xf32>
    %198 = arith.addf %197, %196 : vector<8x128xf32>
    %199 = arith.divf %197, %198 : vector<8x128xf32>
    %200 = vector.extract_strided_slice %183 {offsets = [0, 256], sizes = [8, 128], strides = [1, 1]} : vector<8x384xf32> to vector<8x128xf32>
    %201 = vector.extract_strided_slice %182 {offsets = [0, 256], sizes = [8, 128], strides = [1, 1]} : vector<8x384xf32> to vector<8x128xf32>
    %202 = arith.addf %201, %4 : vector<8x128xf32>
    %203 = arith.mulf %191, %202 : vector<8x128xf32>
    %204 = arith.addf %200, %203 : vector<8x128xf32>
    %205 = math.tanh %204 : vector<8x128xf32>
    %cst_41 = arith.constant 1.000000e+00 : f32
    %206 = vector.broadcast %cst_41 : f32 to vector<8x128xf32>
    %207 = arith.subf %206, %199 : vector<8x128xf32>
    %208 = arith.mulf %207, %205 : vector<8x128xf32>
    %209 = arith.mulf %199, %180 : vector<8x128xf32>
    %210 = arith.addf %208, %209 : vector<8x128xf32>
    %c40 = arith.constant 40 : index
    %c0_42 = arith.constant 0 : index
    %211 = vector.load %arg5[%c40, %c0_42] : memref<64x128xf32, #tpu.memory_space<vmem>>, vector<8x128xf32>
    tpu.vector_store %arg5[%c40, %c0_42], %210 {strides = array<i32>} : memref<64x128xf32, #tpu.memory_space<vmem>>, vector<8x128xf32>,
    %cst_43 = arith.constant dense<0.000000e+00> : vector<8x384xf32>
    %212 = tpu.matmul %210, %0, %cst_43 {dimension_numbers = #tpu.dot_dimension_numbers<[1], [0], [0], [1], [0, 0, 1, 1], [], []>} : vector<8x128xf32>, vector<128x384xf32>, vector<8x384xf32> -> vector<8x384xf32>
    %213 = vector.extract_strided_slice %30 {offsets = [48, 0], sizes = [8, 384], strides = [1, 1]} : vector<64x384xf32> to vector<8x384xf32>
    %214 = vector.extract_strided_slice %213 {offsets = [0, 0], sizes = [8, 128], strides = [1, 1]} : vector<8x384xf32> to vector<8x128xf32>
    %215 = vector.extract_strided_slice %212 {offsets = [0, 0], sizes = [8, 128], strides = [1, 1]} : vector<8x384xf32> to vector<8x128xf32>
    %216 = arith.addf %214, %215 : vector<8x128xf32>
    %217 = arith.negf %216 : vector<8x128xf32>
    %218 = math.exp %217 : vector<8x128xf32>
    %cst_44 = arith.constant 1.000000e+00 : f32
    %219 = vector.broadcast %cst_44 : f32 to vector<8x128xf32>
    %220 = arith.addf %219, %218 : vector<8x128xf32>
    %221 = arith.divf %219, %220 : vector<8x128xf32>
    %222 = vector.extract_strided_slice %213 {offsets = [0, 128], sizes = [8, 128], strides = [1, 1]} : vector<8x384xf32> to vector<8x128xf32>
    %223 = vector.extract_strided_slice %212 {offsets = [0, 128], sizes = [8, 128], strides = [1, 1]} : vector<8x384xf32> to vector<8x128xf32>
    %224 = arith.addf %222, %223 : vector<8x128xf32>
    %225 = arith.negf %224 : vector<8x128xf32>
    %226 = math.exp %225 : vector<8x128xf32>
    %cst_45 = arith.constant 1.000000e+00 : f32
    %227 = vector.broadcast %cst_45 : f32 to vector<8x128xf32>
    %228 = arith.addf %227, %226 : vector<8x128xf32>
    %229 = arith.divf %227, %228 : vector<8x128xf32>
    %230 = vector.extract_strided_slice %213 {offsets = [0, 256], sizes = [8, 128], strides = [1, 1]} : vector<8x384xf32> to vector<8x128xf32>
    %231 = vector.extract_strided_slice %212 {offsets = [0, 256], sizes = [8, 128], strides = [1, 1]} : vector<8x384xf32> to vector<8x128xf32>
    %232 = arith.addf %231, %4 : vector<8x128xf32>
    %233 = arith.mulf %221, %232 : vector<8x128xf32>
    %234 = arith.addf %230, %233 : vector<8x128xf32>
    %235 = math.tanh %234 : vector<8x128xf32>
    %cst_46 = arith.constant 1.000000e+00 : f32
    %236 = vector.broadcast %cst_46 : f32 to vector<8x128xf32>
    %237 = arith.subf %236, %229 : vector<8x128xf32>
    %238 = arith.mulf %237, %235 : vector<8x128xf32>
    %239 = arith.mulf %229, %210 : vector<8x128xf32>
    %240 = arith.addf %238, %239 : vector<8x128xf32>
    %c48 = arith.constant 48 : index
    %c0_47 = arith.constant 0 : index
    %241 = vector.load %arg5[%c48, %c0_47] : memref<64x128xf32, #tpu.memory_space<vmem>>, vector<8x128xf32>
    tpu.vector_store %arg5[%c48, %c0_47], %240 {strides = array<i32>} : memref<64x128xf32, #tpu.memory_space<vmem>>, vector<8x128xf32>,
    %cst_48 = arith.constant dense<0.000000e+00> : vector<8x384xf32>
    %242 = tpu.matmul %240, %0, %cst_48 {dimension_numbers = #tpu.dot_dimension_numbers<[1], [0], [0], [1], [0, 0, 1, 1], [], []>} : vector<8x128xf32>, vector<128x384xf32>, vector<8x384xf32> -> vector<8x384xf32>
    %243 = vector.extract_strided_slice %30 {offsets = [56, 0], sizes = [8, 384], strides = [1, 1]} : vector<64x384xf32> to vector<8x384xf32>
    %244 = vector.extract_strided_slice %243 {offsets = [0, 0], sizes = [8, 128], strides = [1, 1]} : vector<8x384xf32> to vector<8x128xf32>
    %245 = vector.extract_strided_slice %242 {offsets = [0, 0], sizes = [8, 128], strides = [1, 1]} : vector<8x384xf32> to vector<8x128xf32>
    %246 = arith.addf %244, %245 : vector<8x128xf32>
    %247 = arith.negf %246 : vector<8x128xf32>
    %248 = math.exp %247 : vector<8x128xf32>
    %cst_49 = arith.constant 1.000000e+00 : f32
    %249 = vector.broadcast %cst_49 : f32 to vector<8x128xf32>
    %250 = arith.addf %249, %248 : vector<8x128xf32>
    %251 = arith.divf %249, %250 : vector<8x128xf32>
    %252 = vector.extract_strided_slice %243 {offsets = [0, 128], sizes = [8, 128], strides = [1, 1]} : vector<8x384xf32> to vector<8x128xf32>
    %253 = vector.extract_strided_slice %242 {offsets = [0, 128], sizes = [8, 128], strides = [1, 1]} : vector<8x384xf32> to vector<8x128xf32>
    %254 = arith.addf %252, %253 : vector<8x128xf32>
    %255 = arith.negf %254 : vector<8x128xf32>
    %256 = math.exp %255 : vector<8x128xf32>
    %cst_50 = arith.constant 1.000000e+00 : f32
    %257 = vector.broadcast %cst_50 : f32 to vector<8x128xf32>
    %258 = arith.addf %257, %256 : vector<8x128xf32>
    %259 = arith.divf %257, %258 : vector<8x128xf32>
    %260 = vector.extract_strided_slice %243 {offsets = [0, 256], sizes = [8, 128], strides = [1, 1]} : vector<8x384xf32> to vector<8x128xf32>
    %261 = vector.extract_strided_slice %242 {offsets = [0, 256], sizes = [8, 128], strides = [1, 1]} : vector<8x384xf32> to vector<8x128xf32>
    %262 = arith.addf %261, %4 : vector<8x128xf32>
    %263 = arith.mulf %251, %262 : vector<8x128xf32>
    %264 = arith.addf %260, %263 : vector<8x128xf32>
    %265 = math.tanh %264 : vector<8x128xf32>
    %cst_51 = arith.constant 1.000000e+00 : f32
    %266 = vector.broadcast %cst_51 : f32 to vector<8x128xf32>
    %267 = arith.subf %266, %259 : vector<8x128xf32>
    %268 = arith.mulf %267, %265 : vector<8x128xf32>
    %269 = arith.mulf %259, %240 : vector<8x128xf32>
    %270 = arith.addf %268, %269 : vector<8x128xf32>
    %c56 = arith.constant 56 : index
    %c0_52 = arith.constant 0 : index
    %271 = vector.load %arg5[%c56, %c0_52] : memref<64x128xf32, #tpu.memory_space<vmem>>, vector<8x128xf32>
    tpu.vector_store %arg5[%c56, %c0_52], %270 {strides = array<i32>} : memref<64x128xf32, #tpu.memory_space<vmem>>, vector<8x128xf32>,
    %c0_53 = arith.constant 0 : index
    %c0_54 = arith.constant 0 : index
    %272 = vector.load %arg5[%c0_53, %c0_54] : memref<64x128xf32, #tpu.memory_space<vmem>>, vector<64x128xf32>
    %273 = vector.extract_strided_slice %272 {offsets = [56, 0], sizes = [8, 128], strides = [1, 1]} : vector<64x128xf32> to vector<8x128xf32>
    %274 = vector.extract_strided_slice %272 {offsets = [48, 0], sizes = [8, 128], strides = [1, 1]} : vector<64x128xf32> to vector<8x128xf32>
    %275 = vector.extract_strided_slice %272 {offsets = [40, 0], sizes = [8, 128], strides = [1, 1]} : vector<64x128xf32> to vector<8x128xf32>
    %276 = vector.extract_strided_slice %272 {offsets = [32, 0], sizes = [8, 128], strides = [1, 1]} : vector<64x128xf32> to vector<8x128xf32>
    %277 = vector.extract_strided_slice %272 {offsets = [24, 0], sizes = [8, 128], strides = [1, 1]} : vector<64x128xf32> to vector<8x128xf32>
    %278 = vector.extract_strided_slice %272 {offsets = [16, 0], sizes = [8, 128], strides = [1, 1]} : vector<64x128xf32> to vector<8x128xf32>
    %279 = vector.extract_strided_slice %272 {offsets = [8, 0], sizes = [8, 128], strides = [1, 1]} : vector<64x128xf32> to vector<8x128xf32>
    %280 = vector.extract_strided_slice %272 {offsets = [0, 0], sizes = [8, 128], strides = [1, 1]} : vector<64x128xf32> to vector<8x128xf32>
    %281 = tpu.concatenate %273, %274, %275, %276, %277, %278, %279, %280 in 0 : vector<8x128xf32>, vector<8x128xf32>, vector<8x128xf32>, vector<8x128xf32>, vector<8x128xf32>, vector<8x128xf32>, vector<8x128xf32>, vector<8x128xf32> -> vector<64x128xf32>
    %282 = arith.select %13, %272, %281 : vector<64x128xi1>, vector<64x128xf32>
    %c0_55 = arith.constant 0 : index
    %c768 = arith.constant 768 : index
    %283 = vector.load %arg1[%c0_55, %c768] : memref<128x2048xf32, #tpu.memory_space<vmem>>, vector<128x384xf32>
    %cst_56 = arith.constant dense<0.000000e+00> : vector<64x384xf32>
    %284 = tpu.matmul %282, %283, %cst_56 {dimension_numbers = #tpu.dot_dimension_numbers<[1], [0], [0], [1], [0, 0, 1, 1], [], []>} : vector<64x128xf32>, vector<128x384xf32>, vector<64x384xf32> -> vector<64x384xf32>
    %c0_57 = arith.constant 0 : index
    %c384_58 = arith.constant 384 : index
    %285 = vector.load %arg2[%c0_57, %c384_58] : memref<1x1664xf32, #tpu.memory_space<vmem>>, vector<1x384xf32>
    %286 = vector.broadcast %285 : vector<1x384xf32> to vector<64x384xf32>
    %287 = arith.addf %284, %286 : vector<64x384xf32>
    %cst_59 = arith.constant 0.000000e+00 : f32
    %288 = vector.broadcast %cst_59 : f32 to vector<8x128xf32>
    %cst_60 = arith.constant dense<0.000000e+00> : vector<8x384xf32>
    %289 = tpu.matmul %288, %1, %cst_60 {dimension_numbers = #tpu.dot_dimension_numbers<[1], [0], [0], [1], [0, 0, 1, 1], [], []>} : vector<8x128xf32>, vector<128x384xf32>, vector<8x384xf32> -> vector<8x384xf32>
    %290 = vector.extract_strided_slice %287 {offsets = [0, 0], sizes = [8, 384], strides = [1, 1]} : vector<64x384xf32> to vector<8x384xf32>
    %291 = vector.extract_strided_slice %290 {offsets = [0, 0], sizes = [8, 128], strides = [1, 1]} : vector<8x384xf32> to vector<8x128xf32>
    %292 = vector.extract_strided_slice %289 {offsets = [0, 0], sizes = [8, 128], strides = [1, 1]} : vector<8x384xf32> to vector<8x128xf32>
    %293 = arith.addf %291, %292 : vector<8x128xf32>
    %294 = arith.negf %293 : vector<8x128xf32>
    %295 = math.exp %294 : vector<8x128xf32>
    %cst_61 = arith.constant 1.000000e+00 : f32
    %296 = vector.broadcast %cst_61 : f32 to vector<8x128xf32>
    %297 = arith.addf %296, %295 : vector<8x128xf32>
    %298 = arith.divf %296, %297 : vector<8x128xf32>
    %299 = vector.extract_strided_slice %290 {offsets = [0, 128], sizes = [8, 128], strides = [1, 1]} : vector<8x384xf32> to vector<8x128xf32>
    %300 = vector.extract_strided_slice %289 {offsets = [0, 128], sizes = [8, 128], strides = [1, 1]} : vector<8x384xf32> to vector<8x128xf32>
    %301 = arith.addf %299, %300 : vector<8x128xf32>
    %302 = arith.negf %301 : vector<8x128xf32>
    %303 = math.exp %302 : vector<8x128xf32>
    %cst_62 = arith.constant 1.000000e+00 : f32
    %304 = vector.broadcast %cst_62 : f32 to vector<8x128xf32>
    %305 = arith.addf %304, %303 : vector<8x128xf32>
    %306 = arith.divf %304, %305 : vector<8x128xf32>
    %307 = vector.extract_strided_slice %290 {offsets = [0, 256], sizes = [8, 128], strides = [1, 1]} : vector<8x384xf32> to vector<8x128xf32>
    %308 = vector.extract_strided_slice %289 {offsets = [0, 256], sizes = [8, 128], strides = [1, 1]} : vector<8x384xf32> to vector<8x128xf32>
    %309 = arith.addf %308, %7 : vector<8x128xf32>
    %310 = arith.mulf %298, %309 : vector<8x128xf32>
    %311 = arith.addf %307, %310 : vector<8x128xf32>
    %312 = math.tanh %311 : vector<8x128xf32>
    %cst_63 = arith.constant 1.000000e+00 : f32
    %313 = vector.broadcast %cst_63 : f32 to vector<8x128xf32>
    %314 = arith.subf %313, %306 : vector<8x128xf32>
    %315 = arith.mulf %314, %312 : vector<8x128xf32>
    %316 = arith.mulf %306, %288 : vector<8x128xf32>
    %317 = arith.addf %315, %316 : vector<8x128xf32>
    %cst_64 = arith.constant dense<0.000000e+00> : vector<8x384xf32>
    %318 = tpu.matmul %317, %1, %cst_64 {dimension_numbers = #tpu.dot_dimension_numbers<[1], [0], [0], [1], [0, 0, 1, 1], [], []>} : vector<8x128xf32>, vector<128x384xf32>, vector<8x384xf32> -> vector<8x384xf32>
    %319 = vector.extract_strided_slice %287 {offsets = [8, 0], sizes = [8, 384], strides = [1, 1]} : vector<64x384xf32> to vector<8x384xf32>
    %320 = vector.extract_strided_slice %319 {offsets = [0, 0], sizes = [8, 128], strides = [1, 1]} : vector<8x384xf32> to vector<8x128xf32>
    %321 = vector.extract_strided_slice %318 {offsets = [0, 0], sizes = [8, 128], strides = [1, 1]} : vector<8x384xf32> to vector<8x128xf32>
    %322 = arith.addf %320, %321 : vector<8x128xf32>
    %323 = arith.negf %322 : vector<8x128xf32>
    %324 = math.exp %323 : vector<8x128xf32>
    %cst_65 = arith.constant 1.000000e+00 : f32
    %325 = vector.broadcast %cst_65 : f32 to vector<8x128xf32>
    %326 = arith.addf %325, %324 : vector<8x128xf32>
    %327 = arith.divf %325, %326 : vector<8x128xf32>
    %328 = vector.extract_strided_slice %319 {offsets = [0, 128], sizes = [8, 128], strides = [1, 1]} : vector<8x384xf32> to vector<8x128xf32>
    %329 = vector.extract_strided_slice %318 {offsets = [0, 128], sizes = [8, 128], strides = [1, 1]} : vector<8x384xf32> to vector<8x128xf32>
    %330 = arith.addf %328, %329 : vector<8x128xf32>
    %331 = arith.negf %330 : vector<8x128xf32>
    %332 = math.exp %331 : vector<8x128xf32>
    %cst_66 = arith.constant 1.000000e+00 : f32
    %333 = vector.broadcast %cst_66 : f32 to vector<8x128xf32>
    %334 = arith.addf %333, %332 : vector<8x128xf32>
    %335 = arith.divf %333, %334 : vector<8x128xf32>
    %336 = vector.extract_strided_slice %319 {offsets = [0, 256], sizes = [8, 128], strides = [1, 1]} : vector<8x384xf32> to vector<8x128xf32>
    %337 = vector.extract_strided_slice %318 {offsets = [0, 256], sizes = [8, 128], strides = [1, 1]} : vector<8x384xf32> to vector<8x128xf32>
    %338 = arith.addf %337, %7 : vector<8x128xf32>
    %339 = arith.mulf %327, %338 : vector<8x128xf32>
    %340 = arith.addf %336, %339 : vector<8x128xf32>
    %341 = math.tanh %340 : vector<8x128xf32>
    %cst_67 = arith.constant 1.000000e+00 : f32
    %342 = vector.broadcast %cst_67 : f32 to vector<8x128xf32>
    %343 = arith.subf %342, %335 : vector<8x128xf32>
    %344 = arith.mulf %343, %341 : vector<8x128xf32>
    %345 = arith.mulf %335, %317 : vector<8x128xf32>
    %346 = arith.addf %344, %345 : vector<8x128xf32>
    %cst_68 = arith.constant dense<0.000000e+00> : vector<8x384xf32>
    %347 = tpu.matmul %346, %1, %cst_68 {dimension_numbers = #tpu.dot_dimension_numbers<[1], [0], [0], [1], [0, 0, 1, 1], [], []>} : vector<8x128xf32>, vector<128x384xf32>, vector<8x384xf32> -> vector<8x384xf32>
    %348 = vector.extract_strided_slice %287 {offsets = [16, 0], sizes = [8, 384], strides = [1, 1]} : vector<64x384xf32> to vector<8x384xf32>
    %349 = vector.extract_strided_slice %348 {offsets = [0, 0], sizes = [8, 128], strides = [1, 1]} : vector<8x384xf32> to vector<8x128xf32>
    %350 = vector.extract_strided_slice %347 {offsets = [0, 0], sizes = [8, 128], strides = [1, 1]} : vector<8x384xf32> to vector<8x128xf32>
    %351 = arith.addf %349, %350 : vector<8x128xf32>
    %352 = arith.negf %351 : vector<8x128xf32>
    %353 = math.exp %352 : vector<8x128xf32>
    %cst_69 = arith.constant 1.000000e+00 : f32
    %354 = vector.broadcast %cst_69 : f32 to vector<8x128xf32>
    %355 = arith.addf %354, %353 : vector<8x128xf32>
    %356 = arith.divf %354, %355 : vector<8x128xf32>
    %357 = vector.extract_strided_slice %348 {offsets = [0, 128], sizes = [8, 128], strides = [1, 1]} : vector<8x384xf32> to vector<8x128xf32>
    %358 = vector.extract_strided_slice %347 {offsets = [0, 128], sizes = [8, 128], strides = [1, 1]} : vector<8x384xf32> to vector<8x128xf32>
    %359 = arith.addf %357, %358 : vector<8x128xf32>
    %360 = arith.negf %359 : vector<8x128xf32>
    %361 = math.exp %360 : vector<8x128xf32>
    %cst_70 = arith.constant 1.000000e+00 : f32
    %362 = vector.broadcast %cst_70 : f32 to vector<8x128xf32>
    %363 = arith.addf %362, %361 : vector<8x128xf32>
    %364 = arith.divf %362, %363 : vector<8x128xf32>
    %365 = vector.extract_strided_slice %348 {offsets = [0, 256], sizes = [8, 128], strides = [1, 1]} : vector<8x384xf32> to vector<8x128xf32>
    %366 = vector.extract_strided_slice %347 {offsets = [0, 256], sizes = [8, 128], strides = [1, 1]} : vector<8x384xf32> to vector<8x128xf32>
    %367 = arith.addf %366, %7 : vector<8x128xf32>
    %368 = arith.mulf %356, %367 : vector<8x128xf32>
    %369 = arith.addf %365, %368 : vector<8x128xf32>
    %370 = math.tanh %369 : vector<8x128xf32>
    %cst_71 = arith.constant 1.000000e+00 : f32
    %371 = vector.broadcast %cst_71 : f32 to vector<8x128xf32>
    %372 = arith.subf %371, %364 : vector<8x128xf32>
    %373 = arith.mulf %372, %370 : vector<8x128xf32>
    %374 = arith.mulf %364, %346 : vector<8x128xf32>
    %375 = arith.addf %373, %374 : vector<8x128xf32>
    %cst_72 = arith.constant dense<0.000000e+00> : vector<8x384xf32>
    %376 = tpu.matmul %375, %1, %cst_72 {dimension_numbers = #tpu.dot_dimension_numbers<[1], [0], [0], [1], [0, 0, 1, 1], [], []>} : vector<8x128xf32>, vector<128x384xf32>, vector<8x384xf32> -> vector<8x384xf32>
    %377 = vector.extract_strided_slice %287 {offsets = [24, 0], sizes = [8, 384], strides = [1, 1]} : vector<64x384xf32> to vector<8x384xf32>
    %378 = vector.extract_strided_slice %377 {offsets = [0, 0], sizes = [8, 128], strides = [1, 1]} : vector<8x384xf32> to vector<8x128xf32>
    %379 = vector.extract_strided_slice %376 {offsets = [0, 0], sizes = [8, 128], strides = [1, 1]} : vector<8x384xf32> to vector<8x128xf32>
    %380 = arith.addf %378, %379 : vector<8x128xf32>
    %381 = arith.negf %380 : vector<8x128xf32>
    %382 = math.exp %381 : vector<8x128xf32>
    %cst_73 = arith.constant 1.000000e+00 : f32
    %383 = vector.broadcast %cst_73 : f32 to vector<8x128xf32>
    %384 = arith.addf %383, %382 : vector<8x128xf32>
    %385 = arith.divf %383, %384 : vector<8x128xf32>
    %386 = vector.extract_strided_slice %377 {offsets = [0, 128], sizes = [8, 128], strides = [1, 1]} : vector<8x384xf32> to vector<8x128xf32>
    %387 = vector.extract_strided_slice %376 {offsets = [0, 128], sizes = [8, 128], strides = [1, 1]} : vector<8x384xf32> to vector<8x128xf32>
    %388 = arith.addf %386, %387 : vector<8x128xf32>
    %389 = arith.negf %388 : vector<8x128xf32>
    %390 = math.exp %389 : vector<8x128xf32>
    %cst_74 = arith.constant 1.000000e+00 : f32
    %391 = vector.broadcast %cst_74 : f32 to vector<8x128xf32>
    %392 = arith.addf %391, %390 : vector<8x128xf32>
    %393 = arith.divf %391, %392 : vector<8x128xf32>
    %394 = vector.extract_strided_slice %377 {offsets = [0, 256], sizes = [8, 128], strides = [1, 1]} : vector<8x384xf32> to vector<8x128xf32>
    %395 = vector.extract_strided_slice %376 {offsets = [0, 256], sizes = [8, 128], strides = [1, 1]} : vector<8x384xf32> to vector<8x128xf32>
    %396 = arith.addf %395, %7 : vector<8x128xf32>
    %397 = arith.mulf %385, %396 : vector<8x128xf32>
    %398 = arith.addf %394, %397 : vector<8x128xf32>
    %399 = math.tanh %398 : vector<8x128xf32>
    %cst_75 = arith.constant 1.000000e+00 : f32
    %400 = vector.broadcast %cst_75 : f32 to vector<8x128xf32>
    %401 = arith.subf %400, %393 : vector<8x128xf32>
    %402 = arith.mulf %401, %399 : vector<8x128xf32>
    %403 = arith.mulf %393, %375 : vector<8x128xf32>
    %404 = arith.addf %402, %403 : vector<8x128xf32>
    %cst_76 = arith.constant dense<0.000000e+00> : vector<8x384xf32>
    %405 = tpu.matmul %404, %1, %cst_76 {dimension_numbers = #tpu.dot_dimension_numbers<[1], [0], [0], [1], [0, 0, 1, 1], [], []>} : vector<8x128xf32>, vector<128x384xf32>, vector<8x384xf32> -> vector<8x384xf32>
    %406 = vector.extract_strided_slice %287 {offsets = [32, 0], sizes = [8, 384], strides = [1, 1]} : vector<64x384xf32> to vector<8x384xf32>
    %407 = vector.extract_strided_slice %406 {offsets = [0, 0], sizes = [8, 128], strides = [1, 1]} : vector<8x384xf32> to vector<8x128xf32>
    %408 = vector.extract_strided_slice %405 {offsets = [0, 0], sizes = [8, 128], strides = [1, 1]} : vector<8x384xf32> to vector<8x128xf32>
    %409 = arith.addf %407, %408 : vector<8x128xf32>
    %410 = arith.negf %409 : vector<8x128xf32>
    %411 = math.exp %410 : vector<8x128xf32>
    %cst_77 = arith.constant 1.000000e+00 : f32
    %412 = vector.broadcast %cst_77 : f32 to vector<8x128xf32>
    %413 = arith.addf %412, %411 : vector<8x128xf32>
    %414 = arith.divf %412, %413 : vector<8x128xf32>
    %415 = vector.extract_strided_slice %406 {offsets = [0, 128], sizes = [8, 128], strides = [1, 1]} : vector<8x384xf32> to vector<8x128xf32>
    %416 = vector.extract_strided_slice %405 {offsets = [0, 128], sizes = [8, 128], strides = [1, 1]} : vector<8x384xf32> to vector<8x128xf32>
    %417 = arith.addf %415, %416 : vector<8x128xf32>
    %418 = arith.negf %417 : vector<8x128xf32>
    %419 = math.exp %418 : vector<8x128xf32>
    %cst_78 = arith.constant 1.000000e+00 : f32
    %420 = vector.broadcast %cst_78 : f32 to vector<8x128xf32>
    %421 = arith.addf %420, %419 : vector<8x128xf32>
    %422 = arith.divf %420, %421 : vector<8x128xf32>
    %423 = vector.extract_strided_slice %406 {offsets = [0, 256], sizes = [8, 128], strides = [1, 1]} : vector<8x384xf32> to vector<8x128xf32>
    %424 = vector.extract_strided_slice %405 {offsets = [0, 256], sizes = [8, 128], strides = [1, 1]} : vector<8x384xf32> to vector<8x128xf32>
    %425 = arith.addf %424, %7 : vector<8x128xf32>
    %426 = arith.mulf %414, %425 : vector<8x128xf32>
    %427 = arith.addf %423, %426 : vector<8x128xf32>
    %428 = math.tanh %427 : vector<8x128xf32>
    %cst_79 = arith.constant 1.000000e+00 : f32
    %429 = vector.broadcast %cst_79 : f32 to vector<8x128xf32>
    %430 = arith.subf %429, %422 : vector<8x128xf32>
    %431 = arith.mulf %430, %428 : vector<8x128xf32>
    %432 = arith.mulf %422, %404 : vector<8x128xf32>
    %433 = arith.addf %431, %432 : vector<8x128xf32>
    %cst_80 = arith.constant dense<0.000000e+00> : vector<8x384xf32>
    %434 = tpu.matmul %433, %1, %cst_80 {dimension_numbers = #tpu.dot_dimension_numbers<[1], [0], [0], [1], [0, 0, 1, 1], [], []>} : vector<8x128xf32>, vector<128x384xf32>, vector<8x384xf32> -> vector<8x384xf32>
    %435 = vector.extract_strided_slice %287 {offsets = [40, 0], sizes = [8, 384], strides = [1, 1]} : vector<64x384xf32> to vector<8x384xf32>
    %436 = vector.extract_strided_slice %435 {offsets = [0, 0], sizes = [8, 128], strides = [1, 1]} : vector<8x384xf32> to vector<8x128xf32>
    %437 = vector.extract_strided_slice %434 {offsets = [0, 0], sizes = [8, 128], strides = [1, 1]} : vector<8x384xf32> to vector<8x128xf32>
    %438 = arith.addf %436, %437 : vector<8x128xf32>
    %439 = arith.negf %438 : vector<8x128xf32>
    %440 = math.exp %439 : vector<8x128xf32>
    %cst_81 = arith.constant 1.000000e+00 : f32
    %441 = vector.broadcast %cst_81 : f32 to vector<8x128xf32>
    %442 = arith.addf %441, %440 : vector<8x128xf32>
    %443 = arith.divf %441, %442 : vector<8x128xf32>
    %444 = vector.extract_strided_slice %435 {offsets = [0, 128], sizes = [8, 128], strides = [1, 1]} : vector<8x384xf32> to vector<8x128xf32>
    %445 = vector.extract_strided_slice %434 {offsets = [0, 128], sizes = [8, 128], strides = [1, 1]} : vector<8x384xf32> to vector<8x128xf32>
    %446 = arith.addf %444, %445 : vector<8x128xf32>
    %447 = arith.negf %446 : vector<8x128xf32>
    %448 = math.exp %447 : vector<8x128xf32>
    %cst_82 = arith.constant 1.000000e+00 : f32
    %449 = vector.broadcast %cst_82 : f32 to vector<8x128xf32>
    %450 = arith.addf %449, %448 : vector<8x128xf32>
    %451 = arith.divf %449, %450 : vector<8x128xf32>
    %452 = vector.extract_strided_slice %435 {offsets = [0, 256], sizes = [8, 128], strides = [1, 1]} : vector<8x384xf32> to vector<8x128xf32>
    %453 = vector.extract_strided_slice %434 {offsets = [0, 256], sizes = [8, 128], strides = [1, 1]} : vector<8x384xf32> to vector<8x128xf32>
    %454 = arith.addf %453, %7 : vector<8x128xf32>
    %455 = arith.mulf %443, %454 : vector<8x128xf32>
    %456 = arith.addf %452, %455 : vector<8x128xf32>
    %457 = math.tanh %456 : vector<8x128xf32>
    %cst_83 = arith.constant 1.000000e+00 : f32
    %458 = vector.broadcast %cst_83 : f32 to vector<8x128xf32>
    %459 = arith.subf %458, %451 : vector<8x128xf32>
    %460 = arith.mulf %459, %457 : vector<8x128xf32>
    %461 = arith.mulf %451, %433 : vector<8x128xf32>
    %462 = arith.addf %460, %461 : vector<8x128xf32>
    %cst_84 = arith.constant dense<0.000000e+00> : vector<8x384xf32>
    %463 = tpu.matmul %462, %1, %cst_84 {dimension_numbers = #tpu.dot_dimension_numbers<[1], [0], [0], [1], [0, 0, 1, 1], [], []>} : vector<8x128xf32>, vector<128x384xf32>, vector<8x384xf32> -> vector<8x384xf32>
    %464 = vector.extract_strided_slice %287 {offsets = [48, 0], sizes = [8, 384], strides = [1, 1]} : vector<64x384xf32> to vector<8x384xf32>
    %465 = vector.extract_strided_slice %464 {offsets = [0, 0], sizes = [8, 128], strides = [1, 1]} : vector<8x384xf32> to vector<8x128xf32>
    %466 = vector.extract_strided_slice %463 {offsets = [0, 0], sizes = [8, 128], strides = [1, 1]} : vector<8x384xf32> to vector<8x128xf32>
    %467 = arith.addf %465, %466 : vector<8x128xf32>
    %468 = arith.negf %467 : vector<8x128xf32>
    %469 = math.exp %468 : vector<8x128xf32>
    %cst_85 = arith.constant 1.000000e+00 : f32
    %470 = vector.broadcast %cst_85 : f32 to vector<8x128xf32>
    %471 = arith.addf %470, %469 : vector<8x128xf32>
    %472 = arith.divf %470, %471 : vector<8x128xf32>
    %473 = vector.extract_strided_slice %464 {offsets = [0, 128], sizes = [8, 128], strides = [1, 1]} : vector<8x384xf32> to vector<8x128xf32>
    %474 = vector.extract_strided_slice %463 {offsets = [0, 128], sizes = [8, 128], strides = [1, 1]} : vector<8x384xf32> to vector<8x128xf32>
    %475 = arith.addf %473, %474 : vector<8x128xf32>
    %476 = arith.negf %475 : vector<8x128xf32>
    %477 = math.exp %476 : vector<8x128xf32>
    %cst_86 = arith.constant 1.000000e+00 : f32
    %478 = vector.broadcast %cst_86 : f32 to vector<8x128xf32>
    %479 = arith.addf %478, %477 : vector<8x128xf32>
    %480 = arith.divf %478, %479 : vector<8x128xf32>
    %481 = vector.extract_strided_slice %464 {offsets = [0, 256], sizes = [8, 128], strides = [1, 1]} : vector<8x384xf32> to vector<8x128xf32>
    %482 = vector.extract_strided_slice %463 {offsets = [0, 256], sizes = [8, 128], strides = [1, 1]} : vector<8x384xf32> to vector<8x128xf32>
    %483 = arith.addf %482, %7 : vector<8x128xf32>
    %484 = arith.mulf %472, %483 : vector<8x128xf32>
    %485 = arith.addf %481, %484 : vector<8x128xf32>
    %486 = math.tanh %485 : vector<8x128xf32>
    %cst_87 = arith.constant 1.000000e+00 : f32
    %487 = vector.broadcast %cst_87 : f32 to vector<8x128xf32>
    %488 = arith.subf %487, %480 : vector<8x128xf32>
    %489 = arith.mulf %488, %486 : vector<8x128xf32>
    %490 = arith.mulf %480, %462 : vector<8x128xf32>
    %491 = arith.addf %489, %490 : vector<8x128xf32>
    %cst_88 = arith.constant dense<0.000000e+00> : vector<8x384xf32>
    %492 = tpu.matmul %491, %1, %cst_88 {dimension_numbers = #tpu.dot_dimension_numbers<[1], [0], [0], [1], [0, 0, 1, 1], [], []>} : vector<8x128xf32>, vector<128x384xf32>, vector<8x384xf32> -> vector<8x384xf32>
    %493 = vector.extract_strided_slice %287 {offsets = [56, 0], sizes = [8, 384], strides = [1, 1]} : vector<64x384xf32> to vector<8x384xf32>
    %494 = vector.extract_strided_slice %493 {offsets = [0, 0], sizes = [8, 128], strides = [1, 1]} : vector<8x384xf32> to vector<8x128xf32>
    %495 = vector.extract_strided_slice %492 {offsets = [0, 0], sizes = [8, 128], strides = [1, 1]} : vector<8x384xf32> to vector<8x128xf32>
    %496 = arith.addf %494, %495 : vector<8x128xf32>
    %497 = arith.negf %496 : vector<8x128xf32>
    %498 = math.exp %497 : vector<8x128xf32>
    %cst_89 = arith.constant 1.000000e+00 : f32
    %499 = vector.broadcast %cst_89 : f32 to vector<8x128xf32>
    %500 = arith.addf %499, %498 : vector<8x128xf32>
    %501 = arith.divf %499, %500 : vector<8x128xf32>
    %502 = vector.extract_strided_slice %493 {offsets = [0, 128], sizes = [8, 128], strides = [1, 1]} : vector<8x384xf32> to vector<8x128xf32>
    %503 = vector.extract_strided_slice %492 {offsets = [0, 128], sizes = [8, 128], strides = [1, 1]} : vector<8x384xf32> to vector<8x128xf32>
    %504 = arith.addf %502, %503 : vector<8x128xf32>
    %505 = arith.negf %504 : vector<8x128xf32>
    %506 = math.exp %505 : vector<8x128xf32>
    %cst_90 = arith.constant 1.000000e+00 : f32
    %507 = vector.broadcast %cst_90 : f32 to vector<8x128xf32>
    %508 = arith.addf %507, %506 : vector<8x128xf32>
    %509 = arith.divf %507, %508 : vector<8x128xf32>
    %510 = vector.extract_strided_slice %493 {offsets = [0, 256], sizes = [8, 128], strides = [1, 1]} : vector<8x384xf32> to vector<8x128xf32>
    %511 = vector.extract_strided_slice %492 {offsets = [0, 256], sizes = [8, 128], strides = [1, 1]} : vector<8x384xf32> to vector<8x128xf32>
    %512 = arith.addf %511, %7 : vector<8x128xf32>
    %513 = arith.mulf %501, %512 : vector<8x128xf32>
    %514 = arith.addf %510, %513 : vector<8x128xf32>
    %515 = math.tanh %514 : vector<8x128xf32>
    %cst_91 = arith.constant 1.000000e+00 : f32
    %516 = vector.broadcast %cst_91 : f32 to vector<8x128xf32>
    %517 = arith.subf %516, %509 : vector<8x128xf32>
    %518 = arith.mulf %517, %515 : vector<8x128xf32>
    %519 = arith.mulf %509, %491 : vector<8x128xf32>
    %520 = arith.addf %518, %519 : vector<8x128xf32>
    %521 = vector.extract_strided_slice %282 {offsets = [56, 0], sizes = [8, 128], strides = [1, 1]} : vector<64x128xf32> to vector<8x128xf32>
    %c0_92 = arith.constant 0 : index
    %c1536 = arith.constant 1536 : index
    %522 = vector.load %arg1[%c0_92, %c1536] : memref<128x2048xf32, #tpu.memory_space<vmem>>, vector<128x384xf32>
    %cst_93 = arith.constant dense<0.000000e+00> : vector<8x384xf32>
    %523 = tpu.matmul %521, %522, %cst_93 {dimension_numbers = #tpu.dot_dimension_numbers<[1], [0], [0], [1], [0, 0, 1, 1], [], []>} : vector<8x128xf32>, vector<128x384xf32>, vector<8x384xf32> -> vector<8x384xf32>
    %c0_94 = arith.constant 0 : index
    %c768_95 = arith.constant 768 : index
    %524 = vector.load %arg2[%c0_94, %c768_95] : memref<1x1664xf32, #tpu.memory_space<vmem>>, vector<1x384xf32>
    %525 = vector.broadcast %524 : vector<1x384xf32> to vector<8x384xf32>
    %526 = arith.addf %523, %525 : vector<8x384xf32>
    %cst_96 = arith.constant 0.000000e+00 : f32
    %527 = vector.broadcast %cst_96 : f32 to vector<8x384xf32>
    %cst_97 = arith.constant 0.000000e+00 : f32
    %528 = vector.broadcast %cst_97 : f32 to vector<8x128xf32>
    %529 = vector.extract_strided_slice %526 {offsets = [0, 0], sizes = [8, 128], strides = [1, 1]} : vector<8x384xf32> to vector<8x128xf32>
    %530 = vector.extract_strided_slice %527 {offsets = [0, 0], sizes = [8, 128], strides = [1, 1]} : vector<8x384xf32> to vector<8x128xf32>
    %531 = arith.addf %529, %530 : vector<8x128xf32>
    %532 = arith.negf %531 : vector<8x128xf32>
    %533 = math.exp %532 : vector<8x128xf32>
    %cst_98 = arith.constant 1.000000e+00 : f32
    %534 = vector.broadcast %cst_98 : f32 to vector<8x128xf32>
    %535 = arith.addf %534, %533 : vector<8x128xf32>
    %536 = arith.divf %534, %535 : vector<8x128xf32>
    %537 = vector.extract_strided_slice %526 {offsets = [0, 128], sizes = [8, 128], strides = [1, 1]} : vector<8x384xf32> to vector<8x128xf32>
    %538 = vector.extract_strided_slice %527 {offsets = [0, 128], sizes = [8, 128], strides = [1, 1]} : vector<8x384xf32> to vector<8x128xf32>
    %539 = arith.addf %537, %538 : vector<8x128xf32>
    %540 = arith.negf %539 : vector<8x128xf32>
    %541 = math.exp %540 : vector<8x128xf32>
    %cst_99 = arith.constant 1.000000e+00 : f32
    %542 = vector.broadcast %cst_99 : f32 to vector<8x128xf32>
    %543 = arith.addf %542, %541 : vector<8x128xf32>
    %544 = arith.divf %542, %543 : vector<8x128xf32>
    %545 = vector.extract_strided_slice %526 {offsets = [0, 256], sizes = [8, 128], strides = [1, 1]} : vector<8x384xf32> to vector<8x128xf32>
    %546 = vector.extract_strided_slice %527 {offsets = [0, 256], sizes = [8, 128], strides = [1, 1]} : vector<8x384xf32> to vector<8x128xf32>
    %547 = arith.addf %546, %10 : vector<8x128xf32>
    %548 = arith.mulf %536, %547 : vector<8x128xf32>
    %549 = arith.addf %545, %548 : vector<8x128xf32>
    %550 = math.tanh %549 : vector<8x128xf32>
    %cst_100 = arith.constant 1.000000e+00 : f32
    %551 = vector.broadcast %cst_100 : f32 to vector<8x128xf32>
    %552 = arith.subf %551, %544 : vector<8x128xf32>
    %553 = arith.mulf %552, %550 : vector<8x128xf32>
    %554 = arith.mulf %544, %528 : vector<8x128xf32>
    %555 = arith.addf %553, %554 : vector<8x128xf32>
    %556 = arith.addf %520, %555 : vector<8x128xf32>
    %557 = math.tanh %556 : vector<8x128xf32>
    %c0_101 = arith.constant 0 : index
    %c0_102 = arith.constant 0 : index
    %558 = vector.load %arg4[%c0_101, %c0_102] : memref<8x128xf32, #tpu.memory_space<vmem>>, vector<8x128xf32>
    tpu.vector_store %arg4[%c0_101, %c0_102], %557 {strides = array<i32>} : memref<8x128xf32, #tpu.memory_space<vmem>>, vector<8x128xf32>,
    %c0_103 = arith.constant 0 : index
    %c1920 = arith.constant 1920 : index
    %559 = vector.load %arg1[%c0_103, %c1920] : memref<128x2048xf32, #tpu.memory_space<vmem>>, vector<128x128xf32>
    %cst_104 = arith.constant dense<0.000000e+00> : vector<8x128xf32>
    %560 = tpu.matmul %557, %559, %cst_104 {dimension_numbers = #tpu.dot_dimension_numbers<[1], [0], [0], [1], [0, 0, 1, 1], [], []>} : vector<8x128xf32>, vector<128x128xf32>, vector<8x128xf32> -> vector<8x128xf32>
    %c0_105 = arith.constant 0 : index
    %c1536_106 = arith.constant 1536 : index
    %561 = vector.load %arg2[%c0_105, %c1536_106] : memref<1x1664xf32, #tpu.memory_space<vmem>>, vector<1x128xf32>
    %562 = vector.broadcast %561 : vector<1x128xf32> to vector<8x128xf32>
    %563 = arith.addf %560, %562 : vector<8x128xf32>
    %c0_107 = arith.constant 0 : index
    %c0_108 = arith.constant 0 : index
    %564 = vector.load %arg3[%c0_107, %c0_108] : memref<8x128xf32, #tpu.memory_space<vmem>>, vector<8x128xf32>
    tpu.vector_store %arg3[%c0_107, %c0_108], %563 {strides = array<i32>} : memref<8x128xf32, #tpu.memory_space<vmem>>, vector<8x128xf32>,
    return
  }
}

</mosaic_0001>

<bundles_post_ra>
// kernel: tpu_custom_call.1
= control target key start
LH: loop header
LB: loop body
LE: loop exit
PB: predicated region body
PF: predicated region fallthrough
CT: control target
= control target key end

     0   :  { %10 = vsyncpa [#allocation4], 0  ;;  %s4627_s0 = inlined_call_operand.hbm [shape: f32[64,128], index: 0, kind: input, shape index: {}]   ;;  %s4628_s1 = inlined_call_operand.hbm [shape: f32[128,2048], index: 1, kind: input, shape index: {}]   ;;  %s4629_s2 = inlined_call_operand.hbm [shape: f32[1,1664], index: 2, kind: input, shape index: {}]   ;;  %s4630_s3 = inlined_call_operand.hbm [shape: f32[8,128], index: 3, kind: output, shape index: {0}]   ;;  %s4631_s4 = inlined_call_operand.hbm [shape: f32[8,128], index: 4, kind: output, shape index: {1}]  }
   0x1   :  { %11 = vsyncpa [#allocation7], 0 }
   0x2   :  { %12 = vsyncpa [#allocation5], 0  ;;  %s31_s17 = sshll.u32 %s4628_s1, 4  ;;  %s32_s17 = int_to_ptr.hbm [resolvable:$true] %s31_s17 }
   0x3   :  { %13 = vsyncpa [#allocation11], 0  ;;  %s3003_s18 = smov [#allocation6]   ;;  %s18_s22 = sshll.u32 %s4627_s0, 4  ;;  %s19_s22 = int_to_ptr.hbm [resolvable:$true] %s18_s22 }
   0x4   :  { %s33_s19 = sshll.u32 %s3003_s18, 4  ;;  %s3004_s23 = smov 2048   ;;  %s34_s19 = int_to_ptr.vmem [resolvable:$true] %s33_s19 }
   0x5   :  { %s3005_s24 = smov 128   ;;  %s3006_s25 = smov [#allocation3]  }
   0x6   :  { %39 = dma.hbm_to_vmem [thread:$0]  %s32_s17, 32768, %s34_s19, [#allocation7], %s3004_s23, %s3004_s23, %s3005_s24  }
   0x7   :  { %s20_s26 = sshll.u32 %s3006_s25, 4  ;;  %s45_s1 = sshll.u32 %s4629_s2, 4  ;;  %s21_s26 = int_to_ptr.vmem [resolvable:$true] %s20_s26  ;;  %s46_s1 = int_to_ptr.hbm [resolvable:$true] %s45_s1 }
   0x8   :  { %s3007_s29 = smov 8   ;;  %s3008_s30 = smov [#allocation8]  }
   0x9   :  { %26 = dma.hbm_to_vmem [thread:$0]  %s19_s22, 1024, %s21_s26, [#allocation4], %s3005_s24, %s3005_s24, %s3007_s29  }
   0xa   :  { %s47_s5 = sshll.u32 %s3008_s30, 4  ;;  %s48_s5 = int_to_ptr.vmem [resolvable:$true] %s47_s5 }
   0xb   :  { %50 = dma.hbm_to_vmem [thread:$0]  %s46_s1, 208, %s48_s5, [#allocation7]  }
   0xc   :  { %2995 = dma.done.wait [#allocation4], 1024  }
   0xd   :  { %2996 = vsyncadd [#allocation4], 4294966272 }
   0xe   :  { %2997 = dma.done.wait [#allocation7], 32976  }
   0xf   :  { %2998 = vsyncadd [#allocation7], 4294934320  ;;  %v227_v0 = vld [vmem:[#allocation6 + $0x780] sm:$0xff]  ;;  %v228_v1 = vld [vmem:[#allocation6 + $0x788] sm:$0xff]  ;;  %s3010_s0 = smov [#allocation10]   ;;  %s2542_s8 = sshll.u32 %s4631_s4, 4  ;;  %s2543_s8 = int_to_ptr.hbm [resolvable:$true] %s2542_s8 }
  0x10   :  { %v229_v2 = vld [vmem:[#allocation6 + $0x790] sm:$0xff]  ;;  %238 = vmatpush.msra.mxu0 %v227_v0  ;;  %279 = vmatpush.msra.mxu1 %v228_v1  ;;  %v224_v3 = vld [vmem:[#allocation6 + $0x700] sm:$0xff]  ;;  %v225_v4 = vld [vmem:[#allocation6 + $0x708] sm:$0xff]  ;;  %s2540_s2 = sshll.u32 %s3010_s0, 4  ;;  %s3011_s9 = smov [#allocation9]   ;;  %s2541_s2 = int_to_ptr.vmem [resolvable:$true] %s2540_s2 }
  0x11   :  { %v226_v5 = vld [vmem:[#allocation6 + $0x710] sm:$0xff]  ;;  %320 = vmatpush.msra.mxu2 %v229_v2  ;;  %v221_v6 = vld [vmem:[#allocation6 + $0x680] sm:$0xff]  ;;  %v222_v7 = vld [vmem:[#allocation6 + $0x688] sm:$0xff]  ;;  %s2529_s10 = sshll.u32 %s3011_s9, 4  ;;  %s2531_s13 = sshll.u32 %s4630_s3, 4  ;;  %s2530_s10 = int_to_ptr.vmem [resolvable:$true] %s2529_s10  ;;  %s2532_s13 = int_to_ptr.hbm [resolvable:$true] %s2531_s13 }
  0x12   :  { %239 = vmatpush.msra.mxu0 %v224_v3  ;;  %280 = vmatpush.msra.mxu1 %v225_v4  ;;  %v223_v8 = vld [vmem:[#allocation6 + $0x690] sm:$0xff]  ;;  %v218_v9 = vld [vmem:[#allocation6 + $0x600] sm:$0xff]  ;;  %v219_v10 = vld [vmem:[#allocation6 + $0x608] sm:$0xff] }
  0x13   :  { %321 = vmatpush.msra.mxu2 %v226_v5  ;;  %v220_v11 = vld [vmem:[#allocation6 + $0x610] sm:$0xff]  ;;  %v215_v12 = vld [vmem:[#allocation6 + $0x580] sm:$0xff]  ;;  %v216_v13 = vld [vmem:[#allocation6 + $0x588] sm:$0xff] }
  0x14   :  { %240 = vmatpush.msra.mxu0 %v221_v6  ;;  %281 = vmatpush.msra.mxu1 %v222_v7  ;;  %v217_v14 = vld [vmem:[#allocation6 + $0x590] sm:$0xff]  ;;  %v212_v15 = vld [vmem:[#allocation6 + $0x500] sm:$0xff]  ;;  %v213_v16 = vld [vmem:[#allocation6 + $0x508] sm:$0xff] }
  0x15   :  { %322 = vmatpush.msra.mxu2 %v223_v8  ;;  %v214_v17 = vld [vmem:[#allocation6 + $0x510] sm:$0xff]  ;;  %v209_v18 = vld [vmem:[#allocation6 + $0x480] sm:$0xff]  ;;  %v210_v19 = vld [vmem:[#allocation6 + $0x488] sm:$0xff] }
  0x16   :  { %241 = vmatpush.msra.mxu0 %v218_v9  ;;  %282 = vmatpush.msra.mxu1 %v219_v10  ;;  %v211_v20 = vld [vmem:[#allocation6 + $0x490] sm:$0xff]  ;;  %v206_v21 = vld [vmem:[#allocation6 + $0x400] sm:$0xff]  ;;  %v207_v22 = vld [vmem:[#allocation6 + $0x408] sm:$0xff] }
  0x17   :  { %323 = vmatpush.msra.mxu2 %v220_v11  ;;  %v3046_v23 = vld [vmem:[#allocation6 + $0x798] sm:$0xff]  ;;  %v208_v24 = vld [vmem:[#allocation6 + $0x410] sm:$0xff]  ;;  %v203_v26 = vld [vmem:[#allocation6 + $0x380] sm:$0xff] }
  0x18   :  { %242 = vmatpush.msra.mxu0 %v215_v12  ;;  %283 = vmatpush.msra.mxu1 %v216_v13  ;;  %v3048_v25 = vld [vmem:[#allocation6 + $0x718] sm:$0xff]  ;;  %v204_v27 = vld [vmem:[#allocation6 + $0x388] sm:$0xff]  ;;  %v205_v28 = vld [vmem:[#allocation6 + $0x390] sm:$0xff] }
  0x19   :  { %324 = vmatpush.msra.mxu2 %v217_v14  ;;  %385 = vmatpush.msra.mxu3 %v3046_v23  ;;  %v3051_v29 = vld [vmem:[#allocation6 + $0x698] sm:$0xff]  ;;  %v200_v30 = vld [vmem:[#allocation6 + $0x300] sm:$0xff]  ;;  %v201_v31 = vld [vmem:[#allocation6 + $0x308] sm:$0xff] }
  0x1a   :  { %243 = vmatpush.msra.mxu0 %v212_v15  ;;  %284 = vmatpush.msra.mxu1 %v213_v16  ;;  %v202_v32 = vld [vmem:[#allocation6 + $0x310] sm:$0xff]  ;;  %v3054_v33 = vld [vmem:[#allocation6 + $0x618] sm:$0xff]  ;;  %v197_v34 = vld [vmem:[#allocation6 + $0x280] sm:$0xff]  ;;  %v4632_v15 = vmov 0.0  }
  0x1b   :  { %325 = vmatpush.msra.mxu2 %v214_v17  ;;  %386 = vmatpush.msra.mxu3 %v3048_v25  ;;  %v198_v35 = vld [vmem:[#allocation6 + $0x288] sm:$0xff]  ;;  %v199_v36 = vld [vmem:[#allocation6 + $0x290] sm:$0xff]  ;;  %v3057_v37 = vld [vmem:[#allocation6 + $0x598] sm:$0xff] }
  0x1c   :  { %244 = vmatpush.msra.mxu0 %v209_v18  ;;  %285 = vmatpush.msra.mxu1 %v210_v19  ;;  %v194_v38 = vld [vmem:[#allocation6 + $0x200] sm:$0xff]  ;;  %v195_v39 = vld [vmem:[#allocation6 + $0x208] sm:$0xff]  ;;  %v196_v40 = vld [vmem:[#allocation6 + $0x210] sm:$0xff] }
  0x1d   :  { %326 = vmatpush.msra.mxu2 %v211_v20  ;;  %387 = vmatpush.msra.mxu3 %v3051_v29  ;;  %v191_v41 = vld [vmem:[#allocation6 + $0x180] sm:$0xff]  ;;  %v3060_v42 = vld [vmem:[#allocation6 + $0x518] sm:$0xff]  ;;  %v192_v43 = vld [vmem:[#allocation6 + $0x188] sm:$0xff] }
  0x1e   :  { %245 = vmatpush.msra.mxu0 %v206_v21  ;;  %286 = vmatpush.msra.mxu1 %v207_v22  ;;  %v193_v44 = vld [vmem:[#allocation6 + $0x190] sm:$0xff]  ;;  %v188_v45 = vld [vmem:[#allocation6 + $0x100] sm:$0xff]  ;;  %v3063_v46 = vld [vmem:[#allocation6 + $0x498] sm:$0xff] }
  0x1f   :  { %327 = vmatpush.msra.mxu2 %v208_v24  ;;  %388 = vmatpush.msra.mxu3 %v3054_v33  ;;  %v189_v47 = vld [vmem:[#allocation6 + $0x108] sm:$0xff]  ;;  %v190_v48 = vld [vmem:[#allocation6 + $0x110] sm:$0xff]  ;;  %v3066_v49 = vld [vmem:[#allocation6 + $0x418] sm:$0xff] }
  0x20   :  { %246 = vmatpush.msra.mxu0 %v203_v26  ;;  %287 = vmatpush.msra.mxu1 %v204_v27  ;;  %v185_v50 = vld [vmem:[#allocation6 + $0x80] sm:$0xff]  ;;  %v186_v51 = vld [vmem:[#allocation6 + $0x88] sm:$0xff]  ;;  %v187_v52 = vld [vmem:[#allocation6 + $0x90] sm:$0xff] }
  0x21   :  { %328 = vmatpush.msra.mxu2 %v205_v28  ;;  %389 = vmatpush.msra.mxu3 %v3057_v37  ;;  %v3069_v53 = vld [vmem:[#allocation6 + $0x398] sm:$0xff]  ;;  %v182_v54 = vld [vmem:[#allocation6] sm:$0xff]  ;;  %v183_v55 = vld [vmem:[#allocation6 + $0x8] sm:$0xff] }
  0x22   :  { %247 = vmatpush.msra.mxu0 %v200_v30  ;;  %288 = vmatpush.msra.mxu1 %v201_v31  ;;  %v184_v56 = vld [vmem:[#allocation6 + $0x10] sm:$0xff]  ;;  %v174_v57 = vld [vmem:[#allocation3] sm:$0xff]  ;;  %v3073_v58 = vld [vmem:[#allocation6 + $0x318] sm:$0xff] }
  0x23   :  { %329 = vmatpush.msra.mxu2 %v202_v32  ;;  %390 = vmatpush.msra.mxu3 %v3060_v42  ;;  %v3075_v59 = vld [vmem:[#allocation6 + $0x7a8] sm:$0xff]  ;;  %v3077_v60 = vld [vmem:[#allocation6 + $0x298] sm:$0xff]  ;;  %v3082_v62 = vld [vmem:[#allocation6 + $0x7a0] sm:$0xff] }
  0x24   :  { %248 = vmatpush.msra.mxu0 %v197_v34  ;;  %289 = vmatpush.msra.mxu1 %v198_v35  ;;  %v3079_v61 = vld [vmem:[#allocation6 + $0x728] sm:$0xff]  ;;  %v3085_v63 = vld [vmem:[#allocation6 + $0x218] sm:$0xff]  ;;  %v3092_v1 = vld [vmem:[#allocation6 + $0x720] sm:$0xff] }
  0x25   :  { %330 = vmatpush.msra.mxu2 %v199_v36  ;;  %391 = vmatpush.msra.mxu3 %v3063_v46  ;;  %v3087_v0 = vld [vmem:[#allocation6 + $0x6a8] sm:$0xff]  ;;  %v3095_v3 = vld [vmem:[#allocation6 + $0x198] sm:$0xff]  ;;  %v3100_v4 = vld [vmem:[#allocation6 + $0x6a0] sm:$0xff] }
  0x26   :  { %249 = vmatpush.msra.mxu0 %v194_v38  ;;  %290 = vmatpush.msra.mxu1 %v195_v39  ;;  %v175_v2 = vld [vmem:[#allocation3 + $0x8] sm:$0xff]  ;;  %4674 = vst [vmem:[#allocation16_spill] sm:$0xff] %v3095_v3  ;;  %v3103_v5 = vld [vmem:[#allocation6 + $0x118] sm:$0xff]  ;;  %v3115_v9 = vld [vmem:[#allocation6 + $0x620] sm:$0xff] }
  0x27   :  { %331 = vmatpush.msra.mxu2 %v196_v40  ;;  %392 = vmatpush.msra.mxu3 %v3066_v49  ;;  %4675 = vst [vmem:[#allocation17_spill] sm:$0xff] %v3103_v5  ;;  %v3105_v6 = vld [vmem:[#allocation6 + $0x628] sm:$0xff]  ;;  %v3110_v7 = vld [vmem:[#allocation6 + $0x98] sm:$0xff]  ;;  %v3125_v12 = vld [vmem:[#allocation6 + $0x5a0] sm:$0xff] }
  0x28   :  { %250 = vmatpush.msra.mxu0 %v191_v41  ;;  %291 = vmatpush.msra.mxu1 %v192_v43  ;;  %4676 = vst [vmem:[#allocation18_spill] sm:$0xff] %v3110_v7  ;;  %v3112_v8 = vld [vmem:[#allocation6 + $0x5a8] sm:$0xff]  ;;  %v3118_v10 = vld [vmem:[#allocation6 + $0x18] sm:$0xff]  ;;  %v176_v13 = vld [vmem:[#allocation3 + $0x10] sm:$0xff] }
  0x29   :  { %332 = vmatpush.msra.mxu2 %v193_v44  ;;  %393 = vmatpush.msra.mxu3 %v3069_v53  ;;  %4677 = vst [vmem:[#allocation19_spill] sm:$0xff] %v3118_v10  ;;  %v3120_v11 = vld [vmem:[#allocation6 + $0x528] sm:$0xff]  ;;  %v3140_v17 = vld [vmem:[#allocation6 + $0x520] sm:$0xff]  ;;  %v177_v20 = vld [vmem:[#allocation3 + $0x18] sm:$0xff] }
  0x2a   :  { %251 = vmatpush.msra.mxu0 %v188_v45  ;;  %292 = vmatpush.msra.mxu1 %v189_v47  ;;  %v3133_v14 = vld [vmem:[#allocation6 + $0x4a8] sm:$0xff]  ;;  %v3148_v19 = vld [vmem:[#allocation6 + $0x4a0] sm:$0xff]  ;;  %v180_v45 = vld [vmem:[#allocation3 + $0x30] sm:$0xff] }
  0x2b   :  { %333 = vmatpush.msra.mxu2 %v190_v48  ;;  %394 = vmatpush.msra.mxu3 %v3073_v58  ;;  %v3137_v16 = vld [vmem:[#allocation6 + $0x428] sm:$0xff]  ;;  %v3154_v21 = vld [vmem:[#allocation6 + $0x420] sm:$0xff]  ;;  %v181_v47 = vld [vmem:[#allocation3 + $0x38] sm:$0xff] }
  0x2c   :  { %252 = vmatpush.msra.mxu0 %v185_v50  ;;  %293 = vmatpush.msra.mxu1 %v186_v51  ;;  %v3143_v18 = vld [vmem:[#allocation6 + $0x3a8] sm:$0xff]  ;;  %v3165_v26 = vld [vmem:[#allocation6 + $0x3a0] sm:$0xff] }
  0x2d   :  { %334 = vmatpush.msra.mxu2 %v187_v52  ;;  %395 = vmatpush.msra.mxu3 %v3077_v60  ;;  %v3160_v22 = vld [vmem:[#allocation6 + $0x328] sm:$0xff]  ;;  %v3173_v28 = vld [vmem:[#allocation6 + $0x320] sm:$0xff] }
  0x2e   :  { %253 = vmatpush.msra.mxu0 %v182_v54  ;;  %294 = vmatpush.msra.mxu1 %v183_v55  ;;  %v3162_v24 = vld [vmem:[#allocation6 + $0x2a8] sm:$0xff]  ;;  %v178_v30 = vld [vmem:[#allocation3 + $0x20] sm:$0xff] }
  0x2f   :  { %335 = vmatpush.msra.mxu2 %v184_v56  ;;  %254 = vmatmul.f32.vlgmr.msra.gmra.mxu0 %v174_v57  ;;  %v3168_v27 = vld [vmem:[#allocation6 + $0x228] sm:$0xff]  ;;  %v3179_v31 = vld [vmem:[#allocation6 + $0x2a0] sm:$0xff] }
  0x30   :  { %295 = vmatmul.f32.vlgmr.msra.gmra.mxu1 %v174_v57  ;;  %336 = vmatmul.f32.vlgmr.msra.gmra.mxu2 %v174_v57  ;;  %v3182_v32 = vld [vmem:[#allocation6 + $0x1a8] sm:$0xff]  ;;  %v3190_v35 = vld [vmem:[#allocation6 + $0x220] sm:$0xff] }
  0x31   :  { %425 = vmatpush.msrb.mxu0 %v3075_v59  ;;  %494 = vmatpush.msrb.mxu1 %v3046_v23  ;;  %4678 = vst [vmem:[#allocation20_spill] sm:$0xff] %v3182_v32  ;;  %v3187_v34 = vld [vmem:[#allocation6 + $0x128] sm:$0xff]  ;;  %v3198_v38 = vld [vmem:[#allocation6 + $0x1a0] sm:$0xff] }
  0x32   :  { %514 = vmatpush.msrb.mxu2 %v3082_v62  ;;  %396 = vmatpush.msra.mxu3 %v3085_v63  ;;  %4679 = vst [vmem:[#allocation21_spill] sm:$0xff] %v3187_v34  ;;  %v3193_v36 = vld [vmem:[#allocation6 + $0xa8] sm:$0xff]  ;;  %v3204_v40 = vld [vmem:[#allocation6 + $0x120] sm:$0xff] }
  0x33   :  { %426 = vmatpush.msrb.mxu0 %v3079_v61  ;;  %495 = vmatpush.msrb.mxu1 %v3048_v25  ;;  %4680 = vst [vmem:[#allocation22_spill] sm:$0xff] %v3190_v35  ;;  %v179_v39 = vld [vmem:[#allocation3 + $0x28] sm:$0xff]  ;;  %v3212_v43 = vld [vmem:[#allocation6 + $0xa0] sm:$0xff] }
  0x34   :  { %515 = vmatpush.msrb.mxu2 %v3092_v1  ;;  %397 = vmatpush.msra.mxu3 %v3095_v3  ;;  %4681 = vst [vmem:[#allocation23_spill] sm:$0xff] %v3193_v36  ;;  %v3207_v41 = vld [vmem:[#allocation6 + $0x28] sm:$0xff]  ;;  %v3216_v44 = vld [vmem:[#allocation6 + $0x20] sm:$0xff] }
  0x35   :  { %427 = vmatpush.msrb.mxu0 %v3087_v0  ;;  %496 = vmatpush.msrb.mxu1 %v3051_v29  ;;  %4682 = vst [vmem:[#allocation24_spill] sm:$0xff] %v3198_v38  ;;  %v230_v51 = vld [vmem:[#allocation8] sm:$0x7] }
  0x36   :  { %516 = vmatpush.msrb.mxu2 %v3100_v4  ;;  %398 = vmatpush.msra.mxu3 %v3103_v5  ;;  %4683 = vst [vmem:[#allocation25_spill] sm:$0xff] %v3204_v40  ;;  %v3327_v54 = vperm.slane %v230_v51, 1 }
  0x37   :  { %257 = vmatmul.f32.gmra.mxu0 %v175_v2  ;;  %497 = vmatpush.msrb.mxu1 %v3054_v33  ;;  %4684 = vst [vmem:[#allocation26_spill] sm:$0xff] %v3207_v41 }
  0x38   :  { %298 = vmatmul.f32.gmra.mxu1 %v175_v2  ;;  %339 = vmatmul.f32.gmra.mxu2 %v175_v2  ;;  %4685 = vst [vmem:[#allocation27_spill] sm:$0xff] %v3212_v43 }
  0x39   :  { %428 = vmatpush.msrb.mxu0 %v3105_v6  ;;  %517 = vmatpush.msrb.mxu2 %v3115_v9  ;;  %4686 = vst [vmem:[#allocation28_spill] sm:$0xff] %v3216_v44 }
  0x3a   :  { %399 = vmatpush.msra.mxu3 %v3110_v7  ;;  %498 = vmatpush.msrb.mxu1 %v3057_v37 }
  0x3b   :  { %429 = vmatpush.msrb.mxu0 %v3112_v8  ;;  %518 = vmatpush.msrb.mxu2 %v3125_v12 }
  0x3c   :  { %400 = vmatpush.msra.mxu3 %v3118_v10  ;;  %499 = vmatpush.msrb.mxu1 %v3060_v42 }
  0x3d   :  { %430 = vmatpush.msrb.mxu0 %v3120_v11  ;;  %401 = vmatmul.f32.vlgmr.msra.gmra.mxu3 %v4632_v15 }
  0x3e   :  { %405 = vmatpush.msrb.mxu3 %v3082_v62  ;;  %519 = vmatpush.msrb.mxu2 %v3140_v17 }
  0x3f   :  { %260 = vmatmul.f32.gmra.mxu0 %v176_v13  ;;  %500 = vmatpush.msrb.mxu1 %v3063_v46 }
  0x40   :  { %301 = vmatmul.f32.gmra.mxu1 %v176_v13  ;;  %342 = vmatmul.f32.gmra.mxu2 %v176_v13 }
  0x41   :  { %406 = vmatpush.msrb.mxu3 %v3092_v1  ;;  %431 = vmatpush.msrb.mxu0 %v3133_v14 }
  0x42   :  { %520 = vmatpush.msrb.mxu2 %v3148_v19  ;;  %501 = vmatpush.msrb.mxu1 %v3066_v49 }
  0x43   :  { %407 = vmatpush.msrb.mxu3 %v3100_v4  ;;  %432 = vmatpush.msrb.mxu0 %v3137_v16 }
  0x44   :  { %521 = vmatpush.msrb.mxu2 %v3154_v21  ;;  %502 = vmatpush.msrb.mxu1 %v3069_v53 }
  0x45   :  { %408 = vmatpush.msrb.mxu3 %v3115_v9  ;;  %433 = vmatpush.msrb.mxu0 %v3143_v18 }
  0x46   :  { %522 = vmatpush.msrb.mxu2 %v3165_v26  ;;  %503 = vmatpush.msrb.mxu1 %v3073_v58 }
  0x47   :  { %263 = vmatmul.f32.gmra.mxu0 %v177_v20  ;;  %409 = vmatpush.msrb.mxu3 %v3125_v12 }
  0x48   :  { %304 = vmatmul.f32.gmra.mxu1 %v177_v20  ;;  %345 = vmatmul.f32.gmra.mxu2 %v177_v20 }
  0x49   :  { %410 = vmatpush.msrb.mxu3 %v3140_v17  ;;  %434 = vmatpush.msrb.mxu0 %v3160_v22 }
  0x4a   :  { %523 = vmatpush.msrb.mxu2 %v3173_v28  ;;  %504 = vmatpush.msrb.mxu1 %v3077_v60 }
  0x4b   :  { %411 = vmatpush.msrb.mxu3 %v3148_v19  ;;  %435 = vmatpush.msrb.mxu0 %v3162_v24 }
  0x4c   :  { %524 = vmatpush.msrb.mxu2 %v3179_v31  ;;  %505 = vmatpush.msrb.mxu1 %v3085_v63 }
  0x4d   :  { %412 = vmatpush.msrb.mxu3 %v3154_v21  ;;  %436 = vmatpush.msrb.mxu0 %v3168_v27 }
  0x4e   :  { %525 = vmatpush.msrb.mxu2 %v3190_v35  ;;  %506 = vmatpush.msrb.mxu1 %v3095_v3 }
  0x4f   :  { %266 = vmatmul.f32.gmra.mxu0 %v178_v30  ;;  %413 = vmatpush.msrb.mxu3 %v3165_v26 }
  0x50   :  { %307 = vmatmul.f32.gmra.mxu1 %v178_v30  ;;  %348 = vmatmul.f32.gmra.mxu2 %v178_v30 }
  0x51   :  { %414 = vmatpush.msrb.mxu3 %v3173_v28  ;;  %437 = vmatpush.msrb.mxu0 %v3182_v32 }
  0x52   :  { %526 = vmatpush.msrb.mxu2 %v3198_v38  ;;  %507 = vmatpush.msrb.mxu1 %v3103_v5 }
  0x53   :  { %415 = vmatpush.msrb.mxu3 %v3179_v31  ;;  %438 = vmatpush.msrb.mxu0 %v3187_v34 }
  0x54   :  { %527 = vmatpush.msrb.mxu2 %v3204_v40  ;;  %508 = vmatpush.msrb.mxu1 %v3110_v7 }
  0x55   :  { %416 = vmatpush.msrb.mxu3 %v3190_v35  ;;  %439 = vmatpush.msrb.mxu0 %v3193_v36 }
  0x56   :  { %528 = vmatpush.msrb.mxu2 %v3212_v43  ;;  %509 = vmatpush.msrb.mxu1 %v3118_v10 }
  0x57   :  { %269 = vmatmul.f32.gmra.mxu0 %v179_v39  ;;  %417 = vmatpush.msrb.mxu3 %v3198_v38 }
  0x58   :  { %310 = vmatmul.f32.gmra.mxu1 %v179_v39  ;;  %351 = vmatmul.f32.gmra.mxu2 %v179_v39 }
  0x59   :  { %418 = vmatpush.msrb.mxu3 %v3204_v40  ;;  %440 = vmatpush.msrb.mxu0 %v3207_v41 }
  0x5a   :  { %529 = vmatpush.msrb.mxu2 %v3216_v44  ;;  %623 = vmatpush.msra.mxu1 %v3082_v62 }
  0x5b   :  { %419 = vmatpush.msrb.mxu3 %v3212_v43  ;;  %603 = vmatpush.msra.mxu0 %v3046_v23 }
  0x5c   :  { %643 = vmatpush.msra.mxu2 %v3075_v59  ;;  %624 = vmatpush.msra.mxu1 %v3092_v1 }
  0x5d   :  { %420 = vmatpush.msrb.mxu3 %v3216_v44  ;;  %604 = vmatpush.msra.mxu0 %v3048_v25 }
  0x5e   :  { %421 = vmatmul.f32.vlgmr.msrb.gmra.mxu3 %v4632_v15  ;;  %644 = vmatpush.msra.mxu2 %v3079_v61 }
  0x5f   :  { %272 = vmatmul.f32.gmra.mxu0 %v180_v45  ;;  %534 = vmatpush.msra.mxu3 %v3075_v59 }
  0x60   :  { %313 = vmatmul.f32.gmra.mxu1 %v180_v45  ;;  %354 = vmatmul.f32.gmra.mxu2 %v180_v45 }
  0x61   :  { %535 = vmatpush.msra.mxu3 %v3079_v61  ;;  %605 = vmatpush.msra.mxu0 %v3051_v29 }
  0x62   :  { %625 = vmatpush.msra.mxu1 %v3100_v4  ;;  %645 = vmatpush.msra.mxu2 %v3087_v0 }
  0x63   :  { %536 = vmatpush.msra.mxu3 %v3087_v0  ;;  %606 = vmatpush.msra.mxu0 %v3054_v33 }
  0x64   :  { %626 = vmatpush.msra.mxu1 %v3115_v9  ;;  %646 = vmatpush.msra.mxu2 %v3105_v6 }
  0x65   :  { %537 = vmatpush.msra.mxu3 %v3105_v6  ;;  %607 = vmatpush.msra.mxu0 %v3057_v37 }
  0x66   :  { %627 = vmatpush.msra.mxu1 %v3125_v12  ;;  %647 = vmatpush.msra.mxu2 %v3112_v8 }
  0x67   :  { %275 = vmatmul.f32.gmra.mxu0 %v181_v47  ;;  %538 = vmatpush.msra.mxu3 %v3112_v8 }
  0x68   :  { %316 = vmatmul.f32.gmra.mxu1 %v181_v47  ;;  %357 = vmatmul.f32.gmra.mxu2 %v181_v47  ;;  %v171_v47 = vlaneseq }
  0x69   :  { %539 = vmatpush.msra.mxu3 %v3120_v11  ;;  %608 = vmatpush.msra.mxu0 %v3060_v42 }
  0x6a   :  { %628 = vmatpush.msra.mxu1 %v3140_v17  ;;  %648 = vmatpush.msra.mxu2 %v3120_v11 }
  0x6b   :  { %540 = vmatpush.msra.mxu3 %v3133_v14  ;;  %609 = vmatpush.msra.mxu0 %v3063_v46 }
  0x6c   :  { %629 = vmatpush.msra.mxu1 %v3148_v19  ;;  %649 = vmatpush.msra.mxu2 %v3133_v14 }
  0x6d   :  { %541 = vmatpush.msra.mxu3 %v3137_v16  ;;  %610 = vmatpush.msra.mxu0 %v3066_v49 }
  0x6e   :  { %630 = vmatpush.msra.mxu1 %v3154_v21  ;;  %650 = vmatpush.msra.mxu2 %v3137_v16 }
  0x6f   :  { %441 = vmatmul.f32.vlgmr.msrb.gmra.mxu0 %v4632_v15  ;;  %542 = vmatpush.msra.mxu3 %v3143_v18 }
  0x70   :  { %611 = vmatpush.msra.mxu0 %v3069_v53  ;;  %631 = vmatpush.msra.mxu1 %v3165_v26 }
  0x71   :  { %543 = vmatpush.msra.mxu3 %v3160_v22  ;;  %651 = vmatpush.msra.mxu2 %v3143_v18 }
  0x72   :  { %612 = vmatpush.msra.mxu0 %v3073_v58  ;;  %632 = vmatpush.msra.mxu1 %v3173_v28 }
  0x73   :  { %544 = vmatpush.msra.mxu3 %v3162_v24  ;;  %652 = vmatpush.msra.mxu2 %v3160_v22 }
  0x74   :  { %613 = vmatpush.msra.mxu0 %v3077_v60  ;;  %633 = vmatpush.msra.mxu1 %v3179_v31 }
  0x75   :  { %545 = vmatpush.msra.mxu3 %v3168_v27  ;;  %653 = vmatpush.msra.mxu2 %v3162_v24 }
  0x76   :  { %614 = vmatpush.msra.mxu0 %v3085_v63  ;;  %634 = vmatpush.msra.mxu1 %v3190_v35 }
  0x77   :  { %546 = vmatpush.msra.mxu3 %v3182_v32  ;;  %654 = vmatpush.msra.mxu2 %v3168_v27 }
  0x78   :  { %615 = vmatpush.msra.mxu0 %v3095_v3  ;;  %635 = vmatpush.msra.mxu1 %v3198_v38 }
  0x79   :  { %547 = vmatpush.msra.mxu3 %v3187_v34  ;;  %655 = vmatpush.msra.mxu2 %v3182_v32 }
  0x7a   :  { %616 = vmatpush.msra.mxu0 %v3103_v5  ;;  %636 = vmatpush.msra.mxu1 %v3204_v40 }
  0x7b   :  { %548 = vmatpush.msra.mxu3 %v3193_v36  ;;  %656 = vmatpush.msra.mxu2 %v3187_v34 }
  0x7c   :  { %617 = vmatpush.msra.mxu0 %v3110_v7  ;;  %637 = vmatpush.msra.mxu1 %v3212_v43 }
  0x7d   :  { %549 = vmatpush.msra.mxu3 %v3207_v41  ;;  %657 = vmatpush.msra.mxu2 %v3193_v36 }
  0x7e   :  { %618 = vmatpush.msra.mxu0 %v3118_v10  ;;  %638 = vmatpush.msra.mxu1 %v3216_v44 }
  0x7f   :  { %712 = vmatpush.msrb.mxu3 %v3046_v23  ;;  %658 = vmatpush.msra.mxu2 %v3207_v41  ;;  %v232_v41 = vperm.slane %v230_v51, 0 }
  0x80   :  { %732 = vmatpush.msrb.mxu0 %v3082_v62 }
  0x81   :  { %713 = vmatpush.msrb.mxu3 %v3048_v25 }
  0x82   :  { %733 = vmatpush.msrb.mxu0 %v3092_v1 }
  0x83   :  { %714 = vmatpush.msrb.mxu3 %v3051_v29 }
  0x84   :  { %734 = vmatpush.msrb.mxu0 %v3100_v4 }
  0x85   :  { %715 = vmatpush.msrb.mxu3 %v3054_v33 }
  0x86   :  { %735 = vmatpush.msrb.mxu0 %v3115_v9 }
  0x87   :  { %716 = vmatpush.msrb.mxu3 %v3057_v37 }
  0x88   :  { %736 = vmatpush.msrb.mxu0 %v3125_v12 }
  0x89   :  { %717 = vmatpush.msrb.mxu3 %v3060_v42 }
  0x8a   :  { %737 = vmatpush.msrb.mxu0 %v3140_v17 }
  0x8b   :  { %718 = vmatpush.msrb.mxu3 %v3063_v46 }
  0x8c   :  { %738 = vmatpush.msrb.mxu0 %v3148_v19 }
  0x8d   :  { %719 = vmatpush.msrb.mxu3 %v3066_v49 }
  0x8e   :  { %739 = vmatpush.msrb.mxu0 %v3154_v21 }
  0x8f   :  { %720 = vmatpush.msrb.mxu3 %v3069_v53 }
  0x90   :  { %740 = vmatpush.msrb.mxu0 %v3165_v26 }
  0x91   :  { %721 = vmatpush.msrb.mxu3 %v3073_v58 }
  0x92   :  { %741 = vmatpush.msrb.mxu0 %v3173_v28 }
  0x93   :  { %722 = vmatpush.msrb.mxu3 %v3077_v60 }
  0x94   :  { %742 = vmatpush.msrb.mxu0 %v3179_v31 }
  0x95   :  { %723 = vmatpush.msrb.mxu3 %v3085_v63 }
  0x96   :  { %743 = vmatpush.msrb.mxu0 %v3190_v35 }
  0x97   :  { %724 = vmatpush.msrb.mxu3 %v3095_v3 }
  0x98   :  { %744 = vmatpush.msrb.mxu0 %v3198_v38 }
  0x99   :  { %725 = vmatpush.msrb.mxu3 %v3103_v5 }
  0x9a   :  { %745 = vmatpush.msrb.mxu0 %v3204_v40 }
  0x9b   :  { %726 = vmatpush.msrb.mxu3 %v3110_v7 }
  0x9c   :  { %746 = vmatpush.msrb.mxu0 %v3212_v43 }
  0x9d   :  { %727 = vmatpush.msrb.mxu3 %v3118_v10  ;;  %v3332_v10 = vand.u32 127, %v171_v47 }
  0x9e   :  { %747 = vmatpush.msrb.mxu0 %v3216_v44 }
  0x9f   :  { %4687 = vst [vmem:[#allocation29_spill] sm:$0xff] %v3332_v10  ;;  %vm173_vm0 = vcmp.lt.s32.totalorder %v3332_v10, 32 }
  0xac   :  { %v3321_v48 = vpop.f32.mrf.mxu0 }
  0xad   :  { %v3323_v50 = vpop.f32.mrf.mxu1 }
  0xb3   :  { %v3325_v52 = vpop.f32.mrf.mxu2 }
  0xb4   :  { %v258_v55 = vpop.f32.mrf.mxu0 }
  0xb5   :  { %v299_v56 = vpop.f32.mrf.mxu1 }
  0xb6   :  { %v300_v57 = vadd.f32 %v299_v56, %v3327_v54 }
  0xbb   :  { %v340_v2 = vpop.f32.mrf.mxu2 }
  0xbc   :  { %v261_v13 = vpop.f32.mrf.mxu0 }
  0xbd   :  { %v302_v20 = vpop.f32.mrf.mxu1  ;;  %v262_v32 = vadd.f32 %v261_v13, %v232_v41 }
  0xbe   :  { %v303_v30 = vadd.f32 %v302_v20, %v3327_v54 }
  0xc3   :  { %v343_v39 = vpop.f32.mrf.mxu2 }
  0xc4   :  { %v264_v45 = vpop.f32.mrf.mxu0 }
  0xc5   :  { %v305_v15 = vpop.f32.mrf.mxu1  ;;  %v265_v36 = vadd.f32 %v264_v45, %v232_v41 }
  0xc6   :  { %v306_v44 = vadd.f32 %v305_v15, %v3327_v54  ;;  %v234_v15 = vperm.slane %v230_v51, 2 }
  0xcb   :  { %v346_v43 = vpop.f32.mrf.mxu2 }
  0xcc   :  { %v267_v7 = vpop.f32.mrf.mxu0 }
  0xcd   :  { %v268_v56 = vadd.f32 %v267_v7, %v232_v41  ;;  %v308_v40 = vpop.f32.mrf.mxu1  ;;  %v347_v7 = vadd.f32 %v346_v43, %v234_v15 }
  0xce   :  { %v309_v5 = vadd.f32 %v308_v40, %v3327_v54 }
  0xcf   :  { %v3338_v20 = vsel %vm173_vm0, %v265_v36, %v268_v56  ;;  %v3342_v34 = vsel %vm173_vm0, %v268_v56, %v265_v36 }
  0xd0   :  { %4688 = vst [vmem:[#allocation30_spill] sm:$0xff] %v3338_v20  ;;  %v3346_v47 = vsel %vm173_vm0, %v306_v44, %v309_v5  ;;  %v3350_v45 = vsel %vm173_vm0, %v309_v5, %v306_v44  ;;  %v344_v44 = vadd.f32 %v343_v39, %v234_v15 }
  0xd1   :  { %4689 = vst [vmem:[#allocation31_spill] sm:$0xff] %v3342_v34 }
  0xd2   :  { %4690 = vst [vmem:[#allocation32_spill] sm:$0xff] %v3346_v47 }
  0xd3   :  { %4691 = vst [vmem:[#allocation33_spill] sm:$0xff] %v3350_v45  ;;  %v349_v38 = vpop.f32.mrf.mxu2 }
  0xd4   :  { %v350_v40 = vadd.f32 %v349_v38, %v234_v15  ;;  %v270_v3 = vpop.f32.mrf.mxu0 }
  0xd5   :  { %v271_v35 = vadd.f32 %v270_v3, %v232_v41  ;;  %v311_v20 = vpop.f32.mrf.mxu1 }
  0xd6   :  { %v3354_v36 = vsel %vm173_vm0, %v347_v7, %v350_v40  ;;  %v3358_v51 = vsel %vm173_vm0, %v350_v40, %v347_v7  ;;  %v312_v56 = vadd.f32 %v311_v20, %v3327_v54  ;;  %v402_v40 = vpop.f32.mrf.mxu3 }
  0xd7   :  { %4692 = vst [vmem:[#allocation34_spill] sm:$0xff] %v3354_v36  ;;  %v3363_v5 = vsel %vm173_vm0, %v262_v32, %v271_v35  ;;  %v3367_v38 = vsel %vm173_vm0, %v271_v35, %v262_v32 }
  0xd8   :  { %4693 = vst [vmem:[#allocation35_spill] sm:$0xff] %v3358_v51  ;;  %v3371_v3 = vsel %vm173_vm0, %v303_v30, %v312_v56  ;;  %v3375_v43 = vsel %vm173_vm0, %v312_v56, %v303_v30  ;;  %v259_v51 = vadd.f32 %v258_v55, %v232_v41 }
  0xd9   :  { %4694 = vst [vmem:[#allocation36_spill] sm:$0xff] %v3367_v38 }
  0xda   :  { %4695 = vst [vmem:[#allocation37_spill] sm:$0xff] %v3371_v3 }
  0xdb   :  { %4696 = vst [vmem:[#allocation38_spill] sm:$0xff] %v3375_v43  ;;  %v352_v13 = vpop.f32.mrf.mxu2 }
  0xdc   :  { %v353_v7 = vadd.f32 %v352_v13, %v234_v15  ;;  %v273_v20 = vpop.f32.mrf.mxu0  ;;  %v341_v13 = vadd.f32 %v340_v2, %v234_v15 }
  0xdd   :  { %v274_v45 = vadd.f32 %v273_v20, %v232_v41  ;;  %v314_v34 = vpop.f32.mrf.mxu1  ;;  %v256_v20 = vadd.f32 %v3321_v48, %v232_v41 }
  0xde   :  { %v3379_v32 = vsel %vm173_vm0, %v344_v44, %v353_v7  ;;  %v3383_v35 = vsel %vm173_vm0, %v353_v7, %v344_v44  ;;  %v315_v38 = vadd.f32 %v314_v34, %v3327_v54 }
  0xdf   :  { %4697 = vst [vmem:[#allocation39_spill] sm:$0xff] %v3379_v32  ;;  %v3388_v30 = vsel %vm173_vm0, %v259_v51, %v274_v45  ;;  %v3392_v39 = vsel %vm173_vm0, %v274_v45, %v259_v51  ;;  %v297_v45 = vadd.f32 %v3323_v50, %v3327_v54 }
  0xe0   :  { %4698 = vst [vmem:[#allocation40_spill] sm:$0xff] %v3383_v35  ;;  %v3396_v55 = vsel %vm173_vm0, %v300_v57, %v315_v38  ;;  %v3400_v56 = vsel %vm173_vm0, %v315_v38, %v300_v57 }
  0xe1   :  { %4699 = vst [vmem:[#allocation41_spill] sm:$0xff] %v3392_v39  ;;  %v422_v2 = vpop.f32.mrf.mxu3 }
  0xe2   :  { %4700 = vst [vmem:[#allocation42_spill] sm:$0xff] %v3400_v56 }
  0xe3   :  { %v355_v44 = vpop.f32.mrf.mxu2 }
  0xe4   :  { %v356_v7 = vadd.f32 %v355_v44, %v234_v15  ;;  %v276_v34 = vpop.f32.mrf.mxu0 }
  0xe5   :  { %v277_v35 = vadd.f32 %v276_v34, %v232_v41  ;;  %v317_v43 = vpop.f32.mrf.mxu1 }
  0xe6   :  { %v3407_v51 = vsel %vm173_vm0, %v341_v13, %v356_v7  ;;  %v3411_v39 = vsel %vm173_vm0, %v356_v7, %v341_v13  ;;  %v318_v57 = vadd.f32 %v317_v43, %v3327_v54  ;;  %v338_v43 = vadd.f32 %v3325_v52, %v234_v15 }
  0xe7   :  { %4701 = vst [vmem:[#allocation43_spill] sm:$0xff] %v3411_v39  ;;  %v361_v38 = vsel %vm173_vm0, %v256_v20, %v277_v35  ;;  %v3418_v41 = vsel %vm173_vm0, %v277_v35, %v256_v20 }
  0xe8   :  { %4702 = vst [vmem:[#allocation44_spill] sm:$0xff] %v3418_v41  ;;  %v445_v48 = vadd.f32 %v402_v40, %v361_v38  ;;  %v362_v50 = vsel %vm173_vm0, %v297_v45, %v318_v57  ;;  %v3424_v44 = vsel %vm173_vm0, %v318_v57, %v297_v45 }
  0xe9   :  { %4703 = vst [vmem:[#allocation45_spill] sm:$0xff] %v3424_v44  ;;  %v465_v13 = vadd.f32 %v422_v2, %v362_v50  ;;  %v3431_v50 = vld [vmem:[#allocation8 + $0x9] ss:$0 sm:$0xff] }
  0xea   :  { %v2558_v7 = vmul.f32 -1.442695, %v445_v48 }
  0xeb   :  { %v2559_v34 = vmul.f32 -1.442695, %v465_v13  ;;  %v358_v54 = vpop.f32.mrf.mxu2 }
  0xec   :  { %2605 = vpow2.f32 %v2558_v7  ;;  %v359_v39 = vadd.f32 %v358_v54, %v234_v15  ;;  %v442_v15 = vpop.f32.mrf.mxu0 }
  0xed   :  { %2607 = vpow2.f32 %v2559_v34 }
  0xee   :  { %v3429_v35 = vsel %vm173_vm0, %v359_v39, %v338_v43 }
  0xef   :  { %4704 = vst [vmem:[#allocation46_spill] sm:$0xff] %v3429_v35 }
  0xf2   :  { %v2606_v40 = vpop.eup %2605 }
  0xf3   :  { %v2608_v20 = vpop.eup %2607  ;;  %v449_v38 = vadd.f32 1.0, %v2606_v40  ;;  %v485_v40 = vadd.f32 %v3431_v50, %v442_v15 }
  0xf4   :  { %v469_v41 = vadd.f32 1.0, %v2608_v20 }
  0xf5   :  { %2609 = vrcp.f32 %v449_v38  ;;  %v461_v7 = vand.u32 2147483648, %v449_v38  ;;  %v459_v54 = vand.u32 2147483647, %v449_v38  ;;  %vm455_vm2 = vweird.f32 %v449_v38 }
  0xf6   :  { %2611 = vrcp.f32 %v469_v41  ;;  %v481_v32 = vand.u32 2147483648, %v469_v41  ;;  %vm475_vm6 = vweird.f32 %v469_v41 }
  0xf7   :  { %v462_v20 = vor.u32 1.1754944e-38, %v461_v7  ;;  %vm460_vm4 = vcmp.eq.f32.partialorder %v459_v54, 8.507059e+37 }
  0xfb   :  { %v2610_v45 = vpop.eup %2609 }
  0xfc   :  { %v2612_v57 = vpop.eup %2611  ;;  %v451_v2 = vmul.f32 %v2610_v45, %v449_v38  ;;  %vm456_vm1 = vweird.f32 %v2610_v45  ;;  %v482_v38 = vor.u32 1.1754944e-38, %v481_v32  ;;  %v4717_v32 = vld [vmem:[#allocation19_spill] sm:$0xff] }
  0xfd   :  { %v471_v48 = vmul.f32 %v2612_v57, %v469_v41  ;;  %vm457_vm3 = vmor %vm455_vm2, %vm456_vm1  ;;  %vm476_vm5 = vweird.f32 %v2612_v57 }
  0xfe   :  { %v452_v52 = vsub.f32 1.0, %v451_v2  ;;  %vm477_vm7 = vmor %vm475_vm6, %vm476_vm5 }
  0xff   :  { %v472_v13 = vsub.f32 1.0, %v471_v48  ;;  %v479_v48 = vand.u32 2147483647, %v469_v41 }
 0x100   :  { %v453_v34 = vmul.f32 %v2610_v45, %v452_v52  ;;  %v363_v52 = vsel %vm173_vm0, %v338_v43, %v359_v39  ;;  %v4718_v39 = vld [vmem:[#allocation28_spill] sm:$0xff] }
 0x101   :  { %v473_v35 = vmul.f32 %v2612_v57, %v472_v13  ;;  %vm480_vm8 = vcmp.eq.f32.partialorder %v479_v48, 8.507059e+37 }
 0x102   :  { %v454_v44 = vadd.f32 %v2610_v45, %v453_v34 }
 0x103   :  { %v474_v36 = vadd.f32 %v2612_v57, %v473_v35 }
 0x104   :  { %v458_v56 = vsel %vm457_vm3, %v2610_v45, %v454_v44 }
 0x105   :  { %v463_v47 = vsel %vm460_vm4, %v462_v20, %v458_v56  ;;  %v478_v34 = vsel %vm477_vm7, %v2612_v57, %v474_v36  ;;  %v4716_v36 = vld [vmem:[#allocation26_spill] sm:$0xff] }
 0x106   :  { %v486_v2 = vmul.f32 %v485_v40, %v463_v47  ;;  %v483_v15 = vsel %vm480_vm8, %v482_v38, %v478_v34  ;;  %v4715_v47 = vld [vmem:[#allocation27_spill] sm:$0xff] }
 0x107   :  { %v489_v7 = vsub.f32 1.0, %v483_v15  ;;  %v491_v35 = vmul.f32 0.0, %v483_v15 }
 0x108   :  { %v487_v13 = vadd.f32 %v486_v2, %v363_v52 }
 0x10a   :  { %2613 = vtanh.f32 %v487_v13 }
 0x110   :  { %v2614_v44 = vpop.eup %2613 }
 0x111   :  { %v490_v45 = vmul.f32 %v2614_v44, %v489_v7 }
 0x113   :  { %v3436_v54 = vadd.f32 %v491_v35, %v490_v45 }
 0x115   :  { %4705 = vst [vmem:[#allocation47_spill] sm:$0xff] %v3436_v54  ;;  %510 = vmatmul.f32.vlgmr.msrb.gmra.mxu1 %v3436_v54  ;;  %530 = vmatmul.f32.vlgmr.msrb.gmra.mxu2 %v3436_v54 }
 0x116   :  { %550 = vmatmul.f32.vlgmr.msra.gmra.mxu3 %v3436_v54  ;;  %752 = vmatpush.msrb.mxu1 %v3075_v59 }
 0x117   :  { %821 = vmatpush.msrb.mxu2 %v3046_v23  ;;  %841 = vmatpush.msra.mxu3 %v3082_v62  ;;  %v4706_v23 = vld [vmem:[#allocation22_spill] sm:$0xff] }
 0x118   :  { %753 = vmatpush.msrb.mxu1 %v3079_v61 }
 0x119   :  { %822 = vmatpush.msrb.mxu2 %v3048_v25  ;;  %842 = vmatpush.msra.mxu3 %v3092_v1  ;;  %v4707_v25 = vld [vmem:[#allocation20_spill] sm:$0xff] }
 0x11a   :  { %754 = vmatpush.msrb.mxu1 %v3087_v0 }
 0x11b   :  { %823 = vmatpush.msrb.mxu2 %v3051_v29  ;;  %843 = vmatpush.msra.mxu3 %v3100_v4  ;;  %v4708_v29 = vld [vmem:[#allocation16_spill] sm:$0xff] }
 0x11c   :  { %755 = vmatpush.msrb.mxu1 %v3105_v6 }
 0x11d   :  { %824 = vmatpush.msrb.mxu2 %v3054_v33  ;;  %844 = vmatpush.msra.mxu3 %v3115_v9  ;;  %v4709_v33 = vld [vmem:[#allocation24_spill] sm:$0xff] }
 0x11e   :  { %756 = vmatpush.msrb.mxu1 %v3112_v8 }
 0x11f   :  { %825 = vmatpush.msrb.mxu2 %v3057_v37  ;;  %845 = vmatpush.msra.mxu3 %v3125_v12  ;;  %v4710_v37 = vld [vmem:[#allocation21_spill] sm:$0xff] }
 0x120   :  { %757 = vmatpush.msrb.mxu1 %v3120_v11 }
 0x121   :  { %826 = vmatpush.msrb.mxu2 %v3060_v42  ;;  %846 = vmatpush.msra.mxu3 %v3140_v17  ;;  %v4711_v42 = vld [vmem:[#allocation17_spill] sm:$0xff] }
 0x122   :  { %758 = vmatpush.msrb.mxu1 %v3133_v14 }
 0x123   :  { %827 = vmatpush.msrb.mxu2 %v3063_v46  ;;  %847 = vmatpush.msra.mxu3 %v3148_v19  ;;  %v4712_v46 = vld [vmem:[#allocation25_spill] sm:$0xff] }
 0x124   :  { %759 = vmatpush.msrb.mxu1 %v3137_v16 }
 0x125   :  { %828 = vmatpush.msrb.mxu2 %v3066_v49  ;;  %848 = vmatpush.msra.mxu3 %v3154_v21  ;;  %v4713_v49 = vld [vmem:[#allocation23_spill] sm:$0xff] }
 0x126   :  { %760 = vmatpush.msrb.mxu1 %v3143_v18 }
 0x127   :  { %829 = vmatpush.msrb.mxu2 %v3069_v53  ;;  %849 = vmatpush.msra.mxu3 %v3165_v26  ;;  %v4714_v53 = vld [vmem:[#allocation18_spill] sm:$0xff] }
 0x128   :  { %761 = vmatpush.msrb.mxu1 %v3160_v22 }
 0x129   :  { %830 = vmatpush.msrb.mxu2 %v3073_v58  ;;  %850 = vmatpush.msra.mxu3 %v3173_v28 }
 0x12a   :  { %762 = vmatpush.msrb.mxu1 %v3162_v24 }
 0x12b   :  { %831 = vmatpush.msrb.mxu2 %v3077_v60  ;;  %851 = vmatpush.msra.mxu3 %v3179_v31 }
 0x12c   :  { %763 = vmatpush.msrb.mxu1 %v3168_v27 }
 0x12d   :  { %832 = vmatpush.msrb.mxu2 %v3085_v63  ;;  %852 = vmatpush.msra.mxu3 %v4706_v23 }
 0x12e   :  { %764 = vmatpush.msrb.mxu1 %v4707_v25 }
 0x12f   :  { %833 = vmatpush.msrb.mxu2 %v4708_v29  ;;  %853 = vmatpush.msra.mxu3 %v4709_v33 }
 0x130   :  { %765 = vmatpush.msrb.mxu1 %v4710_v37 }
 0x131   :  { %834 = vmatpush.msrb.mxu2 %v4711_v42  ;;  %854 = vmatpush.msra.mxu3 %v4712_v46 }
 0x132   :  { %766 = vmatpush.msrb.mxu1 %v4713_v49 }
 0x133   :  { %835 = vmatpush.msrb.mxu2 %v4714_v53  ;;  %855 = vmatpush.msra.mxu3 %v4715_v47 }
 0x134   :  { %767 = vmatpush.msrb.mxu1 %v4716_v36 }
 0x135   :  { %836 = vmatpush.msrb.mxu2 %v4717_v32  ;;  %856 = vmatpush.msra.mxu3 %v4718_v39 }
 0x192   :  { %v511_v56 = vpop.f32.mrf.mxu1 }
 0x193   :  { %v554_v41 = vadd.f32 %v511_v56, %v3388_v30 }
 0x195   :  { %v2560_v43 = vmul.f32 -1.442695, %v554_v41 }
 0x197   :  { %2615 = vpow2.f32 %v2560_v43 }
 0x198   :  { %v531_v57 = vpop.f32.mrf.mxu2 }
 0x199   :  { %v574_v40 = vadd.f32 %v531_v57, %v3396_v55  ;;  %v551_v35 = vpop.f32.mrf.mxu3 }
 0x19b   :  { %v2561_v20 = vmul.f32 -1.442695, %v574_v40  ;;  %v594_v40 = vadd.f32 %v3431_v50, %v551_v35 }
 0x19d   :  { %v2616_v2 = vpop.eup %2615  ;;  %2617 = vpow2.f32 %v2561_v20 }
 0x19e   :  { %v558_v48 = vadd.f32 1.0, %v2616_v2 }
 0x1a0   :  { %2619 = vrcp.f32 %v558_v48  ;;  %v570_v7 = vand.u32 2147483648, %v558_v48  ;;  %v568_v30 = vand.u32 2147483647, %v558_v48  ;;  %vm564_vm10 = vweird.f32 %v558_v48 }
 0x1a2   :  { %v571_v55 = vor.u32 1.1754944e-38, %v570_v7  ;;  %vm569_vm12 = vcmp.eq.f32.partialorder %v568_v30, 8.507059e+37 }
 0x1a3   :  { %v2618_v52 = vpop.eup %2617 }
 0x1a4   :  { %v578_v13 = vadd.f32 1.0, %v2618_v52 }
 0x1a6   :  { %v2620_v34 = vpop.eup %2619  ;;  %2621 = vrcp.f32 %v578_v13  ;;  %v590_v52 = vand.u32 2147483648, %v578_v13  ;;  %vm584_vm14 = vweird.f32 %v578_v13 }
 0x1a7   :  { %v560_v38 = vmul.f32 %v2620_v34, %v558_v48  ;;  %vm565_vm9 = vweird.f32 %v2620_v34 }
 0x1a8   :  { %vm566_vm11 = vmor %vm564_vm10, %vm565_vm9 }
 0x1a9   :  { %v561_v15 = vsub.f32 1.0, %v560_v38 }
 0x1ab   :  { %v562_v44 = vmul.f32 %v2620_v34, %v561_v15  ;;  %v588_v15 = vand.u32 2147483647, %v578_v13 }
 0x1ac   :  { %v2622_v45 = vpop.eup %2621 }
 0x1ad   :  { %v580_v56 = vmul.f32 %v2622_v45, %v578_v13  ;;  %v563_v41 = vadd.f32 %v2620_v34, %v562_v44  ;;  %vm585_vm13 = vweird.f32 %v2622_v45  ;;  %v591_v44 = vor.u32 1.1754944e-38, %v590_v52 }
 0x1ae   :  { %vm586_vm15 = vmor %vm584_vm14, %vm585_vm13  ;;  %vm589_vm1 = vcmp.eq.f32.partialorder %v588_v15, 8.507059e+37 }
 0x1af   :  { %v581_v43 = vsub.f32 1.0, %v580_v56  ;;  %v567_v57 = vsel %vm566_vm11, %v2620_v34, %v563_v41 }
 0x1b0   :  { %v572_v20 = vsel %vm569_vm12, %v571_v55, %v567_v57  ;;  %v4721_v55 = vld [vmem:[#allocation39_spill] sm:$0xff] }
 0x1b1   :  { %v582_v2 = vmul.f32 %v2622_v45, %v581_v43  ;;  %v595_v38 = vmul.f32 %v594_v40, %v572_v20 }
 0x1b3   :  { %v583_v10 = vadd.f32 %v2622_v45, %v582_v2  ;;  %v596_v3 = vadd.f32 %v595_v38, %v3407_v51  ;;  %v3500_v51 = vld [vmem:[#allocation6 + $0x798] sm:$0xff] }
 0x1b5   :  { %v587_v48 = vsel %vm586_vm15, %v2622_v45, %v583_v10  ;;  %2623 = vtanh.f32 %v596_v3  ;;  %v3505_v10 = vld [vmem:[#allocation6 + $0x718] sm:$0xff] }
 0x1b6   :  { %v592_v7 = vsel %vm589_vm1, %v591_v44, %v587_v48  ;;  %v3510_v3 = vld [vmem:[#allocation6 + $0x698] sm:$0xff]  ;;  %v3575_v48 = vld [vmem:[#allocation6 + $0x7a8] sm:$0xff] }
 0x1b7   :  { %v598_v34 = vsub.f32 1.0, %v592_v7  ;;  %v600_v35 = vmul.f32 %v592_v7, %v3436_v54  ;;  %v3579_v7 = vld [vmem:[#allocation6 + $0x7a0] sm:$0xff] }
 0x1bb   :  { %v2624_v30 = vpop.eup %2623 }
 0x1bc   :  { %v599_v56 = vmul.f32 %v2624_v30, %v598_v34  ;;  %v3582_v34 = vld [vmem:[#allocation6 + $0x728] sm:$0xff]  ;;  %v3586_v30 = vld [vmem:[#allocation6 + $0x720] sm:$0xff] }
 0x1be   :  { %v3494_v41 = vadd.f32 %v600_v35, %v599_v56  ;;  %v3589_v56 = vld [vmem:[#allocation6 + $0x6a8] sm:$0xff]  ;;  %v3593_v35 = vld [vmem:[#allocation6 + $0x6a0] sm:$0xff] }
 0x1c0   :  { %4719 = vst [vmem:[#allocation22_spill] sm:$0xff] %v3494_v41  ;;  %619 = vmatmul.f32.vlgmr.msra.gmra.mxu0 %v3494_v41  ;;  %639 = vmatmul.f32.vlgmr.msra.gmra.mxu1 %v3494_v41 }
 0x1c1   :  { %659 = vmatmul.f32.vlgmr.msra.gmra.mxu2 %v3494_v41  ;;  %861 = vmatpush.msra.mxu0 %v3075_v59  ;;  %v3515_v59 = vld [vmem:[#allocation6 + $0x618] sm:$0xff] }
 0x1c2   :  { %930 = vmatpush.msra.mxu1 %v3500_v51  ;;  %950 = vmatpush.msra.mxu2 %v3082_v62  ;;  %v3525_v62 = vld [vmem:[#allocation6 + $0x518] sm:$0xff] }
 0x1c3   :  { %862 = vmatpush.msra.mxu0 %v3079_v61  ;;  %v3520_v61 = vld [vmem:[#allocation6 + $0x598] sm:$0xff] }
 0x1c4   :  { %931 = vmatpush.msra.mxu1 %v3505_v10  ;;  %951 = vmatpush.msra.mxu2 %v3092_v1  ;;  %v3535_v1 = vld [vmem:[#allocation6 + $0x418] sm:$0xff] }
 0x1c5   :  { %863 = vmatpush.msra.mxu0 %v3087_v0  ;;  %v3530_v0 = vld [vmem:[#allocation6 + $0x498] sm:$0xff] }
 0x1c6   :  { %932 = vmatpush.msra.mxu1 %v3510_v3  ;;  %952 = vmatpush.msra.mxu2 %v3100_v4  ;;  %v3540_v4 = vld [vmem:[#allocation6 + $0x398] sm:$0xff] }
 0x1c7   :  { %864 = vmatpush.msra.mxu0 %v3105_v6  ;;  %v4720_v6 = vld [vmem:[#allocation37_spill] sm:$0xff] }
 0x1c8   :  { %933 = vmatpush.msra.mxu1 %v3515_v59  ;;  %953 = vmatpush.msra.mxu2 %v3115_v9 }
 0x1c9   :  { %865 = vmatpush.msra.mxu0 %v3112_v8 }
 0x1ca   :  { %934 = vmatpush.msra.mxu1 %v3520_v61  ;;  %954 = vmatpush.msra.mxu2 %v3125_v12 }
 0x1cb   :  { %866 = vmatpush.msra.mxu0 %v3120_v11 }
 0x1cc   :  { %935 = vmatpush.msra.mxu1 %v3525_v62  ;;  %955 = vmatpush.msra.mxu2 %v3140_v17 }
 0x1cd   :  { %867 = vmatpush.msra.mxu0 %v3133_v14 }
 0x1ce   :  { %936 = vmatpush.msra.mxu1 %v3530_v0  ;;  %956 = vmatpush.msra.mxu2 %v3148_v19 }
 0x1cf   :  { %868 = vmatpush.msra.mxu0 %v3137_v16 }
 0x1d0   :  { %937 = vmatpush.msra.mxu1 %v3535_v1  ;;  %957 = vmatpush.msra.mxu2 %v3154_v21 }
 0x1d1   :  { %869 = vmatpush.msra.mxu0 %v3143_v18 }
 0x1d2   :  { %938 = vmatpush.msra.mxu1 %v3540_v4  ;;  %958 = vmatpush.msra.mxu2 %v3165_v26 }
 0x1d3   :  { %870 = vmatpush.msra.mxu0 %v3160_v22 }
 0x1d4   :  { %939 = vmatpush.msra.mxu1 %v3073_v58  ;;  %959 = vmatpush.msra.mxu2 %v3173_v28 }
 0x1d5   :  { %871 = vmatpush.msra.mxu0 %v3162_v24 }
 0x1d6   :  { %940 = vmatpush.msra.mxu1 %v3077_v60  ;;  %960 = vmatpush.msra.mxu2 %v3179_v31 }
 0x1d7   :  { %872 = vmatpush.msra.mxu0 %v3168_v27 }
 0x1d8   :  { %941 = vmatpush.msra.mxu1 %v3085_v63  ;;  %961 = vmatpush.msra.mxu2 %v4706_v23 }
 0x1d9   :  { %873 = vmatpush.msra.mxu0 %v4707_v25 }
 0x1da   :  { %942 = vmatpush.msra.mxu1 %v4708_v29  ;;  %962 = vmatpush.msra.mxu2 %v4709_v33 }
 0x1db   :  { %874 = vmatpush.msra.mxu0 %v4710_v37 }
 0x1dc   :  { %943 = vmatpush.msra.mxu1 %v4711_v42  ;;  %963 = vmatpush.msra.mxu2 %v4712_v46 }
 0x1dd   :  { %875 = vmatpush.msra.mxu0 %v4713_v49 }
 0x1de   :  { %944 = vmatpush.msra.mxu1 %v4714_v53  ;;  %964 = vmatpush.msra.mxu2 %v4715_v47 }
 0x1df   :  { %876 = vmatpush.msra.mxu0 %v4716_v36 }
 0x1e0   :  { %945 = vmatpush.msra.mxu1 %v4717_v32  ;;  %965 = vmatpush.msra.mxu2 %v4718_v39 }
 0x23d   :  { %v620_v58 = vpop.f32.mrf.mxu0  ;;  %v640_v60 = vpop.f32.mrf.mxu1 }
 0x23e   :  { %v663_v63 = vadd.f32 %v620_v58, %v3363_v5  ;;  %v683_v8 = vadd.f32 %v640_v60, %v4720_v6  ;;  %v3596_v58 = vld [vmem:[#allocation6 + $0x628] sm:$0xff]  ;;  %v3600_v60 = vld [vmem:[#allocation6 + $0x620] sm:$0xff] }
 0x23f   :  { %v3607_v6 = vld [vmem:[#allocation6 + $0x5a0] sm:$0xff] }
 0x240   :  { %v2562_v9 = vmul.f32 -1.442695, %v663_v63  ;;  %v2563_v11 = vmul.f32 -1.442695, %v683_v8  ;;  %v3603_v63 = vld [vmem:[#allocation6 + $0x5a8] sm:$0xff] }
 0x241   :  { %v3610_v8 = vld [vmem:[#allocation6 + $0x528] sm:$0xff] }
 0x242   :  { %2625 = vpow2.f32 %v2562_v9  ;;  %v3614_v9 = vld [vmem:[#allocation6 + $0x520] sm:$0xff] }
 0x243   :  { %2627 = vpow2.f32 %v2563_v11  ;;  %v3617_v11 = vld [vmem:[#allocation6 + $0x4a8] sm:$0xff] }
 0x244   :  { %v660_v23 = vpop.f32.mrf.mxu2 }
 0x245   :  { %v703_v42 = vadd.f32 %v3431_v50, %v660_v23  ;;  %v3665_v23 = vld [vmem:[#allocation6 + $0x1a8] sm:$0xff] }
 0x248   :  { %v2626_v12 = vpop.eup %2625 }
 0x249   :  { %v2628_v14 = vpop.eup %2627  ;;  %v667_v16 = vadd.f32 1.0, %v2626_v12  ;;  %v3621_v12 = vld [vmem:[#allocation6 + $0x4a0] sm:$0xff] }
 0x24a   :  { %v687_v17 = vadd.f32 1.0, %v2628_v14  ;;  %v3624_v14 = vld [vmem:[#allocation6 + $0x428] sm:$0xff] }
 0x24b   :  { %2629 = vrcp.f32 %v667_v16  ;;  %v679_v27 = vand.u32 2147483648, %v667_v16  ;;  %v677_v31 = vand.u32 2147483647, %v667_v16  ;;  %vm673_vm3 = vweird.f32 %v667_v16 }
 0x24c   :  { %2631 = vrcp.f32 %v687_v17  ;;  %v699_v32 = vand.u32 2147483648, %v687_v17  ;;  %vm693_vm7 = vweird.f32 %v687_v17  ;;  %v697_v45 = vand.u32 2147483647, %v687_v17 }
 0x24d   :  { %v680_v29 = vor.u32 1.1754944e-38, %v679_v27  ;;  %vm678_vm5 = vcmp.eq.f32.partialorder %v677_v31, 8.507059e+37  ;;  %v3653_v27 = vld [vmem:[#allocation6 + $0x2a0] sm:$0xff]  ;;  %v3659_v31 = vld [vmem:[#allocation6 + $0x218] sm:$0xff] }
 0x24e   :  { %v700_v40 = vor.u32 1.1754944e-38, %v699_v32  ;;  %vm698_vm9 = vcmp.eq.f32.partialorder %v697_v45, 8.507059e+37 }
 0x251   :  { %v2630_v18 = vpop.eup %2629 }
 0x252   :  { %v2632_v19 = vpop.eup %2631  ;;  %v669_v21 = vmul.f32 %v2630_v18, %v667_v16  ;;  %vm674_vm2 = vweird.f32 %v2630_v18  ;;  %v3628_v16 = vld [vmem:[#allocation6 + $0x420] sm:$0xff] }
 0x253   :  { %v689_v22 = vmul.f32 %v2632_v19, %v687_v17  ;;  %vm675_vm4 = vmor %vm673_vm3, %vm674_vm2  ;;  %vm694_vm6 = vweird.f32 %v2632_v19  ;;  %v3631_v17 = vld [vmem:[#allocation6 + $0x3a8] sm:$0xff] }
 0x254   :  { %v670_v24 = vsub.f32 1.0, %v669_v21  ;;  %vm695_vm8 = vmor %vm693_vm7, %vm694_vm6  ;;  %v3641_v21 = vld [vmem:[#allocation6 + $0x318] sm:$0xff] }
 0x255   :  { %v690_v26 = vsub.f32 1.0, %v689_v22  ;;  %v3644_v22 = vld [vmem:[#allocation6 + $0x320] sm:$0xff] }
 0x256   :  { %v671_v28 = vmul.f32 %v2630_v18, %v670_v24  ;;  %v3647_v24 = vld [vmem:[#allocation6 + $0x2a8] sm:$0xff] }
 0x257   :  { %v691_v5 = vmul.f32 %v2632_v19, %v690_v26  ;;  %v3650_v26 = vld [vmem:[#allocation6 + $0x298] sm:$0xff] }
 0x258   :  { %v672_v25 = vadd.f32 %v2630_v18, %v671_v28  ;;  %v3656_v28 = vld [vmem:[#allocation6 + $0x228] sm:$0xff] }
 0x259   :  { %v692_v49 = vadd.f32 %v2632_v19, %v691_v5  ;;  %v3662_v5 = vld [vmem:[#allocation6 + $0x220] sm:$0xff] }
 0x25a   :  { %v676_v37 = vsel %vm675_vm4, %v2630_v18, %v672_v25  ;;  %v3635_v18 = vld [vmem:[#allocation6 + $0x3a0] sm:$0xff]  ;;  %v3668_v25 = vld [vmem:[#allocation6 + $0x198] sm:$0xff] }
 0x25b   :  { %v681_v53 = vsel %vm678_vm5, %v680_v29, %v676_v37  ;;  %v696_v57 = vsel %vm695_vm8, %v2632_v19, %v692_v49  ;;  %v3638_v19 = vld [vmem:[#allocation6 + $0x328] sm:$0xff]  ;;  %v3675_v37 = vld [vmem:[#allocation6 + $0x118] sm:$0xff] }
 0x25c   :  { %v704_v13 = vmul.f32 %v703_v42, %v681_v53  ;;  %v701_v20 = vsel %vm698_vm9, %v700_v40, %v696_v57  ;;  %v3672_v29 = vld [vmem:[#allocation6 + $0x128] sm:$0xff]  ;;  %v3682_v49 = vld [vmem:[#allocation6 + $0x98] sm:$0xff] }
 0x25d   :  { %v707_v2 = vsub.f32 1.0, %v701_v20  ;;  %v709_v15 = vmul.f32 %v701_v20, %v3494_v41  ;;  %v3679_v42 = vld [vmem:[#allocation6 + $0xa8] sm:$0xff]  ;;  %4723 = vst [vmem:[#allocation16_spill] sm:$0xff] %v3682_v49 }
 0x25e   :  { %v705_v43 = vadd.f32 %v704_v13, %v4721_v55  ;;  %4722 = vst [vmem:[#allocation20_spill] sm:$0xff] %v3679_v42  ;;  %v4726_v55 = vld [vmem:[#allocation30_spill] sm:$0xff] }
 0x260   :  { %2633 = vtanh.f32 %v705_v43 }
 0x266   :  { %v2634_v52 = vpop.eup %2633 }
 0x267   :  { %v708_v38 = vmul.f32 %v2634_v52, %v707_v2 }
 0x269   :  { %v3570_v44 = vadd.f32 %v709_v15, %v708_v38 }
 0x26b   :  { %728 = vmatmul.f32.vlgmr.msrb.gmra.mxu3 %v3570_v44  ;;  %748 = vmatmul.f32.vlgmr.msrb.gmra.mxu0 %v3570_v44 }
 0x26c   :  { %768 = vmatmul.f32.vlgmr.msrb.gmra.mxu1 %v3570_v44  ;;  %970 = vmatpush.msrb.mxu3 %v3575_v48 }
 0x26d   :  { %1039 = vmatpush.msrb.mxu0 %v3500_v51  ;;  %1059 = vmatpush.msrb.mxu1 %v3579_v7 }
 0x26e   :  { %971 = vmatpush.msrb.mxu3 %v3582_v34 }
 0x26f   :  { %1040 = vmatpush.msrb.mxu0 %v3505_v10  ;;  %1060 = vmatpush.msrb.mxu1 %v3586_v30 }
 0x270   :  { %972 = vmatpush.msrb.mxu3 %v3589_v56 }
 0x271   :  { %1041 = vmatpush.msrb.mxu0 %v3510_v3  ;;  %1061 = vmatpush.msrb.mxu1 %v3593_v35 }
 0x272   :  { %973 = vmatpush.msrb.mxu3 %v3596_v58 }
 0x273   :  { %1042 = vmatpush.msrb.mxu0 %v3515_v59  ;;  %1062 = vmatpush.msrb.mxu1 %v3600_v60 }
 0x274   :  { %974 = vmatpush.msrb.mxu3 %v3603_v63 }
 0x275   :  { %1043 = vmatpush.msrb.mxu0 %v3520_v61  ;;  %1063 = vmatpush.msrb.mxu1 %v3607_v6 }
 0x276   :  { %975 = vmatpush.msrb.mxu3 %v3610_v8 }
 0x277   :  { %1044 = vmatpush.msrb.mxu0 %v3525_v62  ;;  %1064 = vmatpush.msrb.mxu1 %v3614_v9 }
 0x278   :  { %976 = vmatpush.msrb.mxu3 %v3617_v11 }
 0x279   :  { %1045 = vmatpush.msrb.mxu0 %v3530_v0  ;;  %1065 = vmatpush.msrb.mxu1 %v3621_v12 }
 0x27a   :  { %977 = vmatpush.msrb.mxu3 %v3624_v14 }
 0x27b   :  { %1046 = vmatpush.msrb.mxu0 %v3535_v1  ;;  %1066 = vmatpush.msrb.mxu1 %v3628_v16 }
 0x27c   :  { %978 = vmatpush.msrb.mxu3 %v3631_v17 }
 0x27d   :  { %1047 = vmatpush.msrb.mxu0 %v3540_v4  ;;  %1067 = vmatpush.msrb.mxu1 %v3635_v18 }
 0x27e   :  { %979 = vmatpush.msrb.mxu3 %v3638_v19 }
 0x27f   :  { %1048 = vmatpush.msrb.mxu0 %v3641_v21  ;;  %1068 = vmatpush.msrb.mxu1 %v3644_v22 }
 0x280   :  { %980 = vmatpush.msrb.mxu3 %v3647_v24 }
 0x281   :  { %1049 = vmatpush.msrb.mxu0 %v3650_v26  ;;  %1069 = vmatpush.msrb.mxu1 %v3653_v27 }
 0x282   :  { %981 = vmatpush.msrb.mxu3 %v3656_v28 }
 0x283   :  { %1050 = vmatpush.msrb.mxu0 %v3659_v31  ;;  %1070 = vmatpush.msrb.mxu1 %v3662_v5 }
 0x284   :  { %982 = vmatpush.msrb.mxu3 %v3665_v23 }
 0x285   :  { %1051 = vmatpush.msrb.mxu0 %v3668_v25  ;;  %1071 = vmatpush.msrb.mxu1 %v4709_v33  ;;  %v3687_v33 = vld [vmem:[#allocation6 + $0x18] sm:$0xff] }
 0x286   :  { %983 = vmatpush.msrb.mxu3 %v3672_v29  ;;  %4724 = vst [vmem:[#allocation24_spill] sm:$0xff] %v3687_v33 }
 0x287   :  { %1052 = vmatpush.msrb.mxu0 %v3675_v37  ;;  %1072 = vmatpush.msrb.mxu1 %v4712_v46  ;;  %v4725_v46 = vld [vmem:[#allocation32_spill] sm:$0xff] }
 0x288   :  { %984 = vmatpush.msrb.mxu3 %v3679_v42 }
 0x289   :  { %1053 = vmatpush.msrb.mxu0 %v3682_v49  ;;  %1073 = vmatpush.msrb.mxu1 %v4715_v47 }
 0x28a   :  { %985 = vmatpush.msrb.mxu3 %v4716_v36 }
 0x28b   :  { %1054 = vmatpush.msrb.mxu0 %v3687_v33  ;;  %1074 = vmatpush.msrb.mxu1 %v4718_v39 }
 0x2e8   :  { %v749_v53 = vpop.f32.mrf.mxu0 }
 0x2e9   :  { %v792_v32 = vadd.f32 %v749_v53, %v4725_v46 }
 0x2eb   :  { %v2565_v13 = vmul.f32 -1.442695, %v792_v32 }
 0x2ed   :  { %2635 = vpow2.f32 %v2565_v13 }
 0x2ee   :  { %v729_v45 = vpop.f32.mrf.mxu3 }
 0x2ef   :  { %v772_v43 = vadd.f32 %v729_v45, %v4726_v55  ;;  %v769_v45 = vpop.f32.mrf.mxu1 }
 0x2f1   :  { %v2564_v57 = vmul.f32 -1.442695, %v772_v43 }
 0x2f3   :  { %v2636_v40 = vpop.eup %2635  ;;  %2637 = vpow2.f32 %v2564_v57  ;;  %v812_v57 = vadd.f32 %v3431_v50, %v769_v45 }
 0x2f4   :  { %v796_v47 = vadd.f32 1.0, %v2636_v40 }
 0x2f6   :  { %2639 = vrcp.f32 %v796_v47  ;;  %v808_v33 = vand.u32 2147483648, %v796_v47  ;;  %vm802_vm15 = vweird.f32 %v796_v47 }
 0x2f8   :  { %v809_v42 = vor.u32 1.1754944e-38, %v808_v33 }
 0x2f9   :  { %v2638_v36 = vpop.eup %2637 }
 0x2fa   :  { %v776_v20 = vadd.f32 1.0, %v2638_v36 }
 0x2fc   :  { %2641 = vrcp.f32 %v776_v20  ;;  %v2640_v2 = vpop.eup %2639  ;;  %v788_v53 = vand.u32 2147483648, %v776_v20  ;;  %v786_v32 = vand.u32 2147483647, %v776_v20  ;;  %vm782_vm11 = vweird.f32 %v776_v20 }
 0x2fd   :  { %v798_v52 = vmul.f32 %v2640_v2, %v796_v47  ;;  %vm803_vm14 = vweird.f32 %v2640_v2 }
 0x2fe   :  { %v789_v43 = vor.u32 1.1754944e-38, %v788_v53  ;;  %vm787_vm13 = vcmp.eq.f32.partialorder %v786_v32, 8.507059e+37  ;;  %vm804_vm1 = vmor %vm802_vm15, %vm803_vm14 }
 0x2ff   :  { %v799_v15 = vsub.f32 1.0, %v798_v52 }
 0x301   :  { %v800_v13 = vmul.f32 %v2640_v2, %v799_v15 }
 0x302   :  { %v2642_v38 = vpop.eup %2641 }
 0x303   :  { %v778_v39 = vmul.f32 %v2642_v38, %v776_v20  ;;  %vm783_vm10 = vweird.f32 %v2642_v38  ;;  %v801_v36 = vadd.f32 %v2640_v2, %v800_v13 }
 0x304   :  { %vm784_vm12 = vmor %vm782_vm11, %vm783_vm10 }
 0x305   :  { %v779_v41 = vsub.f32 1.0, %v778_v39  ;;  %v806_v39 = vand.u32 2147483647, %v796_v47  ;;  %v805_v15 = vsel %vm804_vm1, %v2640_v2, %v801_v36 }
 0x307   :  { %v780_v46 = vmul.f32 %v2642_v38, %v779_v41  ;;  %v4727_v41 = vld [vmem:[#allocation34_spill] sm:$0xff]  ;;  %vm807_vm2 = vcmp.eq.f32.partialorder %v806_v39, 8.507059e+37 }
 0x308   :  { %v810_v20 = vsel %vm807_vm2, %v809_v42, %v805_v15 }
 0x309   :  { %v781_v55 = vadd.f32 %v2642_v38, %v780_v46  ;;  %v816_v53 = vsub.f32 1.0, %v810_v20 }
 0x30b   :  { %v785_v40 = vsel %vm784_vm12, %v2642_v38, %v781_v55  ;;  %v818_v38 = vmul.f32 %v810_v20, %v3570_v44 }
 0x30c   :  { %v790_v54 = vsel %vm787_vm13, %v789_v43, %v785_v40 }
 0x30d   :  { %v813_v52 = vmul.f32 %v812_v57, %v790_v54  ;;  %v2820_v54 = vld [vmem:[#allocation6 + $0x1a0] sm:$0xff] }
 0x30f   :  { %v814_v49 = vadd.f32 %v813_v52, %v4727_v41  ;;  %v4733_v41 = vld [vmem:[#allocation35_spill] sm:$0xff] }
 0x311   :  { %2643 = vtanh.f32 %v814_v49 }
 0x317   :  { %v2644_v46 = vpop.eup %2643 }
 0x318   :  { %v817_v45 = vmul.f32 %v2644_v46, %v816_v53 }
 0x31a   :  { %v3696_v32 = vadd.f32 %v818_v38, %v817_v45 }
 0x31c   :  { %837 = vmatmul.f32.vlgmr.msrb.gmra.mxu2 %v3696_v32  ;;  %857 = vmatmul.f32.vlgmr.msra.gmra.mxu3 %v3696_v32 }
 0x31d   :  { %877 = vmatmul.f32.vlgmr.msra.gmra.mxu0 %v3696_v32  ;;  %1079 = vmatpush.msrb.mxu2 %v3575_v48 }
 0x31e   :  { %1148 = vmatpush.msra.mxu3 %v3500_v51  ;;  %1168 = vmatpush.msra.mxu0 %v3579_v7  ;;  %v2821_v51 = vld [vmem:[#allocation6 + $0x120] sm:$0xff]  ;;  %v4731_v7 = vld [vmem:[#allocation31_spill] sm:$0xff] }
 0x31f   :  { %1080 = vmatpush.msrb.mxu2 %v3582_v34 }
 0x320   :  { %1149 = vmatpush.msra.mxu3 %v3505_v10  ;;  %1169 = vmatpush.msra.mxu0 %v3586_v30  ;;  %v4728_v10 = vld [vmem:[#allocation20_spill] sm:$0xff] }
 0x321   :  { %1081 = vmatpush.msrb.mxu2 %v3589_v56 }
 0x322   :  { %1150 = vmatpush.msra.mxu3 %v3510_v3  ;;  %1170 = vmatpush.msra.mxu0 %v3593_v35  ;;  %v4729_v3 = vld [vmem:[#allocation16_spill] sm:$0xff]  ;;  %v4732_v35 = vld [vmem:[#allocation33_spill] sm:$0xff] }
 0x323   :  { %1082 = vmatpush.msrb.mxu2 %v3596_v58 }
 0x324   :  { %1151 = vmatpush.msra.mxu3 %v3515_v59  ;;  %1171 = vmatpush.msra.mxu0 %v3600_v60  ;;  %v2822_v59 = vld [vmem:[#allocation6 + $0xa0] sm:$0xff] }
 0x325   :  { %1083 = vmatpush.msrb.mxu2 %v3603_v63 }
 0x326   :  { %1152 = vmatpush.msra.mxu3 %v3520_v61  ;;  %1172 = vmatpush.msra.mxu0 %v3607_v6  ;;  %v3743_v61 = vld [vmem:[#allocation6 + $0x28] sm:$0xff] }
 0x327   :  { %1084 = vmatpush.msrb.mxu2 %v3610_v8 }
 0x328   :  { %1153 = vmatpush.msra.mxu3 %v3525_v62  ;;  %1173 = vmatpush.msra.mxu0 %v3614_v9  ;;  %v4730_v62 = vld [vmem:[#allocation24_spill] sm:$0xff] }
 0x329   :  { %1085 = vmatpush.msrb.mxu2 %v3617_v11 }
 0x32a   :  { %1154 = vmatpush.msra.mxu3 %v3530_v0  ;;  %1174 = vmatpush.msra.mxu0 %v3621_v12  ;;  %v2824_v0 = vld [vmem:[#allocation6 + $0x20] sm:$0xff] }
 0x32b   :  { %1086 = vmatpush.msrb.mxu2 %v3624_v14 }
 0x32c   :  { %1155 = vmatpush.msra.mxu3 %v3535_v1  ;;  %1175 = vmatpush.msra.mxu0 %v3628_v16 }
 0x32d   :  { %1087 = vmatpush.msrb.mxu2 %v3631_v17 }
 0x32e   :  { %1156 = vmatpush.msra.mxu3 %v3540_v4  ;;  %1176 = vmatpush.msra.mxu0 %v3635_v18 }
 0x32f   :  { %1088 = vmatpush.msrb.mxu2 %v3638_v19 }
 0x330   :  { %1157 = vmatpush.msra.mxu3 %v3641_v21  ;;  %1177 = vmatpush.msra.mxu0 %v3644_v22 }
 0x331   :  { %1089 = vmatpush.msrb.mxu2 %v3647_v24 }
 0x332   :  { %1158 = vmatpush.msra.mxu3 %v3650_v26  ;;  %1178 = vmatpush.msra.mxu0 %v3653_v27 }
 0x333   :  { %1090 = vmatpush.msrb.mxu2 %v3656_v28 }
 0x334   :  { %1159 = vmatpush.msra.mxu3 %v3659_v31  ;;  %1179 = vmatpush.msra.mxu0 %v3662_v5 }
 0x335   :  { %1091 = vmatpush.msrb.mxu2 %v3665_v23 }
 0x336   :  { %1160 = vmatpush.msra.mxu3 %v3668_v25  ;;  %1180 = vmatpush.msra.mxu0 %v2820_v54 }
 0x337   :  { %1092 = vmatpush.msrb.mxu2 %v3672_v29 }
 0x338   :  { %1161 = vmatpush.msra.mxu3 %v3675_v37  ;;  %1181 = vmatpush.msra.mxu0 %v2821_v51 }
 0x339   :  { %1093 = vmatpush.msrb.mxu2 %v4728_v10 }
 0x33a   :  { %1162 = vmatpush.msra.mxu3 %v4729_v3  ;;  %1182 = vmatpush.msra.mxu0 %v2822_v59 }
 0x33b   :  { %1094 = vmatpush.msrb.mxu2 %v3743_v61 }
 0x33c   :  { %1163 = vmatpush.msra.mxu3 %v4730_v62  ;;  %1183 = vmatpush.msra.mxu0 %v2824_v0 }
 0x39a   :  { %v878_v33 = vpop.f32.mrf.mxu0 }
 0x39b   :  { %v921_v55 = vadd.f32 %v3431_v50, %v878_v33 }
 0x39f   :  { %v838_v1 = vpop.f32.mrf.mxu2  ;;  %v858_v4 = vpop.f32.mrf.mxu3 }
 0x3a0   :  { %v881_v30 = vadd.f32 %v838_v1, %v4731_v7  ;;  %v901_v60 = vadd.f32 %v858_v4, %v4732_v35 }
 0x3a2   :  { %v2566_v6 = vmul.f32 -1.442695, %v881_v30  ;;  %v2567_v9 = vmul.f32 -1.442695, %v901_v60 }
 0x3a4   :  { %2645 = vpow2.f32 %v2566_v6 }
 0x3a5   :  { %2647 = vpow2.f32 %v2567_v9 }
 0x3aa   :  { %v2646_v12 = vpop.eup %2645 }
 0x3ab   :  { %v2648_v16 = vpop.eup %2647  ;;  %v885_v18 = vadd.f32 1.0, %v2646_v12 }
 0x3ac   :  { %v905_v21 = vadd.f32 1.0, %v2648_v16 }
 0x3ad   :  { %2649 = vrcp.f32 %v885_v18  ;;  %v897_v25 = vand.u32 2147483648, %v885_v18  ;;  %v895_v49 = vand.u32 2147483647, %v885_v18  ;;  %vm891_vm4 = vweird.f32 %v885_v18 }
 0x3ae   :  { %2651 = vrcp.f32 %v905_v21  ;;  %v917_v52 = vand.u32 2147483648, %v905_v21  ;;  %vm911_vm8 = vweird.f32 %v905_v21  ;;  %v915_v39 = vand.u32 2147483647, %v905_v21 }
 0x3af   :  { %v898_v13 = vor.u32 1.1754944e-38, %v897_v25  ;;  %vm896_vm6 = vcmp.eq.f32.partialorder %v895_v49, 8.507059e+37 }
 0x3b0   :  { %v918_v53 = vor.u32 1.1754944e-38, %v917_v52  ;;  %vm916_vm10 = vcmp.eq.f32.partialorder %v915_v39, 8.507059e+37 }
 0x3b3   :  { %v2650_v22 = vpop.eup %2649 }
 0x3b4   :  { %v2652_v26 = vpop.eup %2651  ;;  %v887_v27 = vmul.f32 %v2650_v22, %v885_v18  ;;  %vm892_vm3 = vweird.f32 %v2650_v22 }
 0x3b5   :  { %v907_v31 = vmul.f32 %v2652_v26, %v905_v21  ;;  %vm893_vm5 = vmor %vm891_vm4, %vm892_vm3  ;;  %vm912_vm7 = vweird.f32 %v2652_v26 }
 0x3b6   :  { %v888_v5 = vsub.f32 1.0, %v887_v27  ;;  %vm913_vm9 = vmor %vm911_vm8, %vm912_vm7 }
 0x3b7   :  { %v908_v37 = vsub.f32 1.0, %v907_v31 }
 0x3b8   :  { %v889_v42 = vmul.f32 %v2650_v22, %v888_v5 }
 0x3b9   :  { %v909_v47 = vmul.f32 %v2652_v26, %v908_v37 }
 0x3ba   :  { %v890_v2 = vadd.f32 %v2650_v22, %v889_v42 }
 0x3bb   :  { %v910_v40 = vadd.f32 %v2652_v26, %v909_v47 }
 0x3bc   :  { %v894_v43 = vsel %vm893_vm5, %v2650_v22, %v890_v2 }
 0x3bd   :  { %v899_v57 = vsel %vm896_vm6, %v898_v13, %v894_v43  ;;  %v914_v20 = vsel %vm913_vm9, %v2652_v26, %v910_v40  ;;  %v4736_v26 = vld [vmem:[#allocation40_spill] sm:$0xff]  ;;  %v4737_v13 = vld [vmem:[#allocation41_spill] sm:$0xff]  ;;  %v4738_v43 = vld [vmem:[#allocation42_spill] sm:$0xff] }
 0x3be   :  { %v922_v36 = vmul.f32 %v921_v55, %v899_v57  ;;  %v919_v46 = vsel %vm916_vm10, %v918_v53, %v914_v20  ;;  %v3785_v20 = vld [vmem:[#allocation6 + $0x7c8] sm:$0xff] }
 0x3bf   :  { %v925_v45 = vsub.f32 1.0, %v919_v46  ;;  %v927_v51 = vmul.f32 %v919_v46, %v3696_v32 }
 0x3c0   :  { %v923_v15 = vadd.f32 %v922_v36, %v4733_v41 }
 0x3c2   :  { %2653 = vtanh.f32 %v923_v15 }
 0x3c8   :  { %v2654_v38 = vpop.eup %2653 }
 0x3c9   :  { %v926_v54 = vmul.f32 %v2654_v38, %v925_v45 }
 0x3cb   :  { %v3752_v3 = vadd.f32 %v927_v51, %v926_v54 }
 0x3cd   :  { %946 = vmatmul.f32.vlgmr.msra.gmra.mxu1 %v3752_v3  ;;  %966 = vmatmul.f32.vlgmr.msra.gmra.mxu2 %v3752_v3 }
 0x3ce   :  { %986 = vmatmul.f32.vlgmr.msrb.gmra.mxu3 %v3752_v3  ;;  %1188 = vmatpush.msra.mxu1 %v3575_v48 }
 0x3d0   :  { %1189 = vmatpush.msra.mxu1 %v3582_v34  ;;  %v4734_v34 = vld [vmem:[#allocation36_spill] sm:$0xff] }
 0x3d2   :  { %1190 = vmatpush.msra.mxu1 %v3589_v56 }
 0x3d4   :  { %1191 = vmatpush.msra.mxu1 %v3596_v58 }
 0x3d6   :  { %1192 = vmatpush.msra.mxu1 %v3603_v63 }
 0x3d8   :  { %1193 = vmatpush.msra.mxu1 %v3610_v8  ;;  %v4735_v8 = vld [vmem:[#allocation38_spill] sm:$0xff] }
 0x3da   :  { %1194 = vmatpush.msra.mxu1 %v3617_v11 }
 0x3dc   :  { %1195 = vmatpush.msra.mxu1 %v3624_v14 }
 0x3de   :  { %1196 = vmatpush.msra.mxu1 %v3631_v17 }
 0x3e0   :  { %1197 = vmatpush.msra.mxu1 %v3638_v19 }
 0x3e2   :  { %1198 = vmatpush.msra.mxu1 %v3647_v24 }
 0x3e4   :  { %1199 = vmatpush.msra.mxu1 %v3656_v28 }
 0x3e6   :  { %1200 = vmatpush.msra.mxu1 %v3665_v23 }
 0x3e8   :  { %1201 = vmatpush.msra.mxu1 %v3672_v29 }
 0x3ea   :  { %1202 = vmatpush.msra.mxu1 %v4728_v10 }
 0x3ec   :  { %1203 = vmatpush.msra.mxu1 %v3743_v61 }
 0x44a   :  { %v947_v48 = vpop.f32.mrf.mxu1 }
 0x44b   :  { %v990_v56 = vadd.f32 %v947_v48, %v4734_v34 }
 0x44d   :  { %v2568_v58 = vmul.f32 -1.442695, %v990_v56 }
 0x44f   :  { %2655 = vpow2.f32 %v2568_v58 }
 0x450   :  { %v967_v63 = vpop.f32.mrf.mxu2 }
 0x451   :  { %v1010_v11 = vadd.f32 %v967_v63, %v4735_v8  ;;  %v987_v1 = vpop.f32.mrf.mxu3 }
 0x452   :  { %v1030_v6 = vadd.f32 %v3431_v50, %v987_v1 }
 0x453   :  { %v2569_v14 = vmul.f32 -1.442695, %v1010_v11 }
 0x455   :  { %v2656_v17 = vpop.eup %2655  ;;  %2657 = vpow2.f32 %v2569_v14 }
 0x456   :  { %v994_v19 = vadd.f32 1.0, %v2656_v17  ;;  %v3788_v17 = vld [vmem:[#allocation8 + $0x9] ss:$0 sm:$0xff] }
 0x458   :  { %2659 = vrcp.f32 %v994_v19  ;;  %v1006_v59 = vand.u32 2147483648, %v994_v19  ;;  %v1004_v62 = vand.u32 2147483647, %v994_v19  ;;  %vm1000_vm12 = vweird.f32 %v994_v19 }
 0x45a   :  { %v1007_v30 = vor.u32 1.1754944e-38, %v1006_v59  ;;  %vm1005_vm14 = vcmp.eq.f32.partialorder %v1004_v62, 8.507059e+37  ;;  %v4739_v59 = vld [vmem:[#allocation43_spill] sm:$0xff] }
 0x45b   :  { %v2658_v24 = vpop.eup %2657 }
 0x45c   :  { %v1014_v28 = vadd.f32 1.0, %v2658_v24 }
 0x45e   :  { %v2660_v23 = vpop.eup %2659  ;;  %2661 = vrcp.f32 %v1014_v28  ;;  %v1026_v16 = vand.u32 2147483648, %v1014_v28  ;;  %v1024_v21 = vand.u32 2147483647, %v1014_v28  ;;  %vm1020_vm1 = vweird.f32 %v1014_v28 }
 0x45f   :  { %v996_v29 = vmul.f32 %v2660_v23, %v994_v19  ;;  %vm1001_vm11 = vweird.f32 %v2660_v23 }
 0x460   :  { %vm1002_vm13 = vmor %vm1000_vm12, %vm1001_vm11  ;;  %v1027_v31 = vor.u32 1.1754944e-38, %v1026_v16  ;;  %vm1025_vm3 = vcmp.eq.f32.partialorder %v1024_v21, 8.507059e+37  ;;  %v3807_v16 = vld [vmem:[#allocation6 + $0x5c8] sm:$0xff] }
 0x461   :  { %v997_v10 = vsub.f32 1.0, %v996_v29  ;;  %v3813_v21 = vld [vmem:[#allocation6 + $0x4c8] sm:$0xff] }
 0x463   :  { %v998_v61 = vmul.f32 %v2660_v23, %v997_v10 }
 0x464   :  { %v2662_v0 = vpop.eup %2661 }
 0x465   :  { %v1016_v4 = vmul.f32 %v2662_v0, %v1014_v28  ;;  %v999_v7 = vadd.f32 %v2660_v23, %v998_v61  ;;  %vm1021_vm15 = vweird.f32 %v2662_v0 }
 0x466   :  { %vm1022_vm2 = vmor %vm1020_vm1, %vm1021_vm15 }
 0x467   :  { %v1017_v35 = vsub.f32 1.0, %v1016_v4  ;;  %v1003_v60 = vsel %vm1002_vm13, %v2660_v23, %v999_v7 }
 0x468   :  { %v1008_v9 = vsel %vm1005_vm14, %v1007_v30, %v1003_v60 }
 0x469   :  { %v1018_v12 = vmul.f32 %v2662_v0, %v1017_v35  ;;  %v1031_v18 = vmul.f32 %v1030_v6, %v1008_v9  ;;  %v3798_v6 = vld [vmem:[#allocation6 + $0x748] sm:$0xff] }
 0x46a   :  { %v3801_v9 = vld [vmem:[#allocation6 + $0x6c8] sm:$0xff] }
 0x46b   :  { %v1019_v22 = vadd.f32 %v2662_v0, %v1018_v12  ;;  %v1032_v27 = vadd.f32 %v1031_v18, %v4736_v26  ;;  %v3804_v12 = vld [vmem:[#allocation6 + $0x648] sm:$0xff] }
 0x46c   :  { %v3810_v18 = vld [vmem:[#allocation6 + $0x548] sm:$0xff] }
 0x46d   :  { %v1023_v5 = vsel %vm1022_vm2, %v2662_v0, %v1019_v22  ;;  %2663 = vtanh.f32 %v1032_v27  ;;  %v3816_v22 = vld [vmem:[#allocation6 + $0x448] sm:$0xff] }
 0x46e   :  { %v1028_v25 = vsel %vm1025_vm3, %v1027_v31, %v1023_v5  ;;  %v3819_v26 = vld [vmem:[#allocation6 + $0x3c8] sm:$0xff] }
 0x46f   :  { %v1034_v37 = vsub.f32 1.0, %v1028_v25  ;;  %v1036_v50 = vmul.f32 %v1028_v25, %v3752_v3  ;;  %v3822_v27 = vld [vmem:[#allocation6 + $0x348] sm:$0xff]  ;;  %v1318_v25 = vld [vmem:[#allocation6 + $0x7b0] sm:$0xff] }
 0x470   :  { %v3825_v31 = vld [vmem:[#allocation6 + $0x2c8] sm:$0xff]  ;;  %1329 = vmatpush.msra.mxu2 %v1318_v25  ;;  %v3859_v25 = vld [vmem:[#allocation6 + $0x550] sm:$0xff] }
 0x471   :  { %v3828_v5 = vld [vmem:[#allocation6 + $0x248] sm:$0xff] }
 0x473   :  { %v2664_v42 = vpop.eup %2663 }
 0x474   :  { %v1035_v49 = vmul.f32 %v2664_v42, %v1034_v37  ;;  %v1319_v37 = vld [vmem:[#allocation6 + $0x7b8] sm:$0xff]  ;;  %v1320_v42 = vld [vmem:[#allocation6 + $0x7c0] sm:$0xff] }
 0x475   :  { %1370 = vmatpush.msrb.mxu3 %v1319_v37  ;;  %v1288_v37 = vld [vmem:[#allocation6 + $0x2b0] sm:$0xff] }
 0x476   :  { %v3778_v33 = vadd.f32 %v1036_v50, %v1035_v49  ;;  %v3831_v49 = vld [vmem:[#allocation6 + $0x1c8] sm:$0xff]  ;;  %v1315_v50 = vld [vmem:[#allocation6 + $0x730] sm:$0xff] }
 0x477   :  { %1330 = vmatpush.msra.mxu2 %v1315_v50 }
 0x478   :  { %1055 = vmatmul.f32.vlgmr.msrb.gmra.mxu0 %v3778_v33  ;;  %1075 = vmatmul.f32.vlgmr.msrb.gmra.mxu1 %v3778_v33 }
 0x479   :  { %1095 = vmatmul.f32.vlgmr.msrb.gmra.mxu2 %v3778_v33  ;;  %1452 = vmatpush.msrb.mxu1 %v3785_v20 }
 0x47a   :  { %1411 = vmatpush.msrb.mxu0 %v1320_v42  ;;  %v1289_v42 = vld [vmem:[#allocation6 + $0x2b8] sm:$0xff] }
 0x47b   :  { %1453 = vmatpush.msrb.mxu1 %v3798_v6 }
 0x47d   :  { %1454 = vmatpush.msrb.mxu1 %v3801_v9 }
 0x47f   :  { %1455 = vmatpush.msrb.mxu1 %v3804_v12 }
 0x481   :  { %1456 = vmatpush.msrb.mxu1 %v3807_v16 }
 0x483   :  { %1457 = vmatpush.msrb.mxu1 %v3810_v18 }
 0x485   :  { %1458 = vmatpush.msrb.mxu1 %v3813_v21 }
 0x487   :  { %1459 = vmatpush.msrb.mxu1 %v3816_v22 }
 0x489   :  { %1460 = vmatpush.msrb.mxu1 %v3819_v26 }
 0x48b   :  { %1461 = vmatpush.msrb.mxu1 %v3822_v27 }
 0x48d   :  { %1462 = vmatpush.msrb.mxu1 %v3825_v31 }
 0x48f   :  { %1463 = vmatpush.msrb.mxu1 %v3828_v5 }
 0x491   :  { %1464 = vmatpush.msrb.mxu1 %v3831_v49 }
 0x4f5   :  { %v1056_v47 = vpop.f32.mrf.mxu0  ;;  %v1076_v2 = vpop.f32.mrf.mxu1 }
 0x4f6   :  { %v1099_v55 = vadd.f32 %v1056_v47, %v4737_v13  ;;  %v1119_v57 = vadd.f32 %v1076_v2, %v4738_v43  ;;  %v1316_v47 = vld [vmem:[#allocation6 + $0x738] sm:$0xff]  ;;  %v1317_v2 = vld [vmem:[#allocation6 + $0x740] sm:$0xff]  ;;  %v3834_v13 = vld [vmem:[#allocation6 + $0x148] sm:$0xff] }
 0x4f7   :  { %1371 = vmatpush.msrb.mxu3 %v1316_v47  ;;  %1412 = vmatpush.msrb.mxu0 %v1317_v2  ;;  %v1313_v43 = vld [vmem:[#allocation6 + $0x6b8] sm:$0xff]  ;;  %v1290_v47 = vld [vmem:[#allocation6 + $0x2c0] sm:$0xff]  ;;  %v3862_v2 = vld [vmem:[#allocation6 + $0x4d0] sm:$0xff] }
 0x4f8   :  { %v2570_v40 = vmul.f32 -1.442695, %v1099_v55  ;;  %v2571_v36 = vmul.f32 -1.442695, %v1119_v57  ;;  %1465 = vmatpush.msrb.mxu1 %v3834_v13  ;;  %v1312_v55 = vld [vmem:[#allocation6 + $0x6b0] sm:$0xff]  ;;  %v1314_v57 = vld [vmem:[#allocation6 + $0x6c0] sm:$0xff] }
 0x4f9   :  { %1331 = vmatpush.msra.mxu2 %v1312_v55  ;;  %1372 = vmatpush.msrb.mxu3 %v1313_v43  ;;  %v1285_v55 = vld [vmem:[#allocation6 + $0x230] sm:$0xff]  ;;  %v1286_v43 = vld [vmem:[#allocation6 + $0x238] sm:$0xff] }
 0x4fa   :  { %2665 = vpow2.f32 %v2570_v40  ;;  %v3837_v40 = vld [vmem:[#allocation6 + $0xc8] sm:$0xff]  ;;  %1413 = vmatpush.msrb.mxu0 %v1314_v57 }
 0x4fb   :  { %2667 = vpow2.f32 %v2571_v36  ;;  %1466 = vmatpush.msrb.mxu1 %v3837_v40  ;;  %v1309_v36 = vld [vmem:[#allocation6 + $0x630] sm:$0xff] }
 0x4fc   :  { %v1096_v63 = vpop.f32.mrf.mxu2  ;;  %1332 = vmatpush.msra.mxu2 %v1309_v36  ;;  %v1287_v36 = vld [vmem:[#allocation6 + $0x240] sm:$0xff] }
 0x4fd   :  { %v1139_v19 = vadd.f32 %v3788_v17, %v1096_v63  ;;  %v1300_v63 = vld [vmem:[#allocation6 + $0x4b0] sm:$0xff] }
 0x500   :  { %v2666_v52 = vpop.eup %2665 }
 0x501   :  { %v2668_v39 = vpop.eup %2667  ;;  %v1103_v41 = vadd.f32 1.0, %v2666_v52  ;;  %v1310_v52 = vld [vmem:[#allocation6 + $0x638] sm:$0xff] }
 0x502   :  { %v1123_v15 = vadd.f32 1.0, %v2668_v39  ;;  %v1311_v39 = vld [vmem:[#allocation6 + $0x640] sm:$0xff]  ;;  %1373 = vmatpush.msrb.mxu3 %v1310_v52  ;;  %v3865_v52 = vld [vmem:[#allocation6 + $0x450] sm:$0xff] }
 0x503   :  { %2669 = vrcp.f32 %v1103_v41  ;;  %v1115_v48 = vand.u32 2147483648, %v1103_v41  ;;  %v1113_v56 = vand.u32 2147483647, %v1103_v41  ;;  %vm1109_vm5 = vweird.f32 %v1103_v41  ;;  %1414 = vmatpush.msrb.mxu0 %v1311_v39 }
 0x504   :  { %2671 = vrcp.f32 %v1123_v15  ;;  %v1135_v23 = vand.u32 2147483648, %v1123_v15  ;;  %vm1129_vm9 = vweird.f32 %v1123_v15  ;;  %v1133_v10 = vand.u32 2147483647, %v1123_v15 }
 0x505   :  { %v1116_v11 = vor.u32 1.1754944e-38, %v1115_v48  ;;  %vm1114_vm7 = vcmp.eq.f32.partialorder %v1113_v56, 8.507059e+37  ;;  %v1305_v48 = vld [vmem:[#allocation6 + $0x540] sm:$0xff] }
 0x506   :  { %v1136_v0 = vor.u32 1.1754944e-38, %v1135_v23  ;;  %vm1134_vm11 = vcmp.eq.f32.partialorder %v1133_v10, 8.507059e+37  ;;  %v1299_v23 = vld [vmem:[#allocation6 + $0x440] sm:$0xff]  ;;  %v1294_v10 = vld [vmem:[#allocation6 + $0x3b0] sm:$0xff] }
 0x509   :  { %v2670_v53 = vpop.eup %2669 }
 0x50a   :  { %v2672_v46 = vpop.eup %2671  ;;  %v1105_v45 = vmul.f32 %v2670_v53, %v1103_v41  ;;  %vm1110_vm4 = vweird.f32 %v2670_v53  ;;  %v3840_v41 = vld [vmem:[#allocation6 + $0x48] sm:$0xff] }
 0x50b   :  { %v1125_v38 = vmul.f32 %v2672_v46, %v1123_v15  ;;  %vm1111_vm6 = vmor %vm1109_vm5, %vm1110_vm4  ;;  %vm1130_vm8 = vweird.f32 %v2672_v46  ;;  %1467 = vmatpush.msrb.mxu1 %v3840_v41  ;;  %v1306_v15 = vld [vmem:[#allocation6 + $0x5b0] sm:$0xff] }
 0x50c   :  { %v1106_v54 = vsub.f32 1.0, %v1105_v45  ;;  %vm1131_vm10 = vmor %vm1129_vm9, %vm1130_vm8  ;;  %1333 = vmatpush.msra.mxu2 %v1306_v15  ;;  %v3843_v45 = vld [vmem:[#allocation6 + $0x7d0] sm:$0xff] }
 0x50d   :  { %v1126_v51 = vsub.f32 1.0, %v1125_v38  ;;  %v1282_v15 = vld [vmem:[#allocation6 + $0x1b0] sm:$0xff] }
 0x50e   :  { %v1107_v34 = vmul.f32 %v2670_v53, %v1106_v54  ;;  %v1303_v54 = vld [vmem:[#allocation6 + $0x530] sm:$0xff] }
 0x50f   :  { %v1127_v58 = vmul.f32 %v2672_v46, %v1126_v51  ;;  %v1304_v51 = vld [vmem:[#allocation6 + $0x538] sm:$0xff]  ;;  %1334 = vmatpush.msra.mxu2 %v1303_v54  ;;  %v1279_v54 = vld [vmem:[#allocation6 + $0x130] sm:$0xff] }
 0x510   :  { %v1108_v8 = vadd.f32 %v2670_v53, %v1107_v34  ;;  %v4740_v34 = vld [vmem:[#allocation45_spill] sm:$0xff] }
 0x511   :  { %v1128_v24 = vadd.f32 %v2672_v46, %v1127_v58  ;;  %v3847_v58 = vld [vmem:[#allocation6 + $0x750] sm:$0xff]  ;;  %1335 = vmatpush.msra.mxu2 %v1300_v63  ;;  %v1277_v63 = vld [vmem:[#allocation6 + $0xb8] sm:$0xff] }
 0x512   :  { %v1112_v14 = vsel %vm1111_vm6, %v2670_v53, %v1108_v8  ;;  %v1307_v53 = vld [vmem:[#allocation6 + $0x5b8] sm:$0xff] }
 0x513   :  { %v1117_v28 = vsel %vm1114_vm7, %v1116_v11, %v1112_v14  ;;  %v1132_v62 = vsel %vm1131_vm10, %v2672_v46, %v1128_v24  ;;  %v1308_v46 = vld [vmem:[#allocation6 + $0x5c0] sm:$0xff]  ;;  %1374 = vmatpush.msrb.mxu3 %v1307_v53  ;;  %v1301_v8 = vld [vmem:[#allocation6 + $0x4b8] sm:$0xff]  ;;  %v1297_v24 = vld [vmem:[#allocation6 + $0x430] sm:$0xff] }
 0x514   :  { %v1140_v29 = vmul.f32 %v1139_v19, %v1117_v28  ;;  %v1137_v1 = vsel %vm1134_vm11, %v1136_v0, %v1132_v62  ;;  %1415 = vmatpush.msrb.mxu0 %v1308_v46  ;;  %v1302_v11 = vld [vmem:[#allocation6 + $0x4c0] sm:$0xff]  ;;  %v3850_v19 = vld [vmem:[#allocation6 + $0x6d0] sm:$0xff]  ;;  %v1298_v28 = vld [vmem:[#allocation6 + $0x438] sm:$0xff]  ;;  %1336 = vmatpush.msra.mxu2 %v1297_v24 }
 0x515   :  { %v1143_v4 = vsub.f32 1.0, %v1137_v1  ;;  %v1145_v35 = vmul.f32 %v1137_v1, %v3778_v33  ;;  %1375 = vmatpush.msrb.mxu3 %v1304_v51  ;;  %v1296_v62 = vld [vmem:[#allocation6 + $0x3c0] sm:$0xff]  ;;  %v3856_v0 = vld [vmem:[#allocation6 + $0x5d0] sm:$0xff]  ;;  %v1283_v53 = vld [vmem:[#allocation6 + $0x1b8] sm:$0xff] }
 0x516   :  { %v1141_v61 = vadd.f32 %v1140_v29, %v4739_v59  ;;  %1416 = vmatpush.msrb.mxu0 %v1305_v48  ;;  %v3853_v29 = vld [vmem:[#allocation6 + $0x650] sm:$0xff]  ;;  %v1295_v59 = vld [vmem:[#allocation6 + $0x3b8] sm:$0xff]  ;;  %1337 = vmatpush.msra.mxu2 %v1294_v10  ;;  %v1284_v46 = vld [vmem:[#allocation6 + $0x1c0] sm:$0xff] }
 0x517   :  { %1376 = vmatpush.msrb.mxu3 %v1301_v8  ;;  %v1291_v1 = vld [vmem:[#allocation6 + $0x330] sm:$0xff]  ;;  %v1280_v51 = vld [vmem:[#allocation6 + $0x138] sm:$0xff]  ;;  %v1281_v48 = vld [vmem:[#allocation6 + $0x140] sm:$0xff] }
 0x518   :  { %2673 = vtanh.f32 %v1141_v61  ;;  %1417 = vmatpush.msrb.mxu0 %v1302_v11  ;;  %1338 = vmatpush.msra.mxu2 %v1291_v1  ;;  %v1278_v11 = vld [vmem:[#allocation6 + $0xc0] sm:$0xff]  ;;  %v3891_v1 = vld [vmem:[#allocation6 + $0x1d0] sm:$0xff] }
 0x519   :  { %1377 = vmatpush.msrb.mxu3 %v1298_v28  ;;  %v1273_v28 = vld [vmem:[#allocation6 + $0x30] sm:$0xff]  ;;  %v1275_v10 = vld [vmem:[#allocation6 + $0x40] sm:$0xff] }
 0x51a   :  { %1418 = vmatpush.msrb.mxu0 %v1299_v23  ;;  %1339 = vmatpush.msra.mxu2 %v1288_v37  ;;  %v1274_v23 = vld [vmem:[#allocation6 + $0x38] sm:$0xff]  ;;  %v3904_v37 = vld [vmem:[#allocation6 + $0xd0] sm:$0xff] }
 0x51b   :  { %1378 = vmatpush.msrb.mxu3 %v1295_v59  ;;  %v3882_v59 = vld [vmem:[#allocation6 + $0x250] sm:$0xff] }
 0x51c   :  { %1419 = vmatpush.msrb.mxu0 %v1296_v62  ;;  %1340 = vmatpush.msra.mxu2 %v1285_v55  ;;  %v3889_v62 = vld [vmem:[#allocation6 + $0x7d8] sm:$0xff] }
 0x51e   :  { %v2674_v7 = vpop.eup %2673  ;;  %1341 = vmatpush.msra.mxu2 %v1282_v15  ;;  %v3920_v15 = vld [vmem:[#allocation6 + $0x658] sm:$0xff] }
 0x51f   :  { %v1144_v30 = vmul.f32 %v2674_v7, %v1143_v4  ;;  %v4741_v4 = vld [vmem:[#allocation44_spill] sm:$0xff] }
 0x520   :  { %1342 = vmatpush.msra.mxu2 %v1279_v54 }
 0x521   :  { %v3793_v60 = vadd.f32 %v1145_v35, %v1144_v30  ;;  %v1292_v30 = vld [vmem:[#allocation6 + $0x338] sm:$0xff]  ;;  %v1293_v35 = vld [vmem:[#allocation6 + $0x340] sm:$0xff] }
 0x522   :  { %1379 = vmatpush.msrb.mxu3 %v1292_v30  ;;  %1420 = vmatpush.msrb.mxu0 %v1293_v35  ;;  %v3897_v30 = vld [vmem:[#allocation6 + $0x758] sm:$0xff] }
 0x523   :  { %1164 = vmatmul.f32.vlgmr.msra.gmra.mxu3 %v3793_v60  ;;  %1184 = vmatmul.f32.vlgmr.msra.gmra.mxu0 %v3793_v60 }
 0x524   :  { %1204 = vmatmul.f32.vlgmr.msra.gmra.mxu1 %v3793_v60  ;;  %1380 = vmatpush.msrb.mxu3 %v1289_v42 }
 0x525   :  { %1472 = vmatpush.msra.mxu1 %v3843_v45  ;;  %1421 = vmatpush.msrb.mxu0 %v1290_v47  ;;  %v3910_v47 = vld [vmem:[#allocation6 + $0x50] sm:$0xff] }
 0x526   :  { %1381 = vmatpush.msrb.mxu3 %v1286_v43 }
 0x527   :  { %1473 = vmatpush.msra.mxu1 %v3847_v58  ;;  %1422 = vmatpush.msrb.mxu0 %v1287_v36  ;;  %v3918_v36 = vld [vmem:[#allocation6 + $0x6d8] sm:$0xff] }
 0x528   :  { %1382 = vmatpush.msrb.mxu3 %v1283_v53 }
 0x529   :  { %1474 = vmatpush.msra.mxu1 %v3850_v19  ;;  %1423 = vmatpush.msrb.mxu0 %v1284_v46 }
 0x52a   :  { %1383 = vmatpush.msrb.mxu3 %v1280_v51 }
 0x52b   :  { %1475 = vmatpush.msra.mxu1 %v3853_v29  ;;  %1424 = vmatpush.msrb.mxu0 %v1281_v48 }
 0x52c   :  { %1384 = vmatpush.msrb.mxu3 %v1277_v63 }
 0x52d   :  { %1476 = vmatpush.msra.mxu1 %v3856_v0  ;;  %1425 = vmatpush.msrb.mxu0 %v1278_v11 }
 0x52e   :  { %1385 = vmatpush.msrb.mxu3 %v1274_v23 }
 0x52f   :  { %1477 = vmatpush.msra.mxu1 %v3859_v25  ;;  %1426 = vmatpush.msrb.mxu0 %v1275_v10  ;;  %v3944_v10 = vld [vmem:[#allocation6 + $0x5d8] sm:$0xff] }
 0x530   :  { %1560 = vmatpush.msra.mxu3 %v3785_v20 }
 0x531   :  { %1478 = vmatpush.msra.mxu1 %v3862_v2  ;;  %1580 = vmatpush.msra.mxu0 %v3843_v45 }
 0x532   :  { %1561 = vmatpush.msra.mxu3 %v3798_v6 }
 0x533   :  { %1479 = vmatpush.msra.mxu1 %v3865_v52  ;;  %1581 = vmatpush.msra.mxu0 %v3847_v58 }
 0x534   :  { %1562 = vmatpush.msra.mxu3 %v3801_v9 }
 0x535   :  { %1582 = vmatpush.msra.mxu0 %v3850_v19 }
 0x536   :  { %1563 = vmatpush.msra.mxu3 %v3804_v12 }
 0x537   :  { %1583 = vmatpush.msra.mxu0 %v3853_v29 }
 0x538   :  { %1564 = vmatpush.msra.mxu3 %v3807_v16 }
 0x539   :  { %1584 = vmatpush.msra.mxu0 %v3856_v0 }
 0x53a   :  { %1565 = vmatpush.msra.mxu3 %v3810_v18 }
 0x53b   :  { %1585 = vmatpush.msra.mxu0 %v3859_v25 }
 0x53c   :  { %1566 = vmatpush.msra.mxu3 %v3813_v21 }
 0x53d   :  { %1586 = vmatpush.msra.mxu0 %v3862_v2 }
 0x53e   :  { %1567 = vmatpush.msra.mxu3 %v3816_v22 }
 0x53f   :  { %1587 = vmatpush.msra.mxu0 %v3865_v52 }
 0x540   :  { %1568 = vmatpush.msra.mxu3 %v3819_v26 }
 0x542   :  { %1569 = vmatpush.msra.mxu3 %v3822_v27 }
 0x544   :  { %1570 = vmatpush.msra.mxu3 %v3825_v31 }
 0x546   :  { %1571 = vmatpush.msra.mxu3 %v3828_v5 }
 0x548   :  { %1572 = vmatpush.msra.mxu3 %v3831_v49 }
 0x54a   :  { %1573 = vmatpush.msra.mxu3 %v3834_v13 }
 0x54c   :  { %1574 = vmatpush.msra.mxu3 %v3837_v40 }
 0x54e   :  { %1575 = vmatpush.msra.mxu3 %v3840_v41 }
 0x5a0   :  { %v1185_v38 = vpop.f32.mrf.mxu0 }
 0x5a1   :  { %v1228_v56 = vadd.f32 %v1185_v38, %v4740_v34  ;;  %v3870_v38 = vld [vmem:[#allocation6 + $0x3d0] sm:$0xff]  ;;  %v1205_v51 = vpop.f32.mrf.mxu1 }
 0x5a2   :  { %v3874_v34 = vld [vmem:[#allocation6 + $0x350] sm:$0xff]  ;;  %1480 = vmatpush.msra.mxu1 %v3870_v38  ;;  %v1248_v63 = vadd.f32 %v3788_v17, %v1205_v51  ;;  %1588 = vmatpush.msra.mxu0 %v3870_v38 }
 0x5a3   :  { %v2573_v14 = vmul.f32 -1.442695, %v1228_v56  ;;  %v1276_v56 = vld [vmem:[#allocation6 + $0xb0] sm:$0xff] }
 0x5a4   :  { %1481 = vmatpush.msra.mxu1 %v3874_v34  ;;  %1343 = vmatpush.msra.mxu2 %v1276_v56 }
 0x5a5   :  { %2675 = vpow2.f32 %v2573_v14  ;;  %v3877_v14 = vld [vmem:[#allocation6 + $0x2d0] sm:$0xff]  ;;  %1589 = vmatpush.msra.mxu0 %v3874_v34 }
 0x5a6   :  { %v1165_v61 = vpop.f32.mrf.mxu3  ;;  %1482 = vmatpush.msra.mxu1 %v3877_v14  ;;  %1344 = vmatpush.msra.mxu2 %v1273_v28 }
 0x5a7   :  { %v1208_v7 = vadd.f32 %v1165_v61, %v4741_v4  ;;  %v4742_v4 = vmov 0.0   ;;  %1590 = vmatpush.msra.mxu0 %v3877_v14 }
 0x5a8   :  { %1483 = vmatpush.msra.mxu1 %v3882_v59  ;;  %1492 = vmatpush.msrb.mxu2 %v3889_v62 }
 0x5a9   :  { %v2572_v50 = vmul.f32 -1.442695, %v1208_v7  ;;  %1468 = vmatmul.f32.vlgmr.msrb.gmra.mxu1 %v4742_v4  ;;  %v3895_v7 = vld [vmem:[#allocation6 + $0x150] sm:$0xff]  ;;  %1591 = vmatpush.msra.mxu0 %v3882_v59 }
 0x5aa   :  { %1484 = vmatpush.msra.mxu1 %v3891_v1  ;;  %1493 = vmatpush.msrb.mxu2 %v3897_v30 }
 0x5ab   :  { %v2676_v57 = vpop.eup %2675  ;;  %2677 = vpow2.f32 %v2572_v50  ;;  %1592 = vmatpush.msra.mxu0 %v3891_v1 }
 0x5ac   :  { %v3867_v39 = vadd.f32 1.0, %v2676_v57  ;;  %1485 = vmatpush.msra.mxu1 %v3895_v7  ;;  %1494 = vmatpush.msrb.mxu2 %v3918_v36 }
 0x5ad   :  { %1593 = vmatpush.msra.mxu0 %v3895_v7 }
 0x5ae   :  { %2679 = vrcp.f32 %v3867_v39  ;;  %1486 = vmatpush.msra.mxu1 %v3904_v37  ;;  %1495 = vmatpush.msrb.mxu2 %v3920_v15  ;;  %vm1238_vm2 = vweird.f32 %v3867_v39  ;;  %v1242_v17 = vand.u32 2147483647, %v3867_v39 }
 0x5af   :  { %1594 = vmatpush.msra.mxu0 %v3904_v37 }
 0x5b0   :  { %1487 = vmatpush.msra.mxu1 %v3910_v47  ;;  %1496 = vmatpush.msrb.mxu2 %v3944_v10  ;;  %vm1243_vm4 = vcmp.eq.f32.partialorder %v1242_v17, 8.507059e+37  ;;  %v4005_v17 = vld [vmem:[#allocation6 + $0x2d8] sm:$0xff] }
 0x5b1   :  { %v2678_v8 = vpop.eup %2677  ;;  %1488 = vmatmul.f32.vlgmr.msra.gmra.mxu1 %v4742_v4  ;;  %1595 = vmatpush.msra.mxu0 %v3910_v47 }
 0x5b2   :  { %v3879_v24 = vadd.f32 1.0, %v2678_v8  ;;  %1600 = vmatpush.msrb.mxu1 %v3889_v62 }
 0x5b4   :  { %2681 = vrcp.f32 %v3879_v24  ;;  %v3886_v61 = vpop.eup %2679  ;;  %v1224_v57 = vand.u32 2147483648, %v3879_v24  ;;  %v1222_v46 = vand.u32 2147483647, %v3879_v24  ;;  %vm1218_vm13 = vweird.f32 %v3879_v24  ;;  %1601 = vmatpush.msrb.mxu1 %v3897_v30 }
 0x5b5   :  { %v1234_v35 = vmul.f32 %v3886_v61, %v3867_v39  ;;  %vm1239_vm1 = vweird.f32 %v3886_v61 }
 0x5b6   :  { %v1225_v56 = vor.u32 1.1754944e-38, %v1224_v57  ;;  %vm1223_vm15 = vcmp.eq.f32.partialorder %v1222_v46, 8.507059e+37  ;;  %1602 = vmatpush.msrb.mxu1 %v3918_v36  ;;  %vm1240_vm3 = vmor %vm1238_vm2, %vm1239_vm1  ;;  %v3963_v57 = vld [vmem:[#allocation6 + $0x4d8] sm:$0xff] }
 0x5b7   :  { %v1235_v55 = vsub.f32 1.0, %v1234_v35  ;;  %v3946_v35 = vld [vmem:[#allocation6 + $0x558] sm:$0xff] }
 0x5b8   :  { %1603 = vmatpush.msrb.mxu1 %v3920_v15  ;;  %1497 = vmatpush.msrb.mxu2 %v3946_v35 }
 0x5b9   :  { %v1236_v54 = vmul.f32 %v3886_v61, %v1235_v55 }
 0x5ba   :  { %v2682_v42 = vpop.eup %2681  ;;  %1604 = vmatpush.msrb.mxu1 %v3944_v10  ;;  %1498 = vmatpush.msrb.mxu2 %v3963_v57 }
 0x5bb   :  { %v1214_v50 = vmul.f32 %v2682_v42, %v3879_v24  ;;  %vm1219_vm12 = vweird.f32 %v2682_v42  ;;  %v1237_v28 = vadd.f32 %v3886_v61, %v1236_v54  ;;  %v1244_v24 = vand.u32 2147483648, %v3867_v39 }
 0x5bc   :  { %vm1220_vm14 = vmor %vm1218_vm13, %vm1219_vm12  ;;  %1605 = vmatpush.msrb.mxu1 %v3946_v35 }
 0x5bd   :  { %v1215_v43 = vsub.f32 1.0, %v1214_v50  ;;  %v1241_v55 = vsel %vm1240_vm3, %v3886_v61, %v1237_v28  ;;  %v1245_v39 = vor.u32 1.1754944e-38, %v1244_v24  ;;  %v3988_v28 = vld [vmem:[#allocation6 + $0x358] sm:$0xff]  ;;  %v4746_v24 = vld [vmem:[#allocation22_spill] sm:$0xff] }
 0x5be   :  { %1606 = vmatpush.msrb.mxu1 %v3963_v57 }
 0x5bf   :  { %v1216_v53 = vmul.f32 %v2682_v42, %v1215_v43  ;;  %v1246_v43 = vsel %vm1243_vm4, %v1245_v39, %v1241_v55  ;;  %v4024_v55 = vld [vmem:[#allocation6 + $0x1d8] sm:$0xff] }
 0x5c0   :  { %v1252_v61 = vsub.f32 1.0, %v1246_v43  ;;  %v1254_v51 = vmul.f32 %v1246_v43, %v3793_v60  ;;  %v4026_v39 = vld [vmem:[#allocation6 + $0x158] sm:$0xff]  ;;  %v1268_v43 = vsel %vm173_vm0, %v3696_v32, %v3752_v3 }
 0x5c1   :  { %v1217_v48 = vadd.f32 %v2682_v42, %v1216_v53  ;;  %v3965_v53 = vld [vmem:[#allocation6 + $0x458] sm:$0xff] }
 0x5c2   :  { %1499 = vmatpush.msrb.mxu2 %v3965_v53  ;;  %1607 = vmatpush.msrb.mxu1 %v3965_v53 }
 0x5c3   :  { %v1221_v8 = vsel %vm1220_vm14, %v2682_v42, %v1217_v48  ;;  %v4743_v42 = vld [vmem:[#allocation46_spill] sm:$0xff] }
 0x5c4   :  { %v1226_v11 = vsel %vm1223_vm15, %v1225_v56, %v1221_v8  ;;  %v4744_v56 = vld [vmem:[#allocation47_spill] sm:$0xff] }
 0x5c5   :  { %v1249_v23 = vmul.f32 %v1248_v63, %v1226_v11  ;;  %v3986_v11 = vld [vmem:[#allocation6 + $0x3d8] sm:$0xff] }
 0x5c6   :  { %1500 = vmatpush.msrb.mxu2 %v3986_v11  ;;  %1608 = vmatpush.msrb.mxu1 %v3986_v11 }
 0x5c7   :  { %v1250_v50 = vadd.f32 %v1249_v23, %v4743_v42  ;;  %v1266_v23 = vsel %vm173_vm0, %v4746_v24, %v3793_v60  ;;  %v4007_v42 = vld [vmem:[#allocation6 + $0x258] sm:$0xff] }
 0x5c8   :  { %1501 = vmatpush.msrb.mxu2 %v3988_v28  ;;  %1609 = vmatpush.msrb.mxu1 %v3988_v28 }
 0x5c9   :  { %2683 = vtanh.f32 %v1250_v50  ;;  %v1267_v50 = vsel %vm173_vm0, %v3570_v44, %v3778_v33 }
 0x5ca   :  { %1502 = vmatpush.msrb.mxu2 %v4005_v17  ;;  %1610 = vmatpush.msrb.mxu1 %v4005_v17 }
 0x5cc   :  { %1503 = vmatpush.msrb.mxu2 %v4007_v42  ;;  %1611 = vmatpush.msrb.mxu1 %v4007_v42 }
 0x5ce   :  { %1504 = vmatpush.msrb.mxu2 %v4024_v55  ;;  %1612 = vmatpush.msrb.mxu1 %v4024_v55 }
 0x5cf   :  { %v2684_v46 = vpop.eup %2683 }
 0x5d0   :  { %v1253_v54 = vmul.f32 %v2684_v46, %v1252_v61  ;;  %1505 = vmatpush.msrb.mxu2 %v4026_v39  ;;  %1613 = vmatpush.msrb.mxu1 %v4026_v39  ;;  %v4043_v61 = vld [vmem:[#allocation6 + $0xd8] sm:$0xff] }
 0x5d1   :  { %v4045_v46 = vld [vmem:[#allocation6 + $0x58] sm:$0xff] }
 0x5d2   :  { %v3976_v48 = vadd.f32 %v1254_v51, %v1253_v54  ;;  %1506 = vmatpush.msrb.mxu2 %v4043_v61  ;;  %1614 = vmatpush.msrb.mxu1 %v4043_v61  ;;  %v1269_v54 = vsel %vm173_vm0, %v3752_v3, %v3696_v32  ;;  %v1270_v32 = vsel %vm173_vm0, %v3778_v33, %v3570_v44 }
 0x5d3   :  { %v1271_v44 = vsel %vm173_vm0, %v3793_v60, %v4746_v24 }
 0x5d4   :  { %v1265_v8 = vsel %vm173_vm0, %v4744_v56, %v3976_v48  ;;  %1507 = vmatpush.msrb.mxu2 %v4045_v46  ;;  %1615 = vmatpush.msrb.mxu1 %v4045_v46  ;;  %v4104_v3 = vsel %vm173_vm0, %v3976_v48, %v4744_v56 }
 0x5d5   :  { %1345 = vmatmul.f32.vlgmr.msra.gmra.mxu2 %v1265_v8  ;;  %1386 = vmatmul.f32.vlgmr.msrb.gmra.mxu3 %v1265_v8  ;;  %4747 = vst [vmem:[#allocation21_spill] sm:$0xff] %v4104_v3 }
 0x5d6   :  { %1427 = vmatmul.f32.vlgmr.msrb.gmra.mxu0 %v1265_v8  ;;  %1688 = vmatpush.msrb.mxu3 %v3843_v45 }
 0x5d7   :  { %1708 = vmatpush.msrb.mxu0 %v3889_v62  ;;  %1668 = vmatpush.msra.mxu2 %v3785_v20 }
 0x5d8   :  { %1689 = vmatpush.msrb.mxu3 %v3847_v58  ;;  %1776 = vmatpush.msra.mxu1 %v3785_v20  ;;  %v1321_v20 = vld [vmem:[#allocation8 + $0x3] sm:$0x7] }
 0x5d9   :  { %1709 = vmatpush.msrb.mxu0 %v3897_v30  ;;  %1669 = vmatpush.msra.mxu2 %v3798_v6 }
 0x5da   :  { %1690 = vmatpush.msrb.mxu3 %v3850_v19  ;;  %1777 = vmatpush.msra.mxu1 %v3798_v6 }
 0x5db   :  { %1710 = vmatpush.msrb.mxu0 %v3918_v36  ;;  %1670 = vmatpush.msra.mxu2 %v3801_v9 }
 0x5dc   :  { %1691 = vmatpush.msrb.mxu3 %v3853_v29  ;;  %1778 = vmatpush.msra.mxu1 %v3801_v9  ;;  %v4137_v9 = vperm.slane %v1321_v20, 2 }
 0x5dd   :  { %1348 = vmatmul.f32.gmra.mxu2 %v1266_v23  ;;  %1389 = vmatmul.f32.gmra.mxu3 %v1266_v23 }
 0x5de   :  { %1430 = vmatmul.f32.gmra.mxu0 %v1266_v23  ;;  %1692 = vmatpush.msrb.mxu3 %v3856_v0  ;;  %4748 = vst [vmem:[#allocation17_spill] sm:$0xff] %v4137_v9 }
 0x5df   :  { %1711 = vmatpush.msrb.mxu0 %v3920_v15  ;;  %1671 = vmatpush.msra.mxu2 %v3804_v12 }
 0x5e0   :  { %1693 = vmatpush.msrb.mxu3 %v3859_v25  ;;  %1779 = vmatpush.msra.mxu1 %v3804_v12 }
 0x5e1   :  { %1712 = vmatpush.msrb.mxu0 %v3944_v10  ;;  %1672 = vmatpush.msra.mxu2 %v3807_v16 }
 0x5e2   :  { %1694 = vmatpush.msrb.mxu3 %v3862_v2  ;;  %1780 = vmatpush.msra.mxu1 %v3807_v16 }
 0x5e3   :  { %1713 = vmatpush.msrb.mxu0 %v3946_v35  ;;  %1673 = vmatpush.msra.mxu2 %v3810_v18 }
 0x5e4   :  { %1695 = vmatpush.msrb.mxu3 %v3865_v52  ;;  %1781 = vmatpush.msra.mxu1 %v3810_v18  ;;  %v1323_v18 = vperm.slane %v1321_v20, 0 }
 0x5e5   :  { %1351 = vmatmul.f32.gmra.mxu2 %v1267_v50  ;;  %1392 = vmatmul.f32.gmra.mxu3 %v1267_v50 }
 0x5e6   :  { %1433 = vmatmul.f32.gmra.mxu0 %v1267_v50  ;;  %1696 = vmatpush.msrb.mxu3 %v3870_v38 }
 0x5e7   :  { %1714 = vmatpush.msrb.mxu0 %v3963_v57  ;;  %1674 = vmatpush.msra.mxu2 %v3813_v21 }
 0x5e8   :  { %1697 = vmatpush.msrb.mxu3 %v3874_v34  ;;  %1782 = vmatpush.msra.mxu1 %v3813_v21 }
 0x5e9   :  { %1715 = vmatpush.msrb.mxu0 %v3965_v53  ;;  %1675 = vmatpush.msra.mxu2 %v3816_v22 }
 0x5ea   :  { %1698 = vmatpush.msrb.mxu3 %v3877_v14  ;;  %1783 = vmatpush.msra.mxu1 %v3816_v22 }
 0x5eb   :  { %1716 = vmatpush.msrb.mxu0 %v3986_v11  ;;  %1676 = vmatpush.msra.mxu2 %v3819_v26 }
 0x5ec   :  { %1699 = vmatpush.msrb.mxu3 %v3882_v59  ;;  %1784 = vmatpush.msra.mxu1 %v3819_v26 }
 0x5ed   :  { %1354 = vmatmul.f32.gmra.mxu2 %v1268_v43  ;;  %1395 = vmatmul.f32.gmra.mxu3 %v1268_v43 }
 0x5ee   :  { %1436 = vmatmul.f32.gmra.mxu0 %v1268_v43  ;;  %1700 = vmatpush.msrb.mxu3 %v3891_v1 }
 0x5ef   :  { %1717 = vmatpush.msrb.mxu0 %v3988_v28  ;;  %1677 = vmatpush.msra.mxu2 %v3822_v27 }
 0x5f0   :  { %1701 = vmatpush.msrb.mxu3 %v3895_v7  ;;  %1785 = vmatpush.msra.mxu1 %v3822_v27 }
 0x5f1   :  { %1718 = vmatpush.msrb.mxu0 %v4005_v17  ;;  %1678 = vmatpush.msra.mxu2 %v3825_v31 }
 0x5f2   :  { %1702 = vmatpush.msrb.mxu3 %v3904_v37  ;;  %1786 = vmatpush.msra.mxu1 %v3825_v31 }
 0x5f3   :  { %1719 = vmatpush.msrb.mxu0 %v4007_v42  ;;  %1679 = vmatpush.msra.mxu2 %v3828_v5 }
 0x5f4   :  { %1703 = vmatpush.msrb.mxu3 %v3910_v47  ;;  %1787 = vmatpush.msra.mxu1 %v3828_v5 }
 0x5f5   :  { %1357 = vmatmul.f32.gmra.mxu2 %v1269_v54  ;;  %1398 = vmatmul.f32.gmra.mxu3 %v1269_v54 }
 0x5f6   :  { %1439 = vmatmul.f32.gmra.mxu0 %v1269_v54  ;;  %1680 = vmatpush.msra.mxu2 %v3831_v49 }
 0x5f7   :  { %1720 = vmatpush.msrb.mxu0 %v4024_v55  ;;  %1788 = vmatpush.msra.mxu1 %v3831_v49 }
 0x5f8   :  { %1681 = vmatpush.msra.mxu2 %v3834_v13 }
 0x5f9   :  { %1721 = vmatpush.msrb.mxu0 %v4026_v39  ;;  %1789 = vmatpush.msra.mxu1 %v3834_v13  ;;  %v4149_v13 = vperm.slane %v1321_v20, 1 }
 0x5fa   :  { %1682 = vmatpush.msra.mxu2 %v3837_v40 }
 0x5fb   :  { %1722 = vmatpush.msrb.mxu0 %v4043_v61  ;;  %1790 = vmatpush.msra.mxu1 %v3837_v40  ;;  %4750 = vst [vmem:[#allocation23_spill] sm:$0xff] %v4149_v13 }
 0x5fc   :  { %1683 = vmatpush.msra.mxu2 %v3840_v41 }
 0x5fd   :  { %1360 = vmatmul.f32.gmra.mxu2 %v1270_v32  ;;  %1401 = vmatmul.f32.gmra.mxu3 %v1270_v32 }
 0x5fe   :  { %1442 = vmatmul.f32.gmra.mxu0 %v1270_v32  ;;  %1791 = vmatpush.msra.mxu1 %v3840_v41 }
 0x5ff   :  { %1723 = vmatpush.msrb.mxu0 %v4045_v46 }
 0x605   :  { %1363 = vmatmul.f32.gmra.mxu2 %v1271_v44  ;;  %1404 = vmatmul.f32.gmra.mxu3 %v1271_v44 }
 0x606   :  { %1445 = vmatmul.f32.gmra.mxu0 %v1271_v44 }
 0x60d   :  { %1366 = vmatmul.f32.gmra.mxu2 %v4104_v3  ;;  %1407 = vmatmul.f32.gmra.mxu3 %v4104_v3 }
 0x60e   :  { %1448 = vmatmul.f32.gmra.mxu0 %v4104_v3 }
 0x615   :  { %1508 = vmatmul.f32.vlgmr.msrb.gmra.mxu2 %v4742_v4 }
 0x616   :  { %1796 = vmatpush.msrb.mxu2 %v3843_v45 }
 0x618   :  { %1797 = vmatpush.msrb.mxu2 %v3847_v58 }
 0x61a   :  { %1798 = vmatpush.msrb.mxu2 %v3850_v19 }
 0x61c   :  { %1799 = vmatpush.msrb.mxu2 %v3853_v29 }
 0x61e   :  { %1800 = vmatpush.msrb.mxu2 %v3856_v0 }
 0x620   :  { %1801 = vmatpush.msrb.mxu2 %v3859_v25 }
 0x622   :  { %1802 = vmatpush.msrb.mxu2 %v3862_v2 }
 0x624   :  { %1803 = vmatpush.msrb.mxu2 %v3865_v52 }
 0x626   :  { %1804 = vmatpush.msrb.mxu2 %v3870_v38  ;;  %v1469_v27 = vpop.f32.mrf.mxu1 }
 0x628   :  { %1805 = vmatpush.msrb.mxu2 %v3874_v34 }
 0x62a   :  { %1806 = vmatpush.msrb.mxu2 %v3877_v14 }
 0x62c   :  { %1807 = vmatpush.msrb.mxu2 %v3882_v59 }
 0x62e   :  { %1808 = vmatpush.msrb.mxu2 %v3891_v1  ;;  %v1489_v43 = vpop.f32.mrf.mxu1 }
 0x630   :  { %1809 = vmatpush.msrb.mxu2 %v3895_v7 }
 0x632   :  { %1810 = vmatpush.msrb.mxu2 %v3904_v37 }
 0x634   :  { %1811 = vmatpush.msrb.mxu2 %v3910_v47 }
 0x653   :  { %v4135_v33 = vpop.f32.mrf.mxu0 }
 0x658   :  { %v1346_v60 = vpop.f32.mrf.mxu2  ;;  %v1387_v6 = vpop.f32.mrf.mxu3 }
 0x659   :  { %v1347_v49 = vadd.f32 %v1346_v60, %v1323_v18  ;;  %v1388_v24 = vadd.f32 %v1387_v6, %v4149_v13 }
 0x65b   :  { %v1431_v12 = vpop.f32.mrf.mxu0  ;;  %v1512_v48 = vadd.f32 %v1469_v27, %v1347_v49  ;;  %v1532_v54 = vadd.f32 %v1489_v43, %v1388_v24 }
 0x65c   :  { %v4140_v16 = vadd.f32 %v1431_v12, %v4137_v9 }
 0x65d   :  { %v2574_v50 = vmul.f32 -1.442695, %v1512_v48 }
 0x65f   :  { %2685 = vpow2.f32 %v2574_v50 }
 0x660   :  { %v1349_v21 = vpop.f32.mrf.mxu2  ;;  %v4142_v22 = vpop.f32.mrf.mxu3 }
 0x661   :  { %v4144_v26 = vadd.f32 %v1349_v21, %v1323_v18  ;;  %v2575_v21 = vmul.f32 -1.442695, %v1532_v54 }
 0x663   :  { %v1434_v31 = vpop.f32.mrf.mxu0  ;;  %2687 = vpow2.f32 %v2575_v21 }
 0x664   :  { %v4147_v5 = vadd.f32 %v1434_v31, %v4137_v9 }
 0x665   :  { %v2686_v6 = vpop.eup %2685 }
 0x666   :  { %4749 = vst [vmem:[#allocation25_spill] sm:$0xff] %v4147_v5  ;;  %v1516_v48 = vadd.f32 1.0, %v2686_v6 }
 0x668   :  { %v1352_v4 = vpop.f32.mrf.mxu2  ;;  %v1393_v51 = vpop.f32.mrf.mxu3  ;;  %2689 = vrcp.f32 %v1516_v48  ;;  %vm1522_vm5 = vweird.f32 %v1516_v48 }
 0x669   :  { %v4151_v56 = vadd.f32 %v1352_v4, %v1323_v18  ;;  %v4154_v63 = vadd.f32 %v1393_v51, %v4149_v13  ;;  %v2688_v50 = vpop.eup %2687 }
 0x66b   :  { %v1437_v8 = vpop.f32.mrf.mxu0 }
 0x66c   :  { %v4158_v23 = vadd.f32 %v1437_v8, %v4137_v9 }
 0x66e   :  { %4751 = vst [vmem:[#allocation18_spill] sm:$0xff] %v4158_v23 }
 0x670   :  { %v1355_v32 = vpop.f32.mrf.mxu2  ;;  %v1396_v44 = vpop.f32.mrf.mxu3 }
 0x671   :  { %v4160_v20 = vadd.f32 %v1355_v32, %v1323_v18  ;;  %v4163_v60 = vadd.f32 %v1396_v44, %v4149_v13  ;;  %v1536_v32 = vadd.f32 1.0, %v2688_v50 }
 0x673   :  { %4752 = vst [vmem:[#allocation27_spill] sm:$0xff] %v4160_v20  ;;  %v1440_v12 = vpop.f32.mrf.mxu0  ;;  %2691 = vrcp.f32 %v1536_v32  ;;  %vm1542_vm9 = vweird.f32 %v1536_v32 }
 0x674   :  { %4753 = vst [vmem:[#allocation26_spill] sm:$0xff] %v4163_v60  ;;  %v4166_v27 = vadd.f32 %v1440_v12, %v4137_v9  ;;  %v1526_v60 = vand.u32 2147483647, %v1516_v48 }
 0x676   :  { %4754 = vst [vmem:[#allocation19_spill] sm:$0xff] %v4166_v27  ;;  %vm1527_vm7 = vcmp.eq.f32.partialorder %v1526_v60, 8.507059e+37 }
 0x678   :  { %v1358_v31 = vpop.f32.mrf.mxu2  ;;  %v1399_v49 = vpop.f32.mrf.mxu3 }
 0x679   :  { %v4168_v4 = vadd.f32 %v1358_v31, %v1323_v18  ;;  %v4171_v51 = vadd.f32 %v1399_v49, %v4149_v13  ;;  %v2690_v31 = vpop.eup %2689 }
 0x67a   :  { %v1518_v6 = vmul.f32 %v2690_v31, %v1516_v48  ;;  %v2692_v50 = vpop.eup %2691  ;;  %vm1523_vm0 = vweird.f32 %v2690_v31 }
 0x67b   :  { %4755 = vst [vmem:[#allocation28_spill] sm:$0xff] %v4168_v4  ;;  %v1443_v8 = vpop.f32.mrf.mxu0  ;;  %vm1524_vm6 = vmor %vm1522_vm5, %vm1523_vm0  ;;  %vm1543_vm8 = vweird.f32 %v2692_v50 }
 0x67c   :  { %4756 = vst [vmem:[#allocation37_spill] sm:$0xff] %v4171_v51  ;;  %v4174_v24 = vadd.f32 %v1443_v8, %v4137_v9  ;;  %vm1544_vm10 = vmor %vm1542_vm9, %vm1543_vm8 }
 0x67e   :  { %4757 = vst [vmem:[#allocation39_spill] sm:$0xff] %v4174_v24 }
 0x680   :  { %v1361_v43 = vpop.f32.mrf.mxu2  ;;  %v1402_v54 = vpop.f32.mrf.mxu3 }
 0x681   :  { %v4176_v44 = vadd.f32 %v1361_v43, %v1323_v18  ;;  %v4179_v12 = vadd.f32 %v1402_v54, %v4149_v13  ;;  %v1519_v43 = vsub.f32 1.0, %v1518_v6 }
 0x683   :  { %4758 = vst [vmem:[#allocation32_spill] sm:$0xff] %v4176_v44  ;;  %v1446_v21 = vpop.f32.mrf.mxu0  ;;  %v1538_v44 = vmul.f32 %v2692_v50, %v1536_v32  ;;  %v1520_v51 = vmul.f32 %v2690_v31, %v1519_v43 }
 0x684   :  { %4759 = vst [vmem:[#allocation30_spill] sm:$0xff] %v4179_v12  ;;  %v4182_v49 = vadd.f32 %v1446_v21, %v4137_v9  ;;  %v1528_v21 = vand.u32 2147483648, %v1516_v48 }
 0x685   :  { %v1539_v4 = vsub.f32 1.0, %v1538_v44  ;;  %v1521_v23 = vadd.f32 %v2690_v31, %v1520_v51  ;;  %v1548_v44 = vand.u32 2147483648, %v1536_v32 }
 0x686   :  { %4760 = vst [vmem:[#allocation34_spill] sm:$0xff] %v4182_v49  ;;  %v4191_v49 = vld [vmem:[#allocation8 + $0xa] ss:$0 sm:$0xff] }
 0x688   :  { %v1364_v3 = vpop.f32.mrf.mxu2  ;;  %v1405_v8 = vpop.f32.mrf.mxu3 }
 0x689   :  { %v4184_v24 = vadd.f32 %v1364_v3, %v1323_v18  ;;  %v4187_v27 = vadd.f32 %v1405_v8, %v4149_v13  ;;  %v1540_v3 = vmul.f32 %v2692_v50, %v1539_v4 }
 0x68b   :  { %4761 = vst [vmem:[#allocation20_spill] sm:$0xff] %v4184_v24  ;;  %v1525_v24 = vsel %vm1524_vm6, %v2690_v31, %v1521_v23  ;;  %v1541_v20 = vadd.f32 %v2692_v50, %v1540_v3  ;;  %v1549_v23 = vor.u32 1.1754944e-38, %v1548_v44  ;;  %v4267_v3 = vld [vmem:[#allocation6 + $0x148] sm:$0xff] }
 0x68c   :  { %4762 = vst [vmem:[#allocation16_spill] sm:$0xff] %v4187_v27  ;;  %v1529_v27 = vor.u32 1.1754944e-38, %v1528_v21 }
 0x68d   :  { %v1545_v4 = vsel %vm1544_vm10, %v2692_v50, %v1541_v20  ;;  %v4207_v20 = vld [vmem:[#allocation6 + $0x748] sm:$0xff] }
 0x68e   :  { %v1530_v43 = vsel %vm1527_vm7, %v1529_v27, %v1525_v24  ;;  %v4262_v50 = vld [vmem:[#allocation6 + $0x1c8] sm:$0xff] }
 0x690   :  { %v1367_v54 = vpop.f32.mrf.mxu2 }
 0x691   :  { %v4189_v12 = vadd.f32 %v1367_v54, %v1323_v18  ;;  %v1429_v18 = vadd.f32 %v4135_v33, %v4137_v9  ;;  %v1546_v54 = vand.u32 2147483647, %v1536_v32  ;;  %v4202_v33 = vld [vmem:[#allocation6 + $0x7c8] sm:$0xff] }
 0x692   :  { %v4212_v32 = vld [vmem:[#allocation6 + $0x6c8] sm:$0xff] }
 0x693   :  { %4763 = vst [vmem:[#allocation24_spill] sm:$0xff] %v4189_v12  ;;  %vm1547_vm11 = vcmp.eq.f32.partialorder %v1546_v54, 8.507059e+37 }
 0x694   :  { %v1550_v48 = vsel %vm1547_vm11, %v1549_v23, %v1545_v4 }
 0x695   :  { %v1556_v60 = vsub.f32 1.0, %v1550_v48  ;;  %v1558_v27 = vmul.f32 0.0, %v1550_v48 }
 0x698   :  { %v1509_v8 = vpop.f32.mrf.mxu2 }
 0x699   :  { %v1552_v6 = vadd.f32 %v4191_v49, %v1509_v8  ;;  %v4277_v8 = vpop.f32.mrf.mxu0 }
 0x69a   :  { %4764 = vst [vmem:[#allocation31_spill] sm:$0xff] %v4277_v8 }
 0x69b   :  { %v1553_v51 = vmul.f32 %v1552_v6, %v1530_v43  ;;  %v4279_v6 = vpop.f32.mrf.mxu3  ;;  %v1391_v43 = vadd.f32 %v4142_v22, %v4149_v13 }
 0x69c   :  { %4765 = vst [vmem:[#allocation33_spill] sm:$0xff] %v4279_v6 }
 0x69d   :  { %v1554_v12 = vadd.f32 %v1553_v51, %v1429_v18 }
 0x69f   :  { %2693 = vtanh.f32 %v1554_v12  ;;  %v4217_v12 = vld [vmem:[#allocation6 + $0x648] sm:$0xff] }
 0x6a5   :  { %v2694_v31 = vpop.eup %2693 }
 0x6a6   :  { %v1557_v21 = vmul.f32 %v2694_v31, %v1556_v60 }
 0x6a8   :  { %v4196_v24 = vadd.f32 %v1558_v27, %v1557_v21 }
 0x6aa   :  { %1576 = vmatmul.f32.vlgmr.msra.gmra.mxu3 %v4196_v24  ;;  %1596 = vmatmul.f32.vlgmr.msra.gmra.mxu0 %v4196_v24 }
 0x6ab   :  { %1616 = vmatmul.f32.vlgmr.msrb.gmra.mxu1 %v4196_v24  ;;  %1816 = vmatpush.msra.mxu3 %v3889_v62 }
 0x6ac   :  { %1884 = vmatpush.msra.mxu0 %v4202_v33  ;;  %1904 = vmatpush.msrb.mxu1 %v3843_v45  ;;  %v4222_v45 = vld [vmem:[#allocation6 + $0x5c8] sm:$0xff] }
 0x6ad   :  { %1817 = vmatpush.msra.mxu3 %v3897_v30 }
 0x6ae   :  { %1885 = vmatpush.msra.mxu0 %v4207_v20  ;;  %1905 = vmatpush.msrb.mxu1 %v3847_v58  ;;  %v4227_v58 = vld [vmem:[#allocation6 + $0x548] sm:$0xff] }
 0x6af   :  { %1818 = vmatpush.msra.mxu3 %v3918_v36 }
 0x6b0   :  { %1886 = vmatpush.msra.mxu0 %v4212_v32  ;;  %1906 = vmatpush.msrb.mxu1 %v3850_v19  ;;  %v4232_v19 = vld [vmem:[#allocation6 + $0x4c8] sm:$0xff] }
 0x6b1   :  { %1819 = vmatpush.msra.mxu3 %v3920_v15 }
 0x6b2   :  { %1887 = vmatpush.msra.mxu0 %v4217_v12  ;;  %1907 = vmatpush.msrb.mxu1 %v3853_v29  ;;  %v4237_v29 = vld [vmem:[#allocation6 + $0x448] sm:$0xff] }
 0x6b3   :  { %1820 = vmatpush.msra.mxu3 %v3944_v10 }
 0x6b4   :  { %1888 = vmatpush.msra.mxu0 %v4222_v45  ;;  %1908 = vmatpush.msrb.mxu1 %v3856_v0  ;;  %v4242_v0 = vld [vmem:[#allocation6 + $0x3c8] sm:$0xff] }
 0x6b5   :  { %1821 = vmatpush.msra.mxu3 %v3946_v35 }
 0x6b6   :  { %1889 = vmatpush.msra.mxu0 %v4227_v58  ;;  %1909 = vmatpush.msrb.mxu1 %v3859_v25  ;;  %v4247_v25 = vld [vmem:[#allocation6 + $0x348] sm:$0xff] }
 0x6b7   :  { %1822 = vmatpush.msra.mxu3 %v3963_v57 }
 0x6b8   :  { %1890 = vmatpush.msra.mxu0 %v4232_v19  ;;  %1910 = vmatpush.msrb.mxu1 %v3862_v2  ;;  %v4252_v2 = vld [vmem:[#allocation6 + $0x2c8] sm:$0xff] }
 0x6b9   :  { %1823 = vmatpush.msra.mxu3 %v3965_v53 }
 0x6ba   :  { %1891 = vmatpush.msra.mxu0 %v4237_v29  ;;  %1911 = vmatpush.msrb.mxu1 %v3865_v52  ;;  %v4257_v52 = vld [vmem:[#allocation6 + $0x248] sm:$0xff] }
 0x6bb   :  { %1824 = vmatpush.msra.mxu3 %v3986_v11 }
 0x6bc   :  { %1892 = vmatpush.msra.mxu0 %v4242_v0  ;;  %1912 = vmatpush.msrb.mxu1 %v3870_v38 }
 0x6bd   :  { %1825 = vmatpush.msra.mxu3 %v3988_v28 }
 0x6be   :  { %1893 = vmatpush.msra.mxu0 %v4247_v25  ;;  %1913 = vmatpush.msrb.mxu1 %v3874_v34 }
 0x6bf   :  { %1826 = vmatpush.msra.mxu3 %v4005_v17 }
 0x6c0   :  { %1894 = vmatpush.msra.mxu0 %v4252_v2  ;;  %1914 = vmatpush.msrb.mxu1 %v3877_v14 }
 0x6c1   :  { %1827 = vmatpush.msra.mxu3 %v4007_v42 }
 0x6c2   :  { %1895 = vmatpush.msra.mxu0 %v4257_v52  ;;  %1915 = vmatpush.msrb.mxu1 %v3882_v59 }
 0x6c3   :  { %1828 = vmatpush.msra.mxu3 %v4024_v55 }
 0x6c4   :  { %1896 = vmatpush.msra.mxu0 %v4262_v50  ;;  %1916 = vmatpush.msrb.mxu1 %v3891_v1 }
 0x6c5   :  { %1829 = vmatpush.msra.mxu3 %v4026_v39 }
 0x6c6   :  { %1897 = vmatpush.msra.mxu0 %v4267_v3  ;;  %1917 = vmatpush.msrb.mxu1 %v3895_v7 }
 0x6c7   :  { %1830 = vmatpush.msra.mxu3 %v4043_v61 }
 0x6c8   :  { %1898 = vmatpush.msra.mxu0 %v3837_v40  ;;  %1918 = vmatpush.msrb.mxu1 %v3904_v37 }
 0x6c9   :  { %1831 = vmatpush.msra.mxu3 %v4045_v46 }
 0x6ca   :  { %1899 = vmatpush.msra.mxu0 %v3840_v41  ;;  %1919 = vmatpush.msrb.mxu1 %v3910_v47 }
 0x727   :  { %v1597_v18 = vpop.f32.mrf.mxu0 }
 0x728   :  { %v1640_v51 = vadd.f32 %v1597_v18, %v1391_v43 }
 0x72a   :  { %v2577_v44 = vmul.f32 -1.442695, %v1640_v51 }
 0x72c   :  { %2695 = vpow2.f32 %v2577_v44 }
 0x72d   :  { %v1577_v40 = vpop.f32.mrf.mxu3 }
 0x72e   :  { %v1620_v54 = vadd.f32 %v1577_v40, %v4144_v26  ;;  %v1617_v26 = vpop.f32.mrf.mxu1 }
 0x730   :  { %v2576_v4 = vmul.f32 -1.442695, %v1620_v54 }
 0x732   :  { %v2696_v23 = vpop.eup %2695  ;;  %2697 = vpow2.f32 %v2576_v4  ;;  %v1660_v4 = vadd.f32 %v4191_v49, %v1617_v26 }
 0x733   :  { %v1644_v41 = vadd.f32 1.0, %v2696_v23 }
 0x735   :  { %2699 = vrcp.f32 %v1644_v41  ;;  %v1656_v13 = vand.u32 2147483648, %v1644_v41  ;;  %vm1650_vm2 = vweird.f32 %v1644_v41 }
 0x737   :  { %v1657_v5 = vor.u32 1.1754944e-38, %v1656_v13  ;;  %v4304_v13 = vld [vmem:[#allocation6 + $0x6d0] sm:$0xff] }
 0x738   :  { %v2698_v48 = vpop.eup %2697 }
 0x739   :  { %v1624_v60 = vadd.f32 1.0, %v2698_v48 }
 0x73b   :  { %2701 = vrcp.f32 %v1624_v60  ;;  %v2700_v31 = vpop.eup %2699  ;;  %v1636_v43 = vand.u32 2147483648, %v1624_v60  ;;  %v1634_v51 = vand.u32 2147483647, %v1624_v60  ;;  %vm1630_vm13 = vweird.f32 %v1624_v60 }
 0x73c   :  { %v1646_v21 = vmul.f32 %v2700_v31, %v1644_v41  ;;  %vm1651_vm1 = vweird.f32 %v2700_v31 }
 0x73d   :  { %v1637_v54 = vor.u32 1.1754944e-38, %v1636_v43  ;;  %vm1635_vm15 = vcmp.eq.f32.partialorder %v1634_v51, 8.507059e+37  ;;  %vm1652_vm3 = vmor %vm1650_vm2, %vm1651_vm1 }
 0x73e   :  { %v1647_v22 = vsub.f32 1.0, %v1646_v21 }
 0x740   :  { %v1648_v44 = vmul.f32 %v2700_v31, %v1647_v22 }
 0x741   :  { %v2702_v27 = vpop.eup %2701 }
 0x742   :  { %v1626_v8 = vmul.f32 %v2702_v27, %v1624_v60  ;;  %vm1631_vm12 = vweird.f32 %v2702_v27  ;;  %v1649_v6 = vadd.f32 %v2700_v31, %v1648_v44 }
 0x743   :  { %vm1632_vm14 = vmor %vm1630_vm13, %vm1631_vm12 }
 0x744   :  { %v1627_v9 = vsub.f32 1.0, %v1626_v8  ;;  %v1654_v8 = vand.u32 2147483647, %v1644_v41  ;;  %v1653_v22 = vsel %vm1652_vm3, %v2700_v31, %v1649_v6 }
 0x746   :  { %v1628_v18 = vmul.f32 %v2702_v27, %v1627_v9  ;;  %vm1655_vm4 = vcmp.eq.f32.partialorder %v1654_v8, 8.507059e+37 }
 0x747   :  { %v1658_v60 = vsel %vm1655_vm4, %v1657_v5, %v1653_v22  ;;  %v4299_v5 = vld [vmem:[#allocation6 + $0x750] sm:$0xff] }
 0x748   :  { %v1629_v40 = vadd.f32 %v2702_v27, %v1628_v18  ;;  %v1664_v43 = vsub.f32 1.0, %v1658_v60 }
 0x74a   :  { %v1633_v23 = vsel %vm1632_vm14, %v2702_v27, %v1629_v40  ;;  %v1666_v27 = vmul.f32 %v1658_v60, %v4196_v24  ;;  %v4329_v24 = vld [vmem:[#allocation6 + $0x450] sm:$0xff] }
 0x74b   :  { %v1638_v48 = vsel %vm1635_vm15, %v1637_v54, %v1633_v23 }
 0x74c   :  { %v1661_v21 = vmul.f32 %v1660_v4, %v1638_v48 }
 0x74e   :  { %v1662_v9 = vadd.f32 %v1661_v21, %v4140_v16  ;;  %v4294_v16 = vld [vmem:[#allocation6 + $0x7d0] sm:$0xff] }
 0x750   :  { %2703 = vtanh.f32 %v1662_v9 }
 0x756   :  { %v2704_v18 = vpop.eup %2703 }
 0x757   :  { %v1665_v26 = vmul.f32 %v2704_v18, %v1664_v43 }
 0x759   :  { %v4287_v51 = vadd.f32 %v1666_v27, %v1665_v26 }
 0x75b   :  { %1684 = vmatmul.f32.vlgmr.msra.gmra.mxu2 %v4287_v51  ;;  %1704 = vmatmul.f32.vlgmr.msrb.gmra.mxu3 %v4287_v51 }
 0x75c   :  { %1724 = vmatmul.f32.vlgmr.msrb.gmra.mxu0 %v4287_v51  ;;  %1924 = vmatpush.msra.mxu2 %v3889_v62  ;;  %v4309_v62 = vld [vmem:[#allocation6 + $0x650] sm:$0xff] }
 0x75d   :  { %1992 = vmatpush.msrb.mxu3 %v4202_v33  ;;  %2012 = vmatpush.msrb.mxu0 %v4294_v16 }
 0x75e   :  { %1925 = vmatpush.msra.mxu2 %v3897_v30  ;;  %v4314_v30 = vld [vmem:[#allocation6 + $0x5d0] sm:$0xff] }
 0x75f   :  { %1993 = vmatpush.msrb.mxu3 %v4207_v20  ;;  %2013 = vmatpush.msrb.mxu0 %v4299_v5 }
 0x760   :  { %1926 = vmatpush.msra.mxu2 %v3918_v36  ;;  %v4319_v36 = vld [vmem:[#allocation6 + $0x550] sm:$0xff] }
 0x761   :  { %1994 = vmatpush.msrb.mxu3 %v4212_v32  ;;  %2014 = vmatpush.msrb.mxu0 %v4304_v13 }
 0x762   :  { %1927 = vmatpush.msra.mxu2 %v3920_v15  ;;  %v4324_v15 = vld [vmem:[#allocation6 + $0x4d0] sm:$0xff] }
 0x763   :  { %1995 = vmatpush.msrb.mxu3 %v4217_v12  ;;  %2015 = vmatpush.msrb.mxu0 %v4309_v62 }
 0x764   :  { %1928 = vmatpush.msra.mxu2 %v3944_v10 }
 0x765   :  { %1996 = vmatpush.msrb.mxu3 %v4222_v45  ;;  %2016 = vmatpush.msrb.mxu0 %v4314_v30 }
 0x766   :  { %1929 = vmatpush.msra.mxu2 %v3946_v35 }
 0x767   :  { %1997 = vmatpush.msrb.mxu3 %v4227_v58  ;;  %2017 = vmatpush.msrb.mxu0 %v4319_v36 }
 0x768   :  { %1930 = vmatpush.msra.mxu2 %v3963_v57 }
 0x769   :  { %1998 = vmatpush.msrb.mxu3 %v4232_v19  ;;  %2018 = vmatpush.msrb.mxu0 %v4324_v15 }
 0x76a   :  { %1931 = vmatpush.msra.mxu2 %v3965_v53 }
 0x76b   :  { %1999 = vmatpush.msrb.mxu3 %v4237_v29  ;;  %2019 = vmatpush.msrb.mxu0 %v4329_v24 }
 0x76c   :  { %1932 = vmatpush.msra.mxu2 %v3986_v11 }
 0x76d   :  { %2000 = vmatpush.msrb.mxu3 %v4242_v0  ;;  %2020 = vmatpush.msrb.mxu0 %v3870_v38  ;;  %v4351_v38 = vld [vmem:[#allocation6 + $0xc8] sm:$0xff] }
 0x76e   :  { %1933 = vmatpush.msra.mxu2 %v3988_v28 }
 0x76f   :  { %2001 = vmatpush.msrb.mxu3 %v4247_v25  ;;  %2021 = vmatpush.msrb.mxu0 %v3874_v34  ;;  %v4356_v34 = vld [vmem:[#allocation6 + $0x48] sm:$0xff] }
 0x770   :  { %1934 = vmatpush.msra.mxu2 %v4005_v17 }
 0x771   :  { %2002 = vmatpush.msrb.mxu3 %v4252_v2  ;;  %2022 = vmatpush.msrb.mxu0 %v3877_v14 }
 0x772   :  { %1935 = vmatpush.msra.mxu2 %v4007_v42 }
 0x773   :  { %2003 = vmatpush.msrb.mxu3 %v4257_v52  ;;  %2023 = vmatpush.msrb.mxu0 %v3882_v59 }
 0x774   :  { %1936 = vmatpush.msra.mxu2 %v4024_v55 }
 0x775   :  { %2004 = vmatpush.msrb.mxu3 %v4262_v50  ;;  %2024 = vmatpush.msrb.mxu0 %v3891_v1 }
 0x776   :  { %1937 = vmatpush.msra.mxu2 %v4026_v39 }
 0x777   :  { %2005 = vmatpush.msrb.mxu3 %v4267_v3  ;;  %2025 = vmatpush.msrb.mxu0 %v3895_v7 }
 0x778   :  { %1938 = vmatpush.msra.mxu2 %v4043_v61 }
 0x779   :  { %2006 = vmatpush.msrb.mxu3 %v4351_v38  ;;  %2026 = vmatpush.msrb.mxu0 %v3904_v37 }
 0x77a   :  { %1939 = vmatpush.msra.mxu2 %v4045_v46 }
 0x77b   :  { %2007 = vmatpush.msrb.mxu3 %v4356_v34  ;;  %2027 = vmatpush.msrb.mxu0 %v3910_v47 }
 0x7d9   :  { %v1725_v9 = vpop.f32.mrf.mxu0 }
 0x7da   :  { %v1768_v18 = vadd.f32 %v4191_v49, %v1725_v9  ;;  %v4768_v9 = vld [vmem:[#allocation26_spill] sm:$0xff] }
 0x7de   :  { %v1685_v14 = vpop.f32.mrf.mxu2  ;;  %v1705_v59 = vpop.f32.mrf.mxu3 }
 0x7df   :  { %v1728_v1 = vadd.f32 %v1685_v14, %v4151_v56  ;;  %v1748_v7 = vadd.f32 %v1705_v59, %v4154_v63 }
 0x7e1   :  { %v2578_v6 = vmul.f32 -1.442695, %v1728_v1  ;;  %v2579_v41 = vmul.f32 -1.442695, %v1748_v7 }
 0x7e3   :  { %2705 = vpow2.f32 %v2578_v6  ;;  %v4766_v6 = vld [vmem:[#allocation25_spill] sm:$0xff] }
 0x7e4   :  { %2707 = vpow2.f32 %v2579_v41 }
 0x7e9   :  { %v2706_v31 = vpop.eup %2705 }
 0x7ea   :  { %v2708_v37 = vpop.eup %2707  ;;  %v1732_v44 = vadd.f32 1.0, %v2706_v31 }
 0x7eb   :  { %v1752_v40 = vadd.f32 1.0, %v2708_v37 }
 0x7ec   :  { %2709 = vrcp.f32 %v1732_v44  ;;  %v1744_v21 = vand.u32 2147483648, %v1732_v44  ;;  %v1742_v63 = vand.u32 2147483647, %v1732_v44  ;;  %vm1738_vm5 = vweird.f32 %v1732_v44 }
 0x7ed   :  { %2711 = vrcp.f32 %v1752_v40  ;;  %v1764_v59 = vand.u32 2147483648, %v1752_v40  ;;  %vm1758_vm9 = vweird.f32 %v1752_v40  ;;  %v1762_v7 = vand.u32 2147483647, %v1752_v40 }
 0x7ee   :  { %v1745_v43 = vor.u32 1.1754944e-38, %v1744_v21  ;;  %vm1743_vm7 = vcmp.eq.f32.partialorder %v1742_v63, 8.507059e+37 }
 0x7ef   :  { %v1765_v37 = vor.u32 1.1754944e-38, %v1764_v59  ;;  %vm1763_vm11 = vcmp.eq.f32.partialorder %v1762_v7, 8.507059e+37 }
 0x7f2   :  { %v2710_v54 = vpop.eup %2709 }
 0x7f3   :  { %v2712_v4 = vpop.eup %2711  ;;  %v1734_v23 = vmul.f32 %v2710_v54, %v1732_v44  ;;  %vm1739_vm0 = vweird.f32 %v2710_v54 }
 0x7f4   :  { %v1754_v47 = vmul.f32 %v2712_v4, %v1752_v40  ;;  %vm1740_vm6 = vmor %vm1738_vm5, %vm1739_vm0  ;;  %vm1759_vm8 = vweird.f32 %v2712_v4  ;;  %v4370_v40 = vld [vmem:[#allocation6 + $0x7d8] sm:$0xff] }
 0x7f5   :  { %v1735_v48 = vsub.f32 1.0, %v1734_v23  ;;  %vm1760_vm10 = vmor %vm1758_vm9, %vm1759_vm8 }
 0x7f6   :  { %v1755_v8 = vsub.f32 1.0, %v1754_v47 }
 0x7f7   :  { %v1736_v56 = vmul.f32 %v2710_v54, %v1735_v48 }
 0x7f8   :  { %v1756_v22 = vmul.f32 %v2712_v4, %v1755_v8  ;;  %v4385_v8 = vld [vmem:[#allocation6 + $0x658] sm:$0xff] }
 0x7f9   :  { %v1737_v60 = vadd.f32 %v2710_v54, %v1736_v56 }
 0x7fa   :  { %v1757_v14 = vadd.f32 %v2712_v4, %v1756_v22 }
 0x7fb   :  { %v1741_v26 = vsel %vm1740_vm6, %v2710_v54, %v1737_v60 }
 0x7fc   :  { %v1746_v27 = vsel %vm1743_vm7, %v1745_v43, %v1741_v26  ;;  %v1761_v31 = vsel %vm1760_vm10, %v2712_v4, %v1757_v14  ;;  %v4375_v4 = vld [vmem:[#allocation6 + $0x758] sm:$0xff] }
 0x7fd   :  { %v1769_v1 = vmul.f32 %v1768_v18, %v1746_v27  ;;  %v1766_v44 = vsel %vm1763_vm11, %v1765_v37, %v1761_v31 }
 0x7fe   :  { %v1772_v23 = vsub.f32 1.0, %v1766_v44  ;;  %v1774_v54 = vmul.f32 %v1766_v44, %v4287_v51  ;;  %v4380_v51 = vld [vmem:[#allocation6 + $0x6d8] sm:$0xff] }
 0x7ff   :  { %v1770_v41 = vadd.f32 %v1769_v1, %v4766_v6 }
 0x801   :  { %2713 = vtanh.f32 %v1770_v41 }
 0x807   :  { %v2714_v47 = vpop.eup %2713 }
 0x808   :  { %v1773_v48 = vmul.f32 %v2714_v47, %v1772_v23 }
 0x80a   :  { %v4365_v21 = vadd.f32 %v1774_v54, %v1773_v48 }
 0x80c   :  { %1792 = vmatmul.f32.vlgmr.msra.gmra.mxu1 %v4365_v21  ;;  %1812 = vmatmul.f32.vlgmr.msrb.gmra.mxu2 %v4365_v21 }
 0x80d   :  { %1832 = vmatmul.f32.vlgmr.msra.gmra.mxu3 %v4365_v21  ;;  %2032 = vmatpush.msra.mxu1 %v4370_v40 }
 0x80e   :  { %2100 = vmatpush.msrb.mxu2 %v4202_v33  ;;  %2120 = vmatpush.msra.mxu3 %v4294_v16 }
 0x80f   :  { %2033 = vmatpush.msra.mxu1 %v4375_v4 }
 0x810   :  { %2101 = vmatpush.msrb.mxu2 %v4207_v20  ;;  %2121 = vmatpush.msra.mxu3 %v4299_v5 }
 0x811   :  { %2034 = vmatpush.msra.mxu1 %v4380_v51 }
 0x812   :  { %2102 = vmatpush.msrb.mxu2 %v4212_v32  ;;  %2122 = vmatpush.msra.mxu3 %v4304_v13 }
 0x813   :  { %2035 = vmatpush.msra.mxu1 %v4385_v8 }
 0x814   :  { %2103 = vmatpush.msrb.mxu2 %v4217_v12  ;;  %2123 = vmatpush.msra.mxu3 %v4309_v62 }
 0x815   :  { %2036 = vmatpush.msra.mxu1 %v3944_v10  ;;  %v4404_v10 = vld [vmem:[#allocation6 + $0x3d0] sm:$0xff] }
 0x816   :  { %2104 = vmatpush.msrb.mxu2 %v4222_v45  ;;  %2124 = vmatpush.msra.mxu3 %v4314_v30 }
 0x817   :  { %2037 = vmatpush.msra.mxu1 %v3946_v35  ;;  %v4409_v35 = vld [vmem:[#allocation6 + $0x350] sm:$0xff] }
 0x818   :  { %2105 = vmatpush.msrb.mxu2 %v4227_v58  ;;  %2125 = vmatpush.msra.mxu3 %v4319_v36 }
 0x819   :  { %2038 = vmatpush.msra.mxu1 %v3963_v57  ;;  %v4414_v57 = vld [vmem:[#allocation6 + $0x2d0] sm:$0xff] }
 0x81a   :  { %2106 = vmatpush.msrb.mxu2 %v4232_v19  ;;  %2126 = vmatpush.msra.mxu3 %v4324_v15 }
 0x81b   :  { %2039 = vmatpush.msra.mxu1 %v3965_v53  ;;  %v4419_v53 = vld [vmem:[#allocation6 + $0x250] sm:$0xff] }
 0x81c   :  { %2107 = vmatpush.msrb.mxu2 %v4237_v29  ;;  %2127 = vmatpush.msra.mxu3 %v4329_v24 }
 0x81d   :  { %2040 = vmatpush.msra.mxu1 %v3986_v11  ;;  %v4424_v11 = vld [vmem:[#allocation6 + $0x1d0] sm:$0xff] }
 0x81e   :  { %2108 = vmatpush.msrb.mxu2 %v4242_v0  ;;  %2128 = vmatpush.msra.mxu3 %v4404_v10 }
 0x81f   :  { %2041 = vmatpush.msra.mxu1 %v3988_v28  ;;  %v4429_v28 = vld [vmem:[#allocation6 + $0x150] sm:$0xff] }
 0x820   :  { %2109 = vmatpush.msrb.mxu2 %v4247_v25  ;;  %2129 = vmatpush.msra.mxu3 %v4409_v35 }
 0x821   :  { %2042 = vmatpush.msra.mxu1 %v4005_v17  ;;  %v4434_v17 = vld [vmem:[#allocation6 + $0xd0] sm:$0xff] }
 0x822   :  { %2110 = vmatpush.msrb.mxu2 %v4252_v2  ;;  %2130 = vmatpush.msra.mxu3 %v4414_v57 }
 0x823   :  { %2043 = vmatpush.msra.mxu1 %v4007_v42  ;;  %v4439_v42 = vld [vmem:[#allocation6 + $0x50] sm:$0xff] }
 0x824   :  { %2111 = vmatpush.msrb.mxu2 %v4257_v52  ;;  %2131 = vmatpush.msra.mxu3 %v4419_v53 }
 0x825   :  { %2044 = vmatpush.msra.mxu1 %v4024_v55 }
 0x826   :  { %2112 = vmatpush.msrb.mxu2 %v4262_v50  ;;  %2132 = vmatpush.msra.mxu3 %v4424_v11 }
 0x827   :  { %2045 = vmatpush.msra.mxu1 %v4026_v39  ;;  %v4767_v39 = vld [vmem:[#allocation27_spill] sm:$0xff] }
 0x828   :  { %2113 = vmatpush.msrb.mxu2 %v4267_v3  ;;  %2133 = vmatpush.msra.mxu3 %v4429_v28 }
 0x829   :  { %2046 = vmatpush.msra.mxu1 %v4043_v61 }
 0x82a   :  { %2114 = vmatpush.msrb.mxu2 %v4351_v38  ;;  %2134 = vmatpush.msra.mxu3 %v4434_v17 }
 0x82b   :  { %2047 = vmatpush.msra.mxu1 %v4045_v46 }
 0x82c   :  { %2115 = vmatpush.msrb.mxu2 %v4356_v34  ;;  %2135 = vmatpush.msra.mxu3 %v4439_v42 }
 0x889   :  { %v1793_v55 = vpop.f32.mrf.mxu1 }
 0x88a   :  { %v1836_v56 = vadd.f32 %v1793_v55, %v4767_v39 }
 0x88c   :  { %v2580_v63 = vmul.f32 -1.442695, %v1836_v56 }
 0x88e   :  { %2715 = vpow2.f32 %v2580_v63 }
 0x88f   :  { %v1813_v61 = vpop.f32.mrf.mxu2 }
 0x890   :  { %v1856_v22 = vadd.f32 %v1813_v61, %v4768_v9  ;;  %v1833_v31 = vpop.f32.mrf.mxu3 }
 0x891   :  { %v1876_v54 = vadd.f32 %v4191_v49, %v1833_v31 }
 0x892   :  { %v2581_v60 = vmul.f32 -1.442695, %v1856_v22  ;;  %v4769_v22 = vld [vmem:[#allocation18_spill] sm:$0xff] }
 0x894   :  { %v2716_v43 = vpop.eup %2715  ;;  %2717 = vpow2.f32 %v2581_v60 }
 0x895   :  { %v1840_v18 = vadd.f32 1.0, %v2716_v43 }
 0x897   :  { %2719 = vrcp.f32 %v1840_v18  ;;  %v1852_v1 = vand.u32 2147483648, %v1840_v18  ;;  %v1850_v6 = vand.u32 2147483647, %v1840_v18  ;;  %vm1846_vm13 = vweird.f32 %v1840_v18 }
 0x899   :  { %v1853_v23 = vor.u32 1.1754944e-38, %v1852_v1  ;;  %vm1851_vm15 = vcmp.eq.f32.partialorder %v1850_v6, 8.507059e+37 }
 0x89a   :  { %v2718_v46 = vpop.eup %2717 }
 0x89b   :  { %v1860_v26 = vadd.f32 1.0, %v2718_v46 }
 0x89d   :  { %v2720_v27 = vpop.eup %2719  ;;  %2721 = vrcp.f32 %v1860_v26  ;;  %v1872_v56 = vand.u32 2147483648, %v1860_v26  ;;  %v1870_v61 = vand.u32 2147483647, %v1860_v26  ;;  %vm1866_vm2 = vweird.f32 %v1860_v26 }
 0x89e   :  { %v1842_v14 = vmul.f32 %v2720_v27, %v1840_v18  ;;  %vm1847_vm12 = vweird.f32 %v2720_v27 }
 0x89f   :  { %vm1848_vm14 = vmor %vm1846_vm13, %vm1847_vm12  ;;  %v1873_v43 = vor.u32 1.1754944e-38, %v1872_v56  ;;  %vm1871_vm4 = vcmp.eq.f32.partialorder %v1870_v61, 8.507059e+37 }
 0x8a0   :  { %v1843_v59 = vsub.f32 1.0, %v1842_v14 }
 0x8a2   :  { %v1844_v7 = vmul.f32 %v2720_v27, %v1843_v59 }
 0x8a3   :  { %v2722_v41 = vpop.eup %2721 }
 0x8a4   :  { %v1862_v37 = vmul.f32 %v2722_v41, %v1860_v26  ;;  %v1845_v44 = vadd.f32 %v2720_v27, %v1844_v7  ;;  %vm1867_vm1 = vweird.f32 %v2722_v41 }
 0x8a5   :  { %vm1868_vm3 = vmor %vm1866_vm2, %vm1867_vm1 }
 0x8a6   :  { %v1863_v47 = vsub.f32 1.0, %v1862_v37  ;;  %v1849_v48 = vsel %vm1848_vm14, %v2720_v27, %v1845_v44 }
 0x8a7   :  { %v1854_v55 = vsel %vm1851_vm15, %v1853_v23, %v1849_v48 }
 0x8a8   :  { %v1864_v39 = vmul.f32 %v2722_v41, %v1863_v47  ;;  %v1877_v63 = vmul.f32 %v1876_v54, %v1854_v55 }
 0x8aa   :  { %v1865_v9 = vadd.f32 %v2722_v41, %v1864_v39  ;;  %v1878_v60 = vadd.f32 %v1877_v63, %v4769_v22  ;;  %v4772_v39 = vld [vmem:[#allocation19_spill] sm:$0xff] }
 0x8ac   :  { %v1869_v18 = vsel %vm1868_vm3, %v2722_v41, %v1865_v9  ;;  %2723 = vtanh.f32 %v1878_v60 }
 0x8ad   :  { %v1874_v46 = vsel %vm1871_vm4, %v1873_v43, %v1869_v18 }
 0x8ae   :  { %v1880_v27 = vsub.f32 1.0, %v1874_v46  ;;  %v1882_v1 = vmul.f32 %v1874_v46, %v4365_v21 }
 0x8b2   :  { %v2724_v14 = vpop.eup %2723 }
 0x8b3   :  { %v1881_v59 = vmul.f32 %v2724_v14, %v1880_v27  ;;  %v2355_v27 = vld [vmem:[#allocation6 + $0x6e0] sm:$0xff] }
 0x8b5   :  { %v4447_v7 = vadd.f32 %v1882_v1, %v1881_v59  ;;  %v2352_v59 = vld [vmem:[#allocation6 + $0x660] sm:$0xff] }
 0x8b6   :  { %v2349_v1 = vld [vmem:[#allocation6 + $0x5e0] sm:$0xff] }
 0x8b7   :  { %1900 = vmatmul.f32.vlgmr.msra.gmra.mxu0 %v4447_v7  ;;  %1920 = vmatmul.f32.vlgmr.msrb.gmra.mxu1 %v4447_v7 }
 0x8b8   :  { %1940 = vmatmul.f32.vlgmr.msra.gmra.mxu2 %v4447_v7  ;;  %2140 = vmatpush.msra.mxu0 %v4370_v40 }
 0x8b9   :  { %2208 = vmatpush.msrb.mxu1 %v4202_v33  ;;  %2228 = vmatpush.msra.mxu2 %v4294_v16  ;;  %v4464_v33 = vld [vmem:[#allocation6 + $0x5d8] sm:$0xff] }
 0x8ba   :  { %2141 = vmatpush.msra.mxu0 %v4375_v4  ;;  %v4770_v16 = vld [vmem:[#allocation28_spill] sm:$0xff] }
 0x8bb   :  { %2209 = vmatpush.msrb.mxu1 %v4207_v20  ;;  %2229 = vmatpush.msra.mxu2 %v4299_v5  ;;  %v4469_v20 = vld [vmem:[#allocation6 + $0x558] sm:$0xff] }
 0x8bc   :  { %2142 = vmatpush.msra.mxu0 %v4380_v51 }
 0x8bd   :  { %2210 = vmatpush.msrb.mxu1 %v4212_v32  ;;  %2230 = vmatpush.msra.mxu2 %v4304_v13  ;;  %v4474_v32 = vld [vmem:[#allocation6 + $0x4d8] sm:$0xff]  ;;  %v4771_v13 = vld [vmem:[#allocation37_spill] sm:$0xff] }
 0x8be   :  { %2143 = vmatpush.msra.mxu0 %v4385_v8 }
 0x8bf   :  { %2211 = vmatpush.msrb.mxu1 %v4217_v12  ;;  %2231 = vmatpush.msra.mxu2 %v4309_v62  ;;  %v4479_v12 = vld [vmem:[#allocation6 + $0x458] sm:$0xff] }
 0x8c0   :  { %2144 = vmatpush.msra.mxu0 %v4464_v33 }
 0x8c1   :  { %2212 = vmatpush.msrb.mxu1 %v4222_v45  ;;  %2232 = vmatpush.msra.mxu2 %v4314_v30  ;;  %v4484_v45 = vld [vmem:[#allocation6 + $0x3d8] sm:$0xff] }
 0x8c2   :  { %2145 = vmatpush.msra.mxu0 %v4469_v20 }
 0x8c3   :  { %2213 = vmatpush.msrb.mxu1 %v4227_v58  ;;  %2233 = vmatpush.msra.mxu2 %v4319_v36  ;;  %v4489_v58 = vld [vmem:[#allocation6 + $0x358] sm:$0xff] }
 0x8c4   :  { %2146 = vmatpush.msra.mxu0 %v4474_v32 }
 0x8c5   :  { %2214 = vmatpush.msrb.mxu1 %v4232_v19  ;;  %2234 = vmatpush.msra.mxu2 %v4324_v15  ;;  %v4494_v19 = vld [vmem:[#allocation6 + $0x2d8] sm:$0xff] }
 0x8c6   :  { %2147 = vmatpush.msra.mxu0 %v4479_v12 }
 0x8c7   :  { %2215 = vmatpush.msrb.mxu1 %v4237_v29  ;;  %2235 = vmatpush.msra.mxu2 %v4329_v24  ;;  %v4499_v29 = vld [vmem:[#allocation6 + $0x258] sm:$0xff] }
 0x8c8   :  { %2148 = vmatpush.msra.mxu0 %v4484_v45 }
 0x8c9   :  { %2216 = vmatpush.msrb.mxu1 %v4242_v0  ;;  %2236 = vmatpush.msra.mxu2 %v4404_v10  ;;  %v4504_v0 = vld [vmem:[#allocation6 + $0x1d8] sm:$0xff] }
 0x8ca   :  { %2149 = vmatpush.msra.mxu0 %v4489_v58 }
 0x8cb   :  { %2217 = vmatpush.msrb.mxu1 %v4247_v25  ;;  %2237 = vmatpush.msra.mxu2 %v4409_v35  ;;  %v4509_v25 = vld [vmem:[#allocation6 + $0x158] sm:$0xff] }
 0x8cc   :  { %2150 = vmatpush.msra.mxu0 %v4494_v19 }
 0x8cd   :  { %2218 = vmatpush.msrb.mxu1 %v4252_v2  ;;  %2238 = vmatpush.msra.mxu2 %v4414_v57  ;;  %v4514_v2 = vld [vmem:[#allocation6 + $0xd8] sm:$0xff] }
 0x8ce   :  { %2151 = vmatpush.msra.mxu0 %v4499_v29 }
 0x8cf   :  { %2219 = vmatpush.msrb.mxu1 %v4257_v52  ;;  %2239 = vmatpush.msra.mxu2 %v4419_v53  ;;  %v4519_v52 = vld [vmem:[#allocation6 + $0x58] sm:$0xff] }
 0x8d0   :  { %2152 = vmatpush.msra.mxu0 %v4504_v0 }
 0x8d1   :  { %2220 = vmatpush.msrb.mxu1 %v4262_v50  ;;  %2240 = vmatpush.msra.mxu2 %v4424_v11 }
 0x8d2   :  { %2153 = vmatpush.msra.mxu0 %v4509_v25 }
 0x8d3   :  { %2221 = vmatpush.msrb.mxu1 %v4267_v3  ;;  %2241 = vmatpush.msra.mxu2 %v4429_v28 }
 0x8d4   :  { %2154 = vmatpush.msra.mxu0 %v4514_v2 }
 0x8d5   :  { %2222 = vmatpush.msrb.mxu1 %v4351_v38  ;;  %2242 = vmatpush.msra.mxu2 %v4434_v17 }
 0x8d6   :  { %2155 = vmatpush.msra.mxu0 %v4519_v52 }
 0x8d7   :  { %2223 = vmatpush.msrb.mxu1 %v4356_v34  ;;  %2243 = vmatpush.msra.mxu2 %v4439_v42 }
 0x934   :  { %v1901_v50 = vpop.f32.mrf.mxu0  ;;  %v1921_v3 = vpop.f32.mrf.mxu1 }
 0x935   :  { %v1944_v5 = vadd.f32 %v1901_v50, %v4770_v16  ;;  %v1964_v62 = vadd.f32 %v1921_v3, %v4771_v13  ;;  %v2328_v3 = vld [vmem:[#allocation6 + $0x260] sm:$0xff] }
 0x936   :  { %v2322_v13 = vld [vmem:[#allocation6 + $0x160] sm:$0xff] }
 0x937   :  { %v2582_v30 = vmul.f32 -1.442695, %v1944_v5  ;;  %v2583_v36 = vmul.f32 -1.442695, %v1964_v62  ;;  %v2325_v5 = vld [vmem:[#allocation6 + $0x1e0] sm:$0xff] }
 0x939   :  { %2725 = vpow2.f32 %v2582_v30  ;;  %v2319_v30 = vld [vmem:[#allocation6 + $0xe0] sm:$0xff] }
 0x93a   :  { %2727 = vpow2.f32 %v2583_v36 }
 0x93b   :  { %v1941_v6 = vpop.f32.mrf.mxu2 }
 0x93c   :  { %v1984_v44 = vadd.f32 %v4191_v49, %v1941_v6 }
 0x93f   :  { %v2726_v15 = vpop.eup %2725 }
 0x940   :  { %v2728_v24 = vpop.eup %2727  ;;  %v1948_v38 = vadd.f32 1.0, %v2726_v15  ;;  %v2316_v15 = vld [vmem:[#allocation6 + $0x60] sm:$0xff] }
 0x941   :  { %v1968_v21 = vadd.f32 1.0, %v2728_v24 }
 0x942   :  { %2729 = vrcp.f32 %v1948_v38  ;;  %v1960_v28 = vand.u32 2147483648, %v1948_v38  ;;  %v1958_v42 = vand.u32 2147483647, %v1948_v38  ;;  %vm1954_vm5 = vweird.f32 %v1948_v38 }
 0x943   :  { %2731 = vrcp.f32 %v1968_v21  ;;  %v1980_v54 = vand.u32 2147483648, %v1968_v21  ;;  %vm1974_vm9 = vweird.f32 %v1968_v21  ;;  %v1978_v55 = vand.u32 2147483647, %v1968_v21 }
 0x944   :  { %v1961_v31 = vor.u32 1.1754944e-38, %v1960_v28  ;;  %vm1959_vm7 = vcmp.eq.f32.partialorder %v1958_v42, 8.507059e+37 }
 0x945   :  { %v1981_v61 = vor.u32 1.1754944e-38, %v1980_v54  ;;  %vm1979_vm11 = vcmp.eq.f32.partialorder %v1978_v55, 8.507059e+37 }
 0x948   :  { %v2730_v10 = vpop.eup %2729 }
 0x949   :  { %v2732_v34 = vpop.eup %2731  ;;  %v1950_v35 = vmul.f32 %v2730_v10, %v1948_v38  ;;  %vm1955_vm0 = vweird.f32 %v2730_v10 }
 0x94a   :  { %v1970_v57 = vmul.f32 %v2732_v34, %v1968_v21  ;;  %vm1956_vm6 = vmor %vm1954_vm5, %vm1955_vm0  ;;  %vm1975_vm8 = vweird.f32 %v2732_v34 }
 0x94b   :  { %v1951_v53 = vsub.f32 1.0, %v1950_v35  ;;  %vm1976_vm10 = vmor %vm1974_vm9, %vm1975_vm8 }
 0x94c   :  { %v1971_v11 = vsub.f32 1.0, %v1970_v57 }
 0x94d   :  { %v1952_v17 = vmul.f32 %v2730_v10, %v1951_v53 }
 0x94e   :  { %v1972_v26 = vmul.f32 %v2732_v34, %v1971_v11 }
 0x94f   :  { %v1953_v41 = vadd.f32 %v2730_v10, %v1952_v17  ;;  %v4552_v17 = vld [vmem:[#allocation8 + $0xa] ss:$0 sm:$0xff] }
 0x950   :  { %v1973_v47 = vadd.f32 %v2732_v34, %v1972_v26 }
 0x951   :  { %v1957_v37 = vsel %vm1956_vm6, %v2730_v10, %v1953_v41 }
 0x952   :  { %v1962_v23 = vsel %vm1959_vm7, %v1961_v31, %v1957_v37  ;;  %v1977_v63 = vsel %vm1976_vm10, %v2732_v34, %v1973_v47 }
 0x953   :  { %v1985_v48 = vmul.f32 %v1984_v44, %v1962_v23  ;;  %v1982_v9 = vsel %vm1979_vm11, %v1981_v61, %v1977_v63  ;;  %v4775_v23 = vld [vmem:[#allocation39_spill] sm:$0xff] }
 0x954   :  { %v1988_v22 = vsub.f32 1.0, %v1982_v9  ;;  %v1990_v49 = vmul.f32 %v1982_v9, %v4447_v7 }
 0x955   :  { %v1986_v56 = vadd.f32 %v1985_v48, %v4772_v39 }
 0x957   :  { %2733 = vtanh.f32 %v1986_v56 }
 0x95d   :  { %v2734_v60 = vpop.eup %2733 }
 0x95e   :  { %v1989_v43 = vmul.f32 %v2734_v60, %v1988_v22  ;;  %v4776_v22 = vld [vmem:[#allocation21_spill] sm:$0xff] }
 0x95f   :  { %v2362_v60 = vld [vmem:[#allocation6 + $0x7e8] sm:$0xff] }
 0x960   :  { %v4529_v18 = vadd.f32 %v1990_v49, %v1989_v43  ;;  %v2363_v43 = vld [vmem:[#allocation6 + $0x7f0] sm:$0xff]  ;;  %v2359_v49 = vld [vmem:[#allocation6 + $0x768] sm:$0xff] }
 0x962   :  { %2008 = vmatmul.f32.vlgmr.msrb.gmra.mxu3 %v4529_v18  ;;  %2028 = vmatmul.f32.vlgmr.msrb.gmra.mxu0 %v4529_v18 }
 0x963   :  { %2048 = vmatmul.f32.vlgmr.msra.gmra.mxu1 %v4529_v18  ;;  %2248 = vmatpush.msrb.mxu3 %v4370_v40  ;;  %v2361_v40 = vld [vmem:[#allocation6 + $0x7e0] sm:$0xff] }
 0x964   :  { %2372 = vmatpush.msrb.mxu0 %v2361_v40  ;;  %2392 = vmatpush.msra.mxu1 %v2362_v60  ;;  %v2360_v40 = vld [vmem:[#allocation6 + $0x770] sm:$0xff] }
 0x965   :  { %2249 = vmatpush.msrb.mxu3 %v4375_v4 }
 0x966   :  { %2393 = vmatpush.msra.mxu1 %v2359_v49 }
 0x967   :  { %2250 = vmatpush.msrb.mxu3 %v4380_v51  ;;  %v2358_v51 = vld [vmem:[#allocation6 + $0x760] sm:$0xff] }
 0x968   :  { %2373 = vmatpush.msrb.mxu0 %v2358_v51  ;;  %v2353_v51 = vld [vmem:[#allocation6 + $0x668] sm:$0xff] }
 0x969   :  { %2251 = vmatpush.msrb.mxu3 %v4385_v8  ;;  %v4773_v8 = vld [vmem:[#allocation30_spill] sm:$0xff] }
 0x96a   :  { %2374 = vmatpush.msrb.mxu0 %v2355_v27  ;;  %v2351_v27 = vld [vmem:[#allocation6 + $0x5f0] sm:$0xff] }
 0x96b   :  { %2252 = vmatpush.msrb.mxu3 %v4464_v33  ;;  %v2346_v33 = vld [vmem:[#allocation6 + $0x560] sm:$0xff] }
 0x96c   :  { %2375 = vmatpush.msrb.mxu0 %v2352_v59 }
 0x96d   :  { %2253 = vmatpush.msrb.mxu3 %v4469_v20  ;;  %v4774_v20 = vld [vmem:[#allocation32_spill] sm:$0xff] }
 0x96e   :  { %2376 = vmatpush.msrb.mxu0 %v2349_v1  ;;  %v2347_v1 = vld [vmem:[#allocation6 + $0x568] sm:$0xff] }
 0x96f   :  { %2254 = vmatpush.msrb.mxu3 %v4474_v32 }
 0x970   :  { %2377 = vmatpush.msrb.mxu0 %v2346_v33  ;;  %v4777_v33 = vld [vmem:[#allocation20_spill] sm:$0xff] }
 0x971   :  { %2255 = vmatpush.msrb.mxu3 %v4479_v12  ;;  %v2343_v12 = vld [vmem:[#allocation6 + $0x4e0] sm:$0xff] }
 0x972   :  { %2378 = vmatpush.msrb.mxu0 %v2343_v12 }
 0x973   :  { %2256 = vmatpush.msrb.mxu3 %v4484_v45 }
 0x975   :  { %2257 = vmatpush.msrb.mxu3 %v4489_v58  ;;  %v2340_v58 = vld [vmem:[#allocation6 + $0x460] sm:$0xff] }
 0x976   :  { %2379 = vmatpush.msrb.mxu0 %v2340_v58  ;;  %v2345_v58 = vld [vmem:[#allocation6 + $0x4f0] sm:$0xff] }
 0x977   :  { %2258 = vmatpush.msrb.mxu3 %v4494_v19 }
 0x979   :  { %2259 = vmatpush.msrb.mxu3 %v4499_v29 }
 0x97b   :  { %2260 = vmatpush.msrb.mxu3 %v4504_v0  ;;  %v2337_v0 = vld [vmem:[#allocation6 + $0x3e0] sm:$0xff] }
 0x97c   :  { %2380 = vmatpush.msrb.mxu0 %v2337_v0  ;;  %v2341_v0 = vld [vmem:[#allocation6 + $0x468] sm:$0xff] }
 0x97d   :  { %2261 = vmatpush.msrb.mxu3 %v4509_v25  ;;  %v2334_v25 = vld [vmem:[#allocation6 + $0x360] sm:$0xff] }
 0x97e   :  { %2381 = vmatpush.msrb.mxu0 %v2334_v25  ;;  %v2342_v25 = vld [vmem:[#allocation6 + $0x470] sm:$0xff] }
 0x97f   :  { %2262 = vmatpush.msrb.mxu3 %v4514_v2  ;;  %v2331_v2 = vld [vmem:[#allocation6 + $0x2e0] sm:$0xff] }
 0x980   :  { %2382 = vmatpush.msrb.mxu0 %v2331_v2  ;;  %v2338_v2 = vld [vmem:[#allocation6 + $0x3e8] sm:$0xff] }
 0x981   :  { %2263 = vmatpush.msrb.mxu3 %v4519_v52 }
 0x982   :  { %2383 = vmatpush.msrb.mxu0 %v2328_v3  ;;  %v2336_v3 = vld [vmem:[#allocation6 + $0x370] sm:$0xff] }
 0x984   :  { %2384 = vmatpush.msrb.mxu0 %v2325_v5  ;;  %v2333_v5 = vld [vmem:[#allocation6 + $0x2f0] sm:$0xff] }
 0x986   :  { %2385 = vmatpush.msrb.mxu0 %v2322_v13 }
 0x988   :  { %2386 = vmatpush.msrb.mxu0 %v2319_v30 }
 0x98a   :  { %2387 = vmatpush.msrb.mxu0 %v2316_v15  ;;  %v2330_v15 = vld [vmem:[#allocation6 + $0x270] sm:$0xff] }
 0x9df   :  { %v2029_v4 = vpop.f32.mrf.mxu0 }
 0x9e0   :  { %v2072_v46 = vadd.f32 %v2029_v4, %v4773_v8  ;;  %v2049_v53 = vpop.f32.mrf.mxu1  ;;  %v2356_v4 = vld [vmem:[#allocation6 + $0x6e8] sm:$0xff]  ;;  %v2354_v8 = vld [vmem:[#allocation6 + $0x670] sm:$0xff] }
 0x9e1   :  { %v2092_v42 = vadd.f32 %v4552_v17, %v2049_v53  ;;  %2394 = vmatpush.msra.mxu1 %v2356_v4 }
 0x9e2   :  { %v2585_v14 = vmul.f32 -1.442695, %v2072_v46  ;;  %v2350_v46 = vld [vmem:[#allocation6 + $0x5e8] sm:$0xff] }
 0x9e3   :  { %2395 = vmatpush.msra.mxu1 %v2353_v51 }
 0x9e4   :  { %2735 = vpow2.f32 %v2585_v14 }
 0x9e5   :  { %v2009_v7 = vpop.f32.mrf.mxu3  ;;  %2396 = vmatpush.msra.mxu1 %v2350_v46 }
 0x9e6   :  { %v2052_v32 = vadd.f32 %v2009_v7, %v4774_v20  ;;  %v2348_v7 = vld [vmem:[#allocation6 + $0x570] sm:$0xff] }
 0x9e7   :  { %2397 = vmatpush.msra.mxu1 %v2347_v1 }
 0x9e8   :  { %v2584_v45 = vmul.f32 -1.442695, %v2052_v32  ;;  %v4778_v32 = vld [vmem:[#allocation16_spill] sm:$0xff] }
 0x9ea   :  { %v2736_v19 = vpop.eup %2735  ;;  %2737 = vpow2.f32 %v2584_v45  ;;  %v2344_v45 = vld [vmem:[#allocation6 + $0x4e8] sm:$0xff] }
 0x9eb   :  { %v2076_v29 = vadd.f32 1.0, %v2736_v19  ;;  %2398 = vmatpush.msra.mxu1 %v2344_v45 }
 0x9ed   :  { %2739 = vrcp.f32 %v2076_v29  ;;  %v2088_v31 = vand.u32 2147483648, %v2076_v29  ;;  %vm2082_vm2 = vweird.f32 %v2076_v29  ;;  %v2086_v44 = vand.u32 2147483647, %v2076_v29  ;;  %2399 = vmatpush.msra.mxu1 %v2341_v0 }
 0x9ef   :  { %v2089_v54 = vor.u32 1.1754944e-38, %v2088_v31  ;;  %vm2087_vm4 = vcmp.eq.f32.partialorder %v2086_v44, 8.507059e+37  ;;  %2400 = vmatpush.msra.mxu1 %v2338_v2 }
 0x9f0   :  { %v2738_v52 = vpop.eup %2737 }
 0x9f1   :  { %v2056_v50 = vadd.f32 1.0, %v2738_v52  ;;  %v2339_v52 = vld [vmem:[#allocation6 + $0x3f0] sm:$0xff] }
 0x9f3   :  { %2741 = vrcp.f32 %v2056_v50  ;;  %v2740_v16 = vpop.eup %2739  ;;  %v2068_v10 = vand.u32 2147483648, %v2056_v50  ;;  %v2066_v35 = vand.u32 2147483647, %v2056_v50  ;;  %vm2062_vm13 = vweird.f32 %v2056_v50 }
 0x9f4   :  { %v2078_v62 = vmul.f32 %v2740_v16, %v2076_v29  ;;  %vm2083_vm1 = vweird.f32 %v2740_v16 }
 0x9f5   :  { %v2069_v28 = vor.u32 1.1754944e-38, %v2068_v10  ;;  %vm2067_vm15 = vcmp.eq.f32.partialorder %v2066_v35, 8.507059e+37  ;;  %vm2084_vm3 = vmor %vm2082_vm2, %vm2083_vm1  ;;  %v2323_v10 = vld [vmem:[#allocation6 + $0x168] sm:$0xff] }
 0x9f6   :  { %v2079_v38 = vsub.f32 1.0, %v2078_v62  ;;  %v2320_v35 = vld [vmem:[#allocation6 + $0xe8] sm:$0xff] }
 0x9f8   :  { %v2080_v57 = vmul.f32 %v2740_v16, %v2079_v38  ;;  %v2326_v38 = vld [vmem:[#allocation6 + $0x1e8] sm:$0xff] }
 0x9f9   :  { %v2742_v36 = vpop.eup %2741 }
 0x9fa   :  { %v2058_v24 = vmul.f32 %v2742_v36, %v2056_v50  ;;  %vm2063_vm12 = vweird.f32 %v2742_v36  ;;  %v2081_v6 = vadd.f32 %v2740_v16, %v2080_v57  ;;  %v2335_v50 = vld [vmem:[#allocation6 + $0x368] sm:$0xff]  ;;  %v2321_v57 = vld [vmem:[#allocation6 + $0xf0] sm:$0xff] }
 0x9fb   :  { %vm2064_vm14 = vmor %vm2062_vm13, %vm2063_vm12  ;;  %2401 = vmatpush.msra.mxu1 %v2335_v50 }
 0x9fc   :  { %v2059_v21 = vsub.f32 1.0, %v2058_v24  ;;  %v2085_v48 = vsel %vm2084_vm3, %v2740_v16, %v2081_v6  ;;  %v2332_v16 = vld [vmem:[#allocation6 + $0x2e8] sm:$0xff] }
 0x9fd   :  { %v2090_v55 = vsel %vm2087_vm4, %v2089_v54, %v2085_v48  ;;  %2402 = vmatpush.msra.mxu1 %v2332_v16  ;;  %v2493_v16 = vld [vmem:[#allocation6 + $0x578] sm:$0xff] }
 0x9fe   :  { %v2060_v34 = vmul.f32 %v2742_v36, %v2059_v21  ;;  %v2096_v39 = vsub.f32 1.0, %v2090_v55  ;;  %v2098_v61 = vmul.f32 %v2090_v55, %v4529_v18  ;;  %v2357_v18 = vld [vmem:[#allocation6 + $0x6f0] sm:$0xff] }
 0x9ff   :  { %v2327_v21 = vld [vmem:[#allocation6 + $0x1f0] sm:$0xff] }
 0xa00   :  { %v2061_v11 = vadd.f32 %v2742_v36, %v2060_v34  ;;  %v2324_v34 = vld [vmem:[#allocation6 + $0x170] sm:$0xff] }
 0xa02   :  { %v2065_v26 = vsel %vm2064_vm14, %v2742_v36, %v2061_v11  ;;  %v2329_v36 = vld [vmem:[#allocation6 + $0x268] sm:$0xff] }
 0xa03   :  { %v2070_v41 = vsel %vm2067_vm15, %v2069_v28, %v2065_v26  ;;  %2403 = vmatpush.msra.mxu1 %v2329_v36  ;;  %v2317_v11 = vld [vmem:[#allocation6 + $0x68] sm:$0xff]  ;;  %v2318_v28 = vld [vmem:[#allocation6 + $0x70] sm:$0xff]  ;;  %v2492_v36 = vld [vmem:[#allocation6 + $0x4f8] sm:$0xff] }
 0xa04   :  { %v2093_v37 = vmul.f32 %v2092_v42, %v2070_v41 }
 0xa05   :  { %2404 = vmatpush.msra.mxu1 %v2326_v38 }
 0xa06   :  { %v2094_v47 = vadd.f32 %v2093_v37, %v4775_v23 }
 0xa07   :  { %2405 = vmatpush.msra.mxu1 %v2323_v10 }
 0xa08   :  { %2743 = vtanh.f32 %v2094_v47 }
 0xa09   :  { %2406 = vmatpush.msra.mxu1 %v2320_v35 }
 0xa0b   :  { %2407 = vmatpush.msra.mxu1 %v2317_v11 }
 0xa0e   :  { %v2744_v56 = vpop.eup %2743 }
 0xa0f   :  { %v2097_v63 = vmul.f32 %v2744_v56, %v2096_v39 }
 0xa11   :  { %v4557_v9 = vadd.f32 %v2098_v61, %v2097_v63 }
 0xa13   :  { %2116 = vmatmul.f32.vlgmr.msrb.gmra.mxu2 %v4557_v9  ;;  %2136 = vmatmul.f32.vlgmr.msra.gmra.mxu3 %v4557_v9 }
 0xa14   :  { %2156 = vmatmul.f32.vlgmr.msra.gmra.mxu0 %v4557_v9  ;;  %2412 = vmatpush.msrb.mxu2 %v2363_v43 }
 0xa16   :  { %2413 = vmatpush.msrb.mxu2 %v2360_v40  ;;  %v4779_v40 = vld [vmem:[#allocation34_spill] sm:$0xff] }
 0xa18   :  { %2414 = vmatpush.msrb.mxu2 %v2357_v18 }
 0xa1a   :  { %2415 = vmatpush.msrb.mxu2 %v2354_v8 }
 0xa1c   :  { %2388 = vmatmul.f32.vlgmr.msrb.gmra.mxu0 %v4776_v22  ;;  %2416 = vmatpush.msrb.mxu2 %v2351_v27 }
 0xa1e   :  { %2417 = vmatpush.msrb.mxu2 %v2348_v7  ;;  %v4575_v7 = vld [vmem:[#allocation8 + $0x6] sm:$0x7] }
 0xa20   :  { %2418 = vmatpush.msrb.mxu2 %v2345_v58  ;;  %v2498_v58 = vld [vmem:[#allocation6 + $0x7f8] sm:$0xff] }
 0xa21   :  { %2503 = vmatpush.msra.mxu3 %v2498_v58 }
 0xa22   :  { %2419 = vmatpush.msrb.mxu2 %v2342_v25  ;;  %v4780_v25 = vld [vmem:[#allocation24_spill] sm:$0xff] }
 0xa24   :  { %2420 = vmatpush.msrb.mxu2 %v2339_v52  ;;  %v2494_v52 = vld [vmem:[#allocation6 + $0x5f8] sm:$0xff] }
 0xa26   :  { %2421 = vmatpush.msrb.mxu2 %v2336_v3 }
 0xa28   :  { %2422 = vmatpush.msrb.mxu2 %v2333_v5  ;;  %v4781_v5 = vld [vmem:[#allocation23_spill] sm:$0xff] }
 0xa2a   :  { %2423 = vmatpush.msrb.mxu2 %v2330_v15 }
 0xa2c   :  { %2424 = vmatpush.msrb.mxu2 %v2327_v21  ;;  %v2491_v21 = vld [vmem:[#allocation6 + $0x478] sm:$0xff] }
 0xa2e   :  { %2425 = vmatpush.msrb.mxu2 %v2324_v34 }
 0xa30   :  { %2426 = vmatpush.msrb.mxu2 %v2321_v57  ;;  %v2490_v57 = vld [vmem:[#allocation6 + $0x3f8] sm:$0xff] }
 0xa32   :  { %2427 = vmatpush.msrb.mxu2 %v2318_v28 }
 0xa91   :  { %v2157_v47 = vpop.f32.mrf.mxu0 }
 0xa92   :  { %v2200_v39 = vadd.f32 %v4552_v17, %v2157_v47 }
 0xa96   :  { %v2117_v14 = vpop.f32.mrf.mxu2  ;;  %v2137_v59 = vpop.f32.mrf.mxu3 }
 0xa97   :  { %v2160_v20 = vadd.f32 %v2117_v14, %v4777_v33  ;;  %v2180_v12 = vadd.f32 %v2137_v59, %v4778_v32  ;;  %v2366_v33 = vperm.slane %v4575_v7, 0 }
 0xa99   :  { %v2586_v19 = vmul.f32 -1.442695, %v2160_v20  ;;  %v2587_v29 = vmul.f32 -1.442695, %v2180_v12  ;;  %v2389_v20 = vpop.f32.mrf.mxu0 }
 0xa9a   :  { %v2390_v32 = vadd.f32 %v2389_v20, %v2366_v33 }
 0xa9b   :  { %2745 = vpow2.f32 %v2586_v19  ;;  %v2497_v19 = vld [vmem:[#allocation6 + $0x778] sm:$0xff] }
 0xa9c   :  { %2747 = vpow2.f32 %v2587_v29  ;;  %v2590_v12 = vmul.f32 -1.442695, %v2390_v32  ;;  %2504 = vmatpush.msra.mxu3 %v2497_v19  ;;  %v2496_v29 = vld [vmem:[#allocation6 + $0x6f8] sm:$0xff] }
 0xa9e   :  { %2505 = vmatpush.msra.mxu3 %v2496_v29 }
 0xaa1   :  { %v2746_v13 = vpop.eup %2745 }
 0xaa2   :  { %v2748_v62 = vpop.eup %2747  ;;  %v2164_v30 = vadd.f32 1.0, %v2746_v13  ;;  %v4782_v13 = vld [vmem:[#allocation33_spill] sm:$0xff] }
 0xaa3   :  { %v2184_v24 = vadd.f32 1.0, %v2748_v62  ;;  %v1409_v62 = vadd.f32 %v4782_v13, %v4781_v5 }
 0xaa4   :  { %2749 = vrcp.f32 %v2164_v30  ;;  %v2176_v31 = vand.u32 2147483648, %v2164_v30  ;;  %v2174_v23 = vand.u32 2147483647, %v2164_v30  ;;  %vm2170_vm5 = vweird.f32 %v2164_v30 }
 0xaa5   :  { %2751 = vrcp.f32 %v2184_v24  ;;  %v2196_v60 = vand.u32 2147483648, %v2184_v24  ;;  %vm2190_vm9 = vweird.f32 %v2184_v24  ;;  %v2194_v49 = vand.u32 2147483647, %v2184_v24 }
 0xaa6   :  { %v2177_v55 = vor.u32 1.1754944e-38, %v2176_v31  ;;  %vm2175_vm7 = vcmp.eq.f32.partialorder %v2174_v23, 8.507059e+37  ;;  %v2487_v31 = vld [vmem:[#allocation6 + $0x278] sm:$0xff] }
 0xaa7   :  { %v2197_v51 = vor.u32 1.1754944e-38, %v2196_v60  ;;  %vm2195_vm11 = vcmp.eq.f32.partialorder %v2194_v49, 8.507059e+37  ;;  %v2368_v49 = vperm.slane %v4575_v7, 2 }
 0xaaa   :  { %v2750_v53 = vpop.eup %2749 }
 0xaab   :  { %v2752_v42 = vpop.eup %2751  ;;  %v2166_v26 = vmul.f32 %v2750_v53, %v2164_v30  ;;  %vm2171_vm0 = vweird.f32 %v2750_v53  ;;  %v2367_v30 = vperm.slane %v4575_v7, 1 }
 0xaac   :  { %v2186_v6 = vmul.f32 %v2752_v42, %v2184_v24  ;;  %vm2172_vm6 = vmor %vm2170_vm5, %vm2171_vm0  ;;  %vm2191_vm8 = vweird.f32 %v2752_v42 }
 0xaad   :  { %v2167_v41 = vsub.f32 1.0, %v2166_v26  ;;  %vm2192_vm10 = vmor %vm2190_vm9, %vm2191_vm8 }
 0xaae   :  { %v2187_v37 = vsub.f32 1.0, %v2186_v6  ;;  %v2488_v6 = vld [vmem:[#allocation6 + $0x2f8] sm:$0xff] }
 0xaaf   :  { %v2168_v44 = vmul.f32 %v2750_v53, %v2167_v41 }
 0xab0   :  { %v2188_v48 = vmul.f32 %v2752_v42, %v2187_v37 }
 0xab1   :  { %v2169_v54 = vadd.f32 %v2750_v53, %v2168_v44  ;;  %v2486_v44 = vld [vmem:[#allocation6 + $0x1f8] sm:$0xff] }
 0xab2   :  { %v2189_v61 = vadd.f32 %v2752_v42, %v2188_v48 }
 0xab3   :  { %v2173_v56 = vsel %vm2172_vm6, %v2750_v53, %v2169_v54 }
 0xab4   :  { %v2178_v63 = vsel %vm2175_vm7, %v2177_v55, %v2173_v56  ;;  %v2193_v18 = vsel %vm2192_vm10, %v2752_v42, %v2189_v61  ;;  %v2489_v42 = vld [vmem:[#allocation6 + $0x378] sm:$0xff] }
 0xab5   :  { %v2201_v43 = vmul.f32 %v2200_v39, %v2178_v63  ;;  %v2198_v8 = vsel %vm2195_vm11, %v2197_v51, %v2193_v18  ;;  %v2485_v55 = vld [vmem:[#allocation6 + $0x178] sm:$0xff] }
 0xab6   :  { %v2204_v46 = vsub.f32 1.0, %v2198_v8  ;;  %v2206_v59 = vmul.f32 %v2198_v8, %v4557_v9  ;;  %v2483_v8 = vld [vmem:[#allocation6 + $0x78] sm:$0xff] }
 0xab7   :  { %v2202_v4 = vadd.f32 %v2201_v43, %v4779_v40  ;;  %v2484_v43 = vld [vmem:[#allocation6 + $0xf8] sm:$0xff] }
 0xab9   :  { %2753 = vtanh.f32 %v2202_v4 }
 0xaba   :  { %2755 = vpow2.f32 %v2590_v12 }
 0xabf   :  { %v2754_v27 = vpop.eup %2753 }
 0xac0   :  { %v2205_v14 = vmul.f32 %v2754_v27, %v2204_v46  ;;  %v2756_v9 = vpop.eup %2755  ;;  %v2603_v27 = vld [vmem:[#allocation8 + $0xb] ss:$0 sm:$0xff] }
 0xac1   :  { %v4578_v45 = vadd.f32 1.0, %v2756_v9 }
 0xac2   :  { %v4568_v1 = vadd.f32 %v2206_v59, %v2205_v14 }
 0xac3   :  { %2757 = vrcp.f32 %v4578_v45  ;;  %v2448_v54 = vand.u32 2147483648, %v4578_v45  ;;  %vm2442_vm13 = vweird.f32 %v4578_v45  ;;  %v2446_v56 = vand.u32 2147483647, %v4578_v45 }
 0xac4   :  { %2224 = vmatmul.f32.vlgmr.msrb.gmra.mxu1 %v4568_v1  ;;  %2244 = vmatmul.f32.vlgmr.msra.gmra.mxu2 %v4568_v1 }
 0xac5   :  { %2264 = vmatmul.f32.vlgmr.msrb.gmra.mxu3 %v4568_v1  ;;  %v2449_v51 = vor.u32 1.1754944e-38, %v2448_v54  ;;  %vm2447_vm15 = vcmp.eq.f32.partialorder %v2446_v56, 8.507059e+37 }
 0xac9   :  { %v4582_v50 = vpop.eup %2757 }
 0xaca   :  { %v2438_v15 = vmul.f32 %v4582_v50, %v4578_v45  ;;  %vm2443_vm12 = vweird.f32 %v4582_v50 }
 0xacb   :  { %vm4600_vm14 = vmor %vm2442_vm13, %vm2443_vm12 }
 0xacc   :  { %2408 = vmatmul.f32.vlgmr.msra.gmra.mxu1 %v4776_v22  ;;  %2428 = vmatmul.f32.vlgmr.msrb.gmra.mxu2 %v4776_v22  ;;  %v2495_v22 = vld [vmem:[#allocation6 + $0x678] sm:$0xff]  ;;  %v2439_v53 = vsub.f32 1.0, %v2438_v15 }
 0xacd   :  { %2506 = vmatpush.msra.mxu3 %v2495_v22 }
 0xace   :  { %v2440_v41 = vmul.f32 %v4582_v50, %v2439_v53 }
 0xacf   :  { %2507 = vmatpush.msra.mxu3 %v2494_v52 }
 0xad0   :  { %v2441_v47 = vadd.f32 %v4582_v50, %v2440_v41 }
 0xad1   :  { %2508 = vmatpush.msra.mxu3 %v2493_v16 }
 0xad2   :  { %v2445_v40 = vsel %vm4600_vm14, %v4582_v50, %v2441_v47 }
 0xad3   :  { %2509 = vmatpush.msra.mxu3 %v2492_v36  ;;  %v2450_v33 = vsel %vm2447_vm15, %v2449_v51, %v2445_v40 }
 0xad4   :  { %v2473_v58 = vmul.f32 %v2603_v27, %v2450_v33 }
 0xad5   :  { %2510 = vmatpush.msra.mxu3 %v2491_v21 }
 0xad7   :  { %2511 = vmatpush.msra.mxu3 %v2490_v57 }
 0xad9   :  { %2512 = vmatpush.msra.mxu3 %v2489_v42 }
 0xadb   :  { %2513 = vmatpush.msra.mxu3 %v2488_v6 }
 0xadd   :  { %2514 = vmatpush.msra.mxu3 %v2487_v31 }
 0xadf   :  { %2515 = vmatpush.msra.mxu3 %v2486_v44 }
 0xae1   :  { %2516 = vmatpush.msra.mxu3 %v2485_v55 }
 0xae3   :  { %2517 = vmatpush.msra.mxu3 %v2484_v43 }
 0xae5   :  { %2518 = vmatpush.msra.mxu3 %v2483_v8 }
 0xb41   :  { %v2225_v0 = vpop.f32.mrf.mxu1 }
 0xb42   :  { %v2268_v2 = vadd.f32 %v2225_v0, %v4780_v25  ;;  %v4785_v25 = vld [vmem:[#allocation17_spill] sm:$0xff] }
 0xb44   :  { %v2588_v3 = vmul.f32 -1.442695, %v2268_v2  ;;  %v4786_v2 = vld [vmem:[#allocation31_spill] sm:$0xff] }
 0xb45   :  { %v1450_v52 = vadd.f32 %v4786_v2, %v4785_v25 }
 0xb46   :  { %2759 = vpow2.f32 %v2588_v3 }
 0xb47   :  { %v2245_v24 = vpop.f32.mrf.mxu2 }
 0xb48   :  { %v2288_v38 = vadd.f32 %v2245_v24, %v1409_v62  ;;  %v2265_v20 = vpop.f32.mrf.mxu3 }
 0xb49   :  { %v2409_v10 = vpop.f32.mrf.mxu1  ;;  %v2308_v0 = vadd.f32 %v4552_v17, %v2265_v20 }
 0xb4a   :  { %v2589_v34 = vmul.f32 -1.442695, %v2288_v38  ;;  %v2410_v35 = vadd.f32 %v2409_v10, %v2367_v30 }
 0xb4c   :  { %v2760_v11 = vpop.eup %2759  ;;  %2761 = vpow2.f32 %v2589_v34  ;;  %v2591_v28 = vmul.f32 -1.442695, %v2410_v35 }
 0xb4d   :  { %v2272_v26 = vadd.f32 1.0, %v2760_v11 }
 0xb4e   :  { %2763 = vpow2.f32 %v2591_v28 }
 0xb4f   :  { %2765 = vrcp.f32 %v2272_v26  ;;  %v2429_v18 = vpop.f32.mrf.mxu2  ;;  %v2284_v46 = vand.u32 2147483648, %v2272_v26  ;;  %v2282_v59 = vand.u32 2147483647, %v2272_v26  ;;  %vm2278_vm2 = vweird.f32 %v2272_v26 }
 0xb50   :  { %v2430_v32 = vadd.f32 %v2429_v18, %v2368_v49 }
 0xb51   :  { %v2285_v45 = vor.u32 1.1754944e-38, %v2284_v46  ;;  %vm2283_vm4 = vcmp.eq.f32.partialorder %v2282_v59, 8.507059e+37 }
 0xb52   :  { %v2762_v37 = vpop.eup %2761  ;;  %v2474_v16 = vadd.f32 %v2473_v58, %v2430_v32 }
 0xb53   :  { %v4590_v23 = vadd.f32 1.0, %v2762_v37 }
 0xb54   :  { %v2764_v48 = vpop.eup %2763 }
 0xb55   :  { %v2766_v39 = vpop.eup %2765  ;;  %2767 = vrcp.f32 %v4590_v23  ;;  %v4598_v61 = vadd.f32 1.0, %v2764_v48  ;;  %v2304_v13 = vand.u32 2147483648, %v4590_v23  ;;  %v2302_v30 = vand.u32 2147483647, %v4590_v23 }
 0xb56   :  { %v2274_v63 = vmul.f32 %v2766_v39, %v2272_v26  ;;  %vm2279_vm1 = vweird.f32 %v2766_v39  ;;  %vm2298_vm5 = vweird.f32 %v4590_v23 }
 0xb57   :  { %2769 = vrcp.f32 %v4598_v61  ;;  %vm2280_vm3 = vmor %vm2278_vm2, %vm2279_vm1  ;;  %v2468_v17 = vand.u32 2147483648, %v4598_v61  ;;  %v2466_v21 = vand.u32 2147483647, %v4598_v61  ;;  %v2305_v10 = vor.u32 1.1754944e-38, %v2304_v13 }
 0xb58   :  { %v2275_v4 = vsub.f32 1.0, %v2274_v63  ;;  %2771 = vtanh.f32 %v2474_v16  ;;  %vm2303_vm8 = vcmp.eq.f32.partialorder %v2302_v30, 8.507059e+37  ;;  %vm2462_vm9 = vweird.f32 %v4598_v61 }
 0xb59   :  { %v2469_v53 = vor.u32 1.1754944e-38, %v2468_v17  ;;  %vm2467_vm11 = vcmp.eq.f32.partialorder %v2466_v21, 8.507059e+37 }
 0xb5a   :  { %v2276_v14 = vmul.f32 %v2766_v39, %v2275_v4 }
 0xb5b   :  { %v2768_v7 = vpop.eup %2767 }
 0xb5c   :  { %v2294_v12 = vmul.f32 %v2768_v7, %v4590_v23  ;;  %v2277_v9 = vadd.f32 %v2766_v39, %v2276_v14  ;;  %vm2299_vm0 = vweird.f32 %v2768_v7 }
 0xb5d   :  { %v2770_v19 = vpop.eup %2769  ;;  %vm2300_vm6 = vmor %vm2298_vm5, %vm2299_vm0 }
 0xb5e   :  { %v2295_v29 = vsub.f32 1.0, %v2294_v12  ;;  %v2281_v22 = vsel %vm2280_vm3, %v2766_v39, %v2277_v9  ;;  %v2458_v3 = vmul.f32 %v2770_v19, %v4598_v61  ;;  %vm2463_vm7 = vweird.f32 %v2770_v19  ;;  %v2772_v42 = vpop.eup %2771  ;;  %v2604_v39 = vld [vmem:[#allocation8 + $0xc] ss:$0 sm:$0xff] }
 0xb5f   :  { %v2286_v50 = vsel %vm2283_vm4, %v2285_v45, %v2281_v22  ;;  %vm2464_vm10 = vmor %vm2462_vm9, %vm2463_vm7 }
 0xb60   :  { %v2296_v5 = vmul.f32 %v2768_v7, %v2295_v29  ;;  %v2309_v62 = vmul.f32 %v2308_v0, %v2286_v50  ;;  %v2459_v36 = vsub.f32 1.0, %v2458_v3 }
 0xb62   :  { %v2297_v15 = vadd.f32 %v2768_v7, %v2296_v5  ;;  %v2310_v24 = vadd.f32 %v2309_v62, %v1450_v52  ;;  %v2460_v38 = vmul.f32 %v2770_v19, %v2459_v36 }
 0xb64   :  { %v2301_v34 = vsel %vm2300_vm6, %v2768_v7, %v2297_v15  ;;  %2773 = vtanh.f32 %v2310_v24  ;;  %v2461_v35 = vadd.f32 %v2770_v19, %v2460_v38 }
 0xb65   :  { %v2306_v57 = vsel %vm2303_vm8, %v2305_v10, %v2301_v34 }
 0xb66   :  { %v2465_v11 = vsel %vm2464_vm10, %v2770_v19, %v2461_v35  ;;  %v2312_v26 = vsub.f32 1.0, %v2306_v57  ;;  %v2314_v37 = vmul.f32 %v2306_v57, %v4568_v1 }
 0xb67   :  { %v2470_v28 = vsel %vm2467_vm11, %v2469_v53, %v2465_v11 }
 0xb68   :  { %v2476_v6 = vsub.f32 1.0, %v2470_v28  ;;  %v2478_v23 = vmul.f32 0.0, %v2470_v28 }
 0xb6a   :  { %v2774_v41 = vpop.eup %2773  ;;  %v2477_v44 = vmul.f32 %v2772_v42, %v2476_v6 }
 0xb6b   :  { %v2313_v31 = vmul.f32 %v2774_v41, %v2312_v26 }
 0xb6c   :  { %v2479_v48 = vadd.f32 %v2478_v23, %v2477_v44 }
 0xb6d   :  { %v2315_v47 = vadd.f32 %v2314_v37, %v2313_v31 }
 0xb6f   :  { %v2480_v54 = vadd.f32 %v2479_v48, %v2315_v47 }
 0xb71   :  { %2775 = vtanh.f32 %v2480_v54 }
 0xb77   :  { %v2776_v55 = vpop.eup %2775 }
 0xb78   :  { %2482 = vst [vmem:[#allocation10] sm:$0xff] %v2776_v55  ;;  %2519 = vmatmul.f32.vlgmr.msra.gmra.mxu3 %v2776_v55 }
 0xb79   :  { %2545 = dma.vmem_to_hbm [thread:$0]  %s2541_s2, 128, %s2543_s8, [#allocation11]  }
 0xbfb   :  { %v2520_v1 = vpop.f32.mrf.mxu3 }
 0xbfc   :  { %v2521_v56 = vadd.f32 %v2604_v39, %v2520_v1 }
 0xbfe   :  { %2523 = vst [vmem:[#allocation9] sm:$0xff] %v2521_v56 }
 0xbff   :  { %2534 = dma.vmem_to_hbm [thread:$0]  %s2530_s10, 128, %s2532_s13, [#allocation5]  }
 0xc00   :  { %2999 = dma.done.wait [#allocation5], 128  }
 0xc01   :  { %3000 = vsyncadd [#allocation5], 4294967168 }
 0xc02   :  { %3001 = dma.done.wait [#allocation11], 128  }
 0xc03   :  { %3002 = vsyncadd [#allocation11], 4294967168 }
 0xc04   :  { %2554 = vsyncpa [#allocation4], 1 }
 0xc05   :  { %2555 = vsyncpa [#allocation7], 1 }
 0xc06   :  { %2556 = vsyncpa [#allocation5], 1 }
 0xc07   :  { %2557 = vsyncpa [#allocation11], 1 }

</bundles_post_ra>
